<compile_context>
chip_gen: v6e
topology: v6e:2x2x1
jax: 0.10.0
libtpu: 0.0.40
codegen_flags: <defaults>
</compile_context>

<pallas_src>
import jax
import jax.numpy as jnp
from jax.experimental import pallas as pl
from jax.experimental.pallas import tpu as pltpu


def _round_up(v, m):
    return (v + m - 1) // m * m


# ---------------------------------------------------------------------------
# Fused kernel: [3x3 conv (pad=1) + bias + ReLU] x num_convs  ->  2x2/2 maxpool
# One batch element per grid step. Each conv is a single MXU matmul with
# K = 9*cin (taps concatenated on the lane axis); the 1-pixel halo lives in a
# padded VMEM scratch that also carries activations between conv layers.
# ---------------------------------------------------------------------------
def _make_vgg_block_kernel(num_convs, H, W, Cin, Cout, Cout_p, Cmax):
    def kernel(*refs):
        x_ref = refs[0]                                  # (1, H, W, Cin) bf16
        wb_refs = refs[1:1 + 2 * num_convs]              # [(9*cin, Cout_p) bf16, (1, Cout_p) f32] * num_convs
        o_ref = refs[1 + 2 * num_convs]                  # (1, H//2, W//2, Cout_p) f32
        xpad_ref = refs[2 + 2 * num_convs]               # (H+2, W+2, Cmax) bf16 scratch

        zdt = xpad_ref.dtype
        # Zero ONLY the 1-pixel halo border (padding=1). The interior is fully
        # overwritten right below (and by inter-layer staging), so a full-scratch
        # memset would be pure wasted vector-store traffic.
        xpad_ref[0:1, :, :] = jnp.zeros((1, W + 2, Cmax), zdt)
        xpad_ref[H + 1:H + 2, :, :] = jnp.zeros((1, W + 2, Cmax), zdt)
        xpad_ref[:, 0:1, :] = jnp.zeros((H + 2, 1, Cmax), zdt)
        xpad_ref[:, W + 1:W + 2, :] = jnp.zeros((H + 2, 1, Cmax), zdt)

        # Stage the input tile into the interior of the padded scratch.
        xpad_ref[1:H + 1, 1:W + 1, 0:Cin] = x_ref[0]

        cin = Cin
        y = None
        for layer in range(num_convs):
            w_ref = wb_refs[2 * layer]          # (9 * cin, Cout_p) bf16, used whole
            b_ref = wb_refs[2 * layer + 1]      # (1, Cout_p) f32

            # im2col in registers: concatenate the 9 shifted 3x3 taps on the
            # channel (lane) axis -> (H, W, 9*cin), then ONE matmul per layer
            # with K = 9*cin. Accumulation over taps happens inside the MXU,
            # not as 8 full-map VALU add passes.
            col = jnp.concatenate(
                [xpad_ref[kh:kh + H, kw:kw + W, 0:cin]
                 for kh in range(3) for kw in range(3)],
                axis=-1)                                     # (H, W, 9*cin) bf16
            y = jax.lax.dot_general(
                col, w_ref[...],
                dimension_numbers=(((2,), (0,)), ((), ())),
                preferred_element_type=jnp.float32)          # (H, W, Cout_p) f32
            y = jnp.maximum(y + b_ref[0], 0.0)               # bias + ReLU, f32

            cin = Cout
            if layer + 1 < num_convs:
                # Stage only the real Cout channels for the next conv (padded
                # lanes are identically zero; staging them would only inflate K).
                xpad_ref[1:H + 1, 1:W + 1, 0:Cout] = y[:, :, 0:Cout].astype(zdt)

        # Fused 2x2 stride-2 max pool: H-pair max first (splits only the major
        # axis -> free), then W-pair max. The lane dim (Cout_p) stays dense, so
        # the final store is an unmasked full-lane store.
        yh = jnp.max(y.reshape(H // 2, 2, W, Cout_p), axis=1)
        yp = jnp.max(yh.reshape(H // 2, W // 2, 2, Cout_p), axis=2)
        o_ref[0] = yp.astype(o_ref.dtype)

    return kernel


def vgg_block(x_nchw, params):
    """Forward of VGGblock. x_nchw: (B, Cin, H, W) f32; params: [(w_hwio, b), ...]."""
    B, Cin, H, W = x_nchw.shape
    assert H % 2 == 0 and W % 2 == 0, "MaxPool2d(2,2) needs even spatial dims here"
    num_convs = len(params)
    Cout = params[0][0].shape[-1]
    Cout_p = _round_up(Cout, 128)      # lane-dense output / filled MXU N dimension
    Cmax = max(Cin, Cout)

    # NCHW -> NHWC; bf16 operands for the MXU (f32 accumulation inside the kernel).
    x = jnp.transpose(x_nchw, (0, 2, 3, 1)).astype(jnp.bfloat16)

    flat_inputs = [x]
    in_specs = [pl.BlockSpec((1, H, W, Cin), lambda i: (i, 0, 0, 0))]
    cin = Cin
    for (w, b) in params:
        assert w.shape == (3, 3, cin, Cout)
        # Zero-pad Cout to Cout_p lanes once; (K=9*cin, N=Cout_p) layout consumed
        # whole by the per-layer matmul (no per-tap weight slicing in the kernel).
        w_p = jnp.pad(w, ((0, 0), (0, 0), (0, 0), (0, Cout_p - Cout)))
        b_p = jnp.pad(b, (0, Cout_p - Cout))
        flat_inputs += [w_p.reshape(9 * cin, Cout_p).astype(jnp.bfloat16),
                        b_p.reshape(1, Cout_p).astype(jnp.float32)]
        in_specs += [
            pl.BlockSpec((9 * cin, Cout_p), lambda i: (0, 0)),
            pl.BlockSpec((1, Cout_p), lambda i: (0, 0)),
        ]
        cin = Cout

    kernel = _make_vgg_block_kernel(num_convs, H, W, Cin, Cout, Cout_p, Cmax)

    out_nhwc = pl.pallas_call(
        kernel,
        out_shape=jax.ShapeDtypeStruct((B, H // 2, W // 2, Cout_p), jnp.float32),
        grid=(B,),
        in_specs=in_specs,
        out_specs=pl.BlockSpec((1, H // 2, W // 2, Cout_p), lambda i: (i, 0, 0, 0)),
        scratch_shapes=[pltpu.VMEM((H + 2, W + 2, Cmax), jnp.bfloat16)],
        compiler_params=pltpu.CompilerParams(
            dimension_semantics=("parallel",),
            # Tiny per-step footprint at these shapes; re-derive together with the
            # row/Cout tiling for real VGG sizes (<= ~48 MiB headroom on v7x).
            vmem_limit_bytes=32 * 1024 * 1024),
    )(*flat_inputs)

    # Drop the zero-padded lanes; NHWC -> NCHW to match PyTorch.
    return jnp.transpose(out_nhwc[..., :Cout], (0, 3, 1, 2))


# ---------------------------------------------------------------------------
# Deterministic parameter init (mirrors nn.Conv2d default
# uniform(-1/sqrt(fan_in), 1/sqrt(fan_in)); weights stored HWIO).
# ---------------------------------------------------------------------------
def init_vggblock_params(key, in_channels, out_channels, num_convs):
    params = []
    cin = in_channels
    for _ in range(num_convs):
        key, kw, kb = jax.random.split(key, 3)
        fan_in = cin * 3 * 3
        bound = 1.0 / (fan_in ** 0.5)
        w = jax.random.uniform(kw, (3, 3, cin, out_channels), jnp.float32,
                               -bound, bound)
        b = jax.random.uniform(kb, (out_channels,), jnp.float32, -bound, bound)
        params.append((w, b))
        cin = out_channels
    return params


if __name__ == "__main__":
    key = jax.random.PRNGKey(0)
    kx, kp = jax.random.split(key)

    B, Cin, H, W = 2, 4, 16, 16
    Cout, num_convs = 8, 2

    x = jax.random.normal(kx, (B, Cin, H, W), jnp.float32)
    params = init_vggblock_params(kp, Cin, Cout, num_convs)

    out = jax.block_until_ready(vgg_block(x, params))
    assert out.shape == (B, Cout, H // 2, W // 2), out.shape

    # Reference with plain XLA ops, using the same bf16 operands / f32 accumulation
    # as the kernel (same math as the PyTorch forward, up to the bf16 operand cast).
    ref = jnp.transpose(x, (0, 2, 3, 1))
    for w, b in params:
        ref = jax.lax.conv_general_dilated(
            ref.astype(jnp.bfloat16), w.astype(jnp.bfloat16),
            window_strides=(1, 1), padding="SAME",
            dimension_numbers=("NHWC", "HWIO", "NHWC"),
            preferred_element_type=jnp.float32)
        ref = jnp.maximum(ref + b, 0.0)
    ref = jax.lax.reduce_window(ref, -jnp.inf, jax.lax.max,
                                (1, 2, 2, 1), (1, 2, 2, 1), "VALID")
    ref = jnp.transpose(ref, (0, 3, 1, 2))
    max_err = float(jnp.max(jnp.abs(out - ref)))
    assert jnp.allclose(out, ref, atol=1e-4, rtol=1e-4), max_err

    print("KERNEL_OK")
</pallas_src>

<mosaic_0001>
module attributes {stable_mosaic.version = 11 : i64} {
  func.func @kernel(%arg0: i32, %arg1: memref<1x16x16x4xbf16, #tpu.memory_space<vmem>>, %arg2: memref<36x128xbf16, #tpu.memory_space<vmem>>, %arg3: memref<1x128xf32, #tpu.memory_space<vmem>>, %arg4: memref<72x128xbf16, #tpu.memory_space<vmem>>, %arg5: memref<1x128xf32, #tpu.memory_space<vmem>>, %arg6: memref<1x8x8x128xf32, #tpu.memory_space<vmem>>, %arg7: memref<18x18x8xbf16, #tpu.memory_space<vmem>>) attributes {dimension_semantics = [#tpu.dimension_semantics<parallel>], iteration_bounds = array<i64: 2>, scalar_prefetch = 0 : i64, scratch_operands = 1 : i64, tpu.core_type = #tpu.core_type<tc>, window_params = [{transform_indices = @transform_0, window_bounds = array<i64: 1, 16, 16, 4>}, {pipeline_mode = #tpu.pipeline_mode<synchronous>, transform_indices = @transform_1, window_bounds = array<i64: 36, 128>}, {pipeline_mode = #tpu.pipeline_mode<synchronous>, transform_indices = @transform_2, window_bounds = array<i64: 1, 128>}, {pipeline_mode = #tpu.pipeline_mode<synchronous>, transform_indices = @transform_3, window_bounds = array<i64: 72, 128>}, {pipeline_mode = #tpu.pipeline_mode<synchronous>, transform_indices = @transform_4, window_bounds = array<i64: 1, 128>}, {transform_indices = @transform_5, window_bounds = array<i64: 1, 8, 8, 128>}]} {
    %cst = arith.constant 0.000000e+00 : bf16
    %0 = vector.broadcast %cst : bf16 to vector<1x18x8xbf16>
    %c0 = arith.constant 0 : index
    %c0_0 = arith.constant 0 : index
    %c0_1 = arith.constant 0 : index
    %1 = vector.load %arg7[%c0, %c0_0, %c0_1] : memref<18x18x8xbf16, #tpu.memory_space<vmem>>, vector<1x18x8xbf16>
    tpu.vector_store %arg7[%c0, %c0_0, %c0_1], %0 {strides = array<i32>} : memref<18x18x8xbf16, #tpu.memory_space<vmem>>, vector<1x18x8xbf16>,
    %cst_2 = arith.constant 0.000000e+00 : bf16
    %2 = vector.broadcast %cst_2 : bf16 to vector<1x18x8xbf16>
    %c17 = arith.constant 17 : index
    %c0_3 = arith.constant 0 : index
    %c0_4 = arith.constant 0 : index
    %3 = vector.load %arg7[%c17, %c0_3, %c0_4] : memref<18x18x8xbf16, #tpu.memory_space<vmem>>, vector<1x18x8xbf16>
    tpu.vector_store %arg7[%c17, %c0_3, %c0_4], %2 {strides = array<i32>} : memref<18x18x8xbf16, #tpu.memory_space<vmem>>, vector<1x18x8xbf16>,
    %cst_5 = arith.constant 0.000000e+00 : bf16
    %4 = vector.broadcast %cst_5 : bf16 to vector<18x1x8xbf16>
    %c0_6 = arith.constant 0 : index
    %c0_7 = arith.constant 0 : index
    %c0_8 = arith.constant 0 : index
    %5 = vector.load %arg7[%c0_6, %c0_7, %c0_8] : memref<18x18x8xbf16, #tpu.memory_space<vmem>>, vector<18x1x8xbf16>
    tpu.vector_store %arg7[%c0_6, %c0_7, %c0_8], %4 {strides = array<i32>} : memref<18x18x8xbf16, #tpu.memory_space<vmem>>, vector<18x1x8xbf16>,
    %cst_9 = arith.constant 0.000000e+00 : bf16
    %6 = vector.broadcast %cst_9 : bf16 to vector<18x1x8xbf16>
    %c0_10 = arith.constant 0 : index
    %c17_11 = arith.constant 17 : index
    %c0_12 = arith.constant 0 : index
    %7 = vector.load %arg7[%c0_10, %c17_11, %c0_12] : memref<18x18x8xbf16, #tpu.memory_space<vmem>>, vector<18x1x8xbf16>
    tpu.vector_store %arg7[%c0_10, %c17_11, %c0_12], %6 {strides = array<i32>} : memref<18x18x8xbf16, #tpu.memory_space<vmem>>, vector<18x1x8xbf16>,
    %c0_13 = arith.constant 0 : index
    %c0_14 = arith.constant 0 : index
    %c0_15 = arith.constant 0 : index
    %c0_16 = arith.constant 0 : index
    %8 = vector.load %arg1[%c0_13, %c0_14, %c0_15, %c0_16] : memref<1x16x16x4xbf16, #tpu.memory_space<vmem>>, vector<1x16x16x4xbf16>
    %9 = vector.shape_cast %8 : vector<1x16x16x4xbf16> to vector<16x16x4xbf16>
    %c1 = arith.constant 1 : index
    %c1_17 = arith.constant 1 : index
    %c0_18 = arith.constant 0 : index
    %10 = vector.load %arg7[%c1, %c1_17, %c0_18] : memref<18x18x8xbf16, #tpu.memory_space<vmem>>, vector<16x16x4xbf16>
    tpu.vector_store %arg7[%c1, %c1_17, %c0_18], %9 {strides = array<i32>} : memref<18x18x8xbf16, #tpu.memory_space<vmem>>, vector<16x16x4xbf16>,
    %c0_19 = arith.constant 0 : index
    %c0_20 = arith.constant 0 : index
    %c0_21 = arith.constant 0 : index
    %11 = vector.load %arg7[%c0_19, %c0_20, %c0_21] : memref<18x18x8xbf16, #tpu.memory_space<vmem>>, vector<16x16x4xbf16>
    %c0_22 = arith.constant 0 : index
    %c1_23 = arith.constant 1 : index
    %c0_24 = arith.constant 0 : index
    %12 = vector.load %arg7[%c0_22, %c1_23, %c0_24] : memref<18x18x8xbf16, #tpu.memory_space<vmem>>, vector<16x16x4xbf16>
    %c0_25 = arith.constant 0 : index
    %c2 = arith.constant 2 : index
    %c0_26 = arith.constant 0 : index
    %13 = vector.load %arg7[%c0_25, %c2, %c0_26] : memref<18x18x8xbf16, #tpu.memory_space<vmem>>, vector<16x16x4xbf16>
    %c1_27 = arith.constant 1 : index
    %c0_28 = arith.constant 0 : index
    %c0_29 = arith.constant 0 : index
    %14 = vector.load %arg7[%c1_27, %c0_28, %c0_29] : memref<18x18x8xbf16, #tpu.memory_space<vmem>>, vector<16x16x4xbf16>
    %c1_30 = arith.constant 1 : index
    %c1_31 = arith.constant 1 : index
    %c0_32 = arith.constant 0 : index
    %15 = vector.load %arg7[%c1_30, %c1_31, %c0_32] : memref<18x18x8xbf16, #tpu.memory_space<vmem>>, vector<16x16x4xbf16>
    %c1_33 = arith.constant 1 : index
    %c2_34 = arith.constant 2 : index
    %c0_35 = arith.constant 0 : index
    %16 = vector.load %arg7[%c1_33, %c2_34, %c0_35] : memref<18x18x8xbf16, #tpu.memory_space<vmem>>, vector<16x16x4xbf16>
    %c2_36 = arith.constant 2 : index
    %c0_37 = arith.constant 0 : index
    %c0_38 = arith.constant 0 : index
    %17 = vector.load %arg7[%c2_36, %c0_37, %c0_38] : memref<18x18x8xbf16, #tpu.memory_space<vmem>>, vector<16x16x4xbf16>
    %c2_39 = arith.constant 2 : index
    %c1_40 = arith.constant 1 : index
    %c0_41 = arith.constant 0 : index
    %18 = vector.load %arg7[%c2_39, %c1_40, %c0_41] : memref<18x18x8xbf16, #tpu.memory_space<vmem>>, vector<16x16x4xbf16>
    %c2_42 = arith.constant 2 : index
    %c2_43 = arith.constant 2 : index
    %c0_44 = arith.constant 0 : index
    %19 = vector.load %arg7[%c2_42, %c2_43, %c0_44] : memref<18x18x8xbf16, #tpu.memory_space<vmem>>, vector<16x16x4xbf16>
    %20 = tpu.concatenate %11, %12, %13, %14, %15, %16, %17, %18, %19 in 2 : vector<16x16x4xbf16>, vector<16x16x4xbf16>, vector<16x16x4xbf16>, vector<16x16x4xbf16>, vector<16x16x4xbf16>, vector<16x16x4xbf16>, vector<16x16x4xbf16>, vector<16x16x4xbf16>, vector<16x16x4xbf16> -> vector<16x16x36xbf16>
    %c0_45 = arith.constant 0 : index
    %c0_46 = arith.constant 0 : index
    %21 = vector.load %arg2[%c0_45, %c0_46] : memref<36x128xbf16, #tpu.memory_space<vmem>>, vector<36x128xbf16>
    %cst_47 = arith.constant dense<0.000000e+00> : vector<16x16x128xf32>
    %22 = tpu.matmul %20, %21, %cst_47 {dimension_numbers = #tpu.dot_dimension_numbers<[2], [0], [0, 1], [1], [0, 0, 0, 1, 1, 1], [], []>} : vector<16x16x36xbf16>, vector<36x128xbf16>, vector<16x16x128xf32> -> vector<16x16x128xf32>
    %c0_48 = arith.constant 0 : index
    %c0_49 = arith.constant 0 : index
    %23 = vector.load %arg3[%c0_48, %c0_49] : memref<1x128xf32, #tpu.memory_space<vmem>>, vector<1x128xf32>
    %24 = vector.shape_cast %23 : vector<1x128xf32> to vector<128xf32>
    %25 = vector.shape_cast %24 : vector<128xf32> to vector<1x1x128xf32>
    %26 = vector.broadcast %25 : vector<1x1x128xf32> to vector<16x16x128xf32>
    %27 = arith.addf %22, %26 : vector<16x16x128xf32>
    %cst_50 = arith.constant 0.000000e+00 : f32
    %28 = vector.broadcast %cst_50 : f32 to vector<16x16x128xf32>
    %29 = arith.maximumf %27, %28 : vector<16x16x128xf32>
    %30 = vector.extract_strided_slice %29 {offsets = [0, 0, 0], sizes = [16, 16, 8], strides = [1, 1, 1]} : vector<16x16x128xf32> to vector<16x16x8xf32>
    %31 = arith.truncf %30 : vector<16x16x8xf32> to vector<16x16x8xbf16>
    %c1_51 = arith.constant 1 : index
    %c1_52 = arith.constant 1 : index
    %c0_53 = arith.constant 0 : index
    %32 = vector.load %arg7[%c1_51, %c1_52, %c0_53] : memref<18x18x8xbf16, #tpu.memory_space<vmem>>, vector<16x16x8xbf16>
    tpu.vector_store %arg7[%c1_51, %c1_52, %c0_53], %31 {strides = array<i32>} : memref<18x18x8xbf16, #tpu.memory_space<vmem>>, vector<16x16x8xbf16>,
    %c0_54 = arith.constant 0 : index
    %c0_55 = arith.constant 0 : index
    %c0_56 = arith.constant 0 : index
    %33 = vector.load %arg7[%c0_54, %c0_55, %c0_56] : memref<18x18x8xbf16, #tpu.memory_space<vmem>>, vector<16x16x8xbf16>
    %c0_57 = arith.constant 0 : index
    %c1_58 = arith.constant 1 : index
    %c0_59 = arith.constant 0 : index
    %34 = vector.load %arg7[%c0_57, %c1_58, %c0_59] : memref<18x18x8xbf16, #tpu.memory_space<vmem>>, vector<16x16x8xbf16>
    %c0_60 = arith.constant 0 : index
    %c2_61 = arith.constant 2 : index
    %c0_62 = arith.constant 0 : index
    %35 = vector.load %arg7[%c0_60, %c2_61, %c0_62] : memref<18x18x8xbf16, #tpu.memory_space<vmem>>, vector<16x16x8xbf16>
    %c1_63 = arith.constant 1 : index
    %c0_64 = arith.constant 0 : index
    %c0_65 = arith.constant 0 : index
    %36 = vector.load %arg7[%c1_63, %c0_64, %c0_65] : memref<18x18x8xbf16, #tpu.memory_space<vmem>>, vector<16x16x8xbf16>
    %c1_66 = arith.constant 1 : index
    %c1_67 = arith.constant 1 : index
    %c0_68 = arith.constant 0 : index
    %37 = vector.load %arg7[%c1_66, %c1_67, %c0_68] : memref<18x18x8xbf16, #tpu.memory_space<vmem>>, vector<16x16x8xbf16>
    %c1_69 = arith.constant 1 : index
    %c2_70 = arith.constant 2 : index
    %c0_71 = arith.constant 0 : index
    %38 = vector.load %arg7[%c1_69, %c2_70, %c0_71] : memref<18x18x8xbf16, #tpu.memory_space<vmem>>, vector<16x16x8xbf16>
    %c2_72 = arith.constant 2 : index
    %c0_73 = arith.constant 0 : index
    %c0_74 = arith.constant 0 : index
    %39 = vector.load %arg7[%c2_72, %c0_73, %c0_74] : memref<18x18x8xbf16, #tpu.memory_space<vmem>>, vector<16x16x8xbf16>
    %c2_75 = arith.constant 2 : index
    %c1_76 = arith.constant 1 : index
    %c0_77 = arith.constant 0 : index
    %40 = vector.load %arg7[%c2_75, %c1_76, %c0_77] : memref<18x18x8xbf16, #tpu.memory_space<vmem>>, vector<16x16x8xbf16>
    %c2_78 = arith.constant 2 : index
    %c2_79 = arith.constant 2 : index
    %c0_80 = arith.constant 0 : index
    %41 = vector.load %arg7[%c2_78, %c2_79, %c0_80] : memref<18x18x8xbf16, #tpu.memory_space<vmem>>, vector<16x16x8xbf16>
    %42 = tpu.concatenate %33, %34, %35, %36, %37, %38, %39, %40, %41 in 2 : vector<16x16x8xbf16>, vector<16x16x8xbf16>, vector<16x16x8xbf16>, vector<16x16x8xbf16>, vector<16x16x8xbf16>, vector<16x16x8xbf16>, vector<16x16x8xbf16>, vector<16x16x8xbf16>, vector<16x16x8xbf16> -> vector<16x16x72xbf16>
    %c0_81 = arith.constant 0 : index
    %c0_82 = arith.constant 0 : index
    %43 = vector.load %arg4[%c0_81, %c0_82] : memref<72x128xbf16, #tpu.memory_space<vmem>>, vector<72x128xbf16>
    %cst_83 = arith.constant dense<0.000000e+00> : vector<16x16x128xf32>
    %44 = tpu.matmul %42, %43, %cst_83 {dimension_numbers = #tpu.dot_dimension_numbers<[2], [0], [0, 1], [1], [0, 0, 0, 1, 1, 1], [], []>} : vector<16x16x72xbf16>, vector<72x128xbf16>, vector<16x16x128xf32> -> vector<16x16x128xf32>
    %c0_84 = arith.constant 0 : index
    %c0_85 = arith.constant 0 : index
    %45 = vector.load %arg5[%c0_84, %c0_85] : memref<1x128xf32, #tpu.memory_space<vmem>>, vector<1x128xf32>
    %46 = vector.shape_cast %45 : vector<1x128xf32> to vector<128xf32>
    %47 = vector.shape_cast %46 : vector<128xf32> to vector<1x1x128xf32>
    %48 = vector.broadcast %47 : vector<1x1x128xf32> to vector<16x16x128xf32>
    %49 = arith.addf %44, %48 : vector<16x16x128xf32>
    %cst_86 = arith.constant 0.000000e+00 : f32
    %50 = vector.broadcast %cst_86 : f32 to vector<16x16x128xf32>
    %51 = arith.maximumf %49, %50 : vector<16x16x128xf32>
    %52 = vector.shape_cast %51 : vector<16x16x128xf32> to vector<8x2x16x128xf32>
    %cst_87 = arith.constant dense<0xFF800000> : vector<8x16x128xf32>
    %53 = vector.multi_reduction <maximumf>, %52, %cst_87 [1] : vector<8x2x16x128xf32> to vector<8x16x128xf32>
    %54 = vector.shape_cast %53 : vector<8x16x128xf32> to vector<8x8x2x128xf32>
    %cst_88 = arith.constant dense<0xFF800000> : vector<8x8x128xf32>
    %55 = vector.multi_reduction <maximumf>, %54, %cst_88 [2] : vector<8x8x2x128xf32> to vector<8x8x128xf32>
    %c0_89 = arith.constant 0 : index
    %c0_90 = arith.constant 0 : index
    %c0_91 = arith.constant 0 : index
    %c0_92 = arith.constant 0 : index
    %56 = vector.load %arg6[%c0_89, %c0_90, %c0_91, %c0_92] : memref<1x8x8x128xf32, #tpu.memory_space<vmem>>, vector<1x8x8x128xf32>
    %57 = vector.shape_cast %56 : vector<1x8x8x128xf32> to vector<8x8x128xf32>
    %58 = vector.shape_cast %55 : vector<8x8x128xf32> to vector<1x8x8x128xf32>
    tpu.vector_store %arg6[%c0_89, %c0_90, %c0_91, %c0_92], %58 {strides = array<i32>} : memref<1x8x8x128xf32, #tpu.memory_space<vmem>>, vector<1x8x8x128xf32>,
    return
  }
  func.func @transform_0(%arg0: i32) -> (i32, i32, i32, i32) {
    %c0_i32 = arith.constant 0 : i32
    %c0_i32_0 = arith.constant 0 : i32
    %c0_i32_1 = arith.constant 0 : i32
    %c0_i32_2 = arith.constant 0 : i32
    return %arg0, %c0_i32, %c0_i32_0, %c0_i32_1 : i32, i32, i32, i32
  }
  func.func @transform_1(%arg0: i32) -> (i32, i32) {
    %c0_i32 = arith.constant 0 : i32
    %c0_i32_0 = arith.constant 0 : i32
    %c0_i32_1 = arith.constant 0 : i32
    return %c0_i32, %c0_i32_0 : i32, i32
  }
  func.func @transform_2(%arg0: i32) -> (i32, i32) {
    %c0_i32 = arith.constant 0 : i32
    %c0_i32_0 = arith.constant 0 : i32
    %c0_i32_1 = arith.constant 0 : i32
    return %c0_i32, %c0_i32_0 : i32, i32
  }
  func.func @transform_3(%arg0: i32) -> (i32, i32) {
    %c0_i32 = arith.constant 0 : i32
    %c0_i32_0 = arith.constant 0 : i32
    %c0_i32_1 = arith.constant 0 : i32
    return %c0_i32, %c0_i32_0 : i32, i32
  }
  func.func @transform_4(%arg0: i32) -> (i32, i32) {
    %c0_i32 = arith.constant 0 : i32
    %c0_i32_0 = arith.constant 0 : i32
    %c0_i32_1 = arith.constant 0 : i32
    return %c0_i32, %c0_i32_0 : i32, i32
  }
  func.func @transform_5(%arg0: i32) -> (i32, i32, i32, i32) {
    %c0_i32 = arith.constant 0 : i32
    %c0_i32_0 = arith.constant 0 : i32
    %c0_i32_1 = arith.constant 0 : i32
    %c0_i32_2 = arith.constant 0 : i32
    return %arg0, %c0_i32, %c0_i32_0, %c0_i32_1 : i32, i32, i32, i32
  }
}

</mosaic_0001>

<bundles_post_ra>
// kernel: tpu_custom_call.1
= control target key start
LH: loop header
LB: loop body
LE: loop exit
PB: predicated region body
PF: predicated region fallthrough
CT: control target
= control target key end

     0   :  { %10 = vsyncpa [#allocation4], 0  ;;  %s10626_s0 = inlined_call_operand.vmem [shape: bf16[2,16,16,4], index: 0, kind: input, shape index: {}]   ;;  %s10627_s1 = inlined_call_operand.vmem [shape: bf16[36,128], index: 1, kind: input, shape index: {}]   ;;  %s10628_s2 = inlined_call_operand.vmem [shape: f32[1,128], index: 2, kind: input, shape index: {}]   ;;  %s10629_s3 = inlined_call_operand.vmem [shape: bf16[72,128], index: 3, kind: input, shape index: {}]   ;;  %s10630_s4 = inlined_call_operand.vmem [shape: f32[1,128], index: 4, kind: input, shape index: {}]   ;;  %s10631_s5 = inlined_call_operand.hbm [shape: f32[2,8,8,128], index: 5, kind: output, shape index: {}]  }
   0x1   :  { %12 = vsyncpa [#allocation4 + $0x1], 0  ;;  %s7794_s18 = smov 0   ;;  %s7796_s19 = smov 0  }
   0x2   :  { %s7798_s20 = smov 0   ;;  %s7800_s21 = smov 0  }
   0x3 LB: > { %s7815_s22 = sadd.s32 4294967295, %s7746_s21   ;;  %s6831_s23 = sadd.s32 4294967294, %s7746_s21   ;;  %s7746_s21 = sphi %s7800_s21, %s10757_s21   ;;  %s7742_s20 = sphi %s7798_s20, %s10756_s20   ;;  %s7738_s19 = sphi %s7796_s19, %s10755_s19   ;;  %s7734_s18 = sphi %s7794_s18, %s10754_s18  }
   0x4   : > { %s7819_s24 = sadd.s32 1, %s7746_s21   ;;  %s135_s25 = sadd.s32 1, %s7742_s20 }
   0x5   : > { %s132_s26 = ssub.s32 %s7746_s21, %s7819_s24  ;;  %p145_p0 = scmp.ne.s32.totalorder %s7742_s20, %s7738_s19 }
   0x6   : > { %p133_p1 = scmp.eq.s32.totalorder %s132_s26, 0  ;;  %p146_p2 = scmp.eq.s32.totalorder %s7815_s22, 1 }
   0x7   : > { %p151_p3 = scmp.ne.s32.totalorder %s7738_s19, %s7734_s18  ;;  %p152_p4 = scmp.eq.s32.totalorder %s6831_s23, 1 }
   0x8   : > { %s7830_s27 = scalar_select %p133_p1, %s7742_s20, %s135_s25  }
   0x9   : > { %p7832_p5 = por %p146_p2, %p145_p0  ;;  %p7836_p6 = por %p152_p4, %p151_p3 }
   0xa   : > { %p6834_p7 = scmp.ge.s32.totalorder %s7746_s21, 1  ;;  %p190_p8 = scmp.lt.s32.totalorder %s7746_s21, 3 }
   0xc   : > { %p191_p9 = pnand %p6834_p7, %p190_p8 }
   0xd   : > { %p218_p10 = scmp.lt.s32.totalorder (!%p191_p9), %s7815_s22, 1  ;;  %s7749_s10 = smov (!%p191_p9), 8  }
   0xe   : > { %194 = sbr.rel (%p191_p9) target bundleno = 1045 (0x415), region = 40  ;;  %s7750_s11 = smov (!%p191_p9), 12  }
   0xf   : > { %s7751_s12 = smov (!%p191_p9), 24   ;;  %s7752_s13 = smov (!%p191_p9), 4  }
  0x10   : > { %s7753_s14 = smov (!%p191_p9), 20   ;;  %s7754_s15 = smov (!%p191_p9), 32  }
  0x11   : > { %s7755_s16 = smov (!%p191_p9), 16   ;;  %s7756_s17 = smov (!%p191_p9), 28  }
  0x12   : > { %s7238_s8 = sshll.u32 (!%p191_p9), %s7815_s22, 10 }
  0x13   : > { %vm10633_vm0 = vcmask 60416   ;;  %vm227_vm1 = vcmask 57344   ;;  %vm234_vm2 = vsmask.f32 256  ;;  %v7748_v0 = vmov 0   ;;  %s219_s30 = scalar_select %p218_p10, %s7815_s22, 1 }
  0x14   : > { %225 = vst.msk [vmem:[#allocation2] sm:$0xf] %vm10633_vm0, %v7748_v0  ;;  %226 = vst.msk [vmem:[#allocation2 + $0x4] sm:$0xf] %vm10633_vm0, %v7748_v0  ;;  %vm10634_vm4 = vsmask.f32 7938  ;;  %s10576_s26 = scalar_lea.hbm %s10631_s5, %s7238_s8 }
  0x15   : > { %228 = vst.msk [vmem:[#allocation2 + $0x8] sm:$0x1] %vm227_vm1, %v7748_v0  ;;  %vm7847_vm3 = vmand %vm227_vm1, %vm234_vm2  ;;  %v239_v2 = vld [vmem:[#allocation2 + $0xc] sm:$0x1]  ;;  %v242_v3 = vld [vmem:[#allocation2 + $0x18] sm:$0x1] }
  0x16   : > { %230 = vst.msk [vmem:[#allocation2 + $0xcc] sm:$0xf] %vm10633_vm0, %v7748_v0  ;;  %231 = vst.msk [vmem:[#allocation2 + $0xd0] sm:$0xf] %vm10633_vm0, %v7748_v0  ;;  %v240_v4 = vsel %vm7847_vm3, 0, %v239_v2  ;;  %v243_v5 = vsel %vm7847_vm3, 0, %v242_v3 }
  0x17   : > { %232 = vst.msk [vmem:[#allocation2 + $0xd4] sm:$0x1] %vm227_vm1, %v7748_v0  ;;  %v245_v6 = vld [vmem:[#allocation2 + $0x24] sm:$0x1]  ;;  %241 = vst [vmem:[#allocation2 + $0xc] sm:$0x1] %v240_v4 }
  0x18   : > { %244 = vst [vmem:[#allocation2 + $0x18] sm:$0x1] %v243_v5  ;;  %v246_v7 = vsel %vm7847_vm3, 0, %v245_v6  ;;  %vm7864_vm5 = vmand %vm227_vm1, %vm10634_vm4  ;;  %vm10635_vm6 = vcmask 27648   ;;  %s7205_s6 = sshll.u32 %s219_s30, 7  ;;  %vm708_vm8 = vcmask 24576  }
  0x19   : > { %247 = vst [vmem:[#allocation2 + $0x24] sm:$0x1] %v246_v7  ;;  %v295_v9 = vld [vmem:[#allocation2 + $0x14] sm:$0x1]  ;;  %v298_v10 = vld [vmem:[#allocation2 + $0x20] sm:$0x1]  ;;  %s7871_s9 = scalar_lea.vmem %s10626_s0, %s7205_s6  ;;  %vm7890_vm9 = vmand %vm10635_vm6, %vm10634_vm4 }
  0x1a   : > { %vm378_vm7 = vsmask.f32 4368  ;;  %v296_v11 = vsel %vm7864_vm5, 0, %v295_v9  ;;  %v299_v12 = vsel %vm7864_vm5, 0, %v298_v10  ;;  %v346_v13 = vld [vmem:[%s7871_s9] sm:$0xf]  ;;  %vm7906_vm11 = vmand %vm708_vm8, %vm234_vm2 }
  0x1b   : > { %v347_v14 = vld [vmem:[%s7871_s9 + $0x4] sm:$0xf]  ;;  %v348_v15 = vld [vmem:[%s7871_s9 + $0x8] sm:$0xf]  ;;  %297 = vst [vmem:[#allocation2 + $0x14] sm:$0x1] %v296_v11  ;;  %vm7898_vm10 = vmor %vm234_vm2, %vm378_vm7 }
  0x1c   : > { %300 = vst [vmem:[#allocation2 + $0x20] sm:$0x1] %v299_v12  ;;  %v301_v16 = vld [vmem:[#allocation2 + $0x2c] sm:$0x1]  ;;  %v292_v17 = vld [vmem:[#allocation2 + $0x8] sm:$0x1] }
  0x1d   : > { %v7880_v18 = vld [vmem:[#allocation2 + $0x4] sm:$0xf]  ;;  %v866_v19 = vld [vmem:[#allocation2] sm:$0xe]  ;;  %v293_v20 = vsel %vm7864_vm5, 0, %v292_v17  ;;  %v381_v23 = vshrl.u32 %v346_v13, 16 }
  0x1e   : > { %v6870_v21 = vcombine.low %v866_v19, %v7880_v18  ;;  %v236_v22 = vld [vmem:[#allocation2] sm:$0x1]  ;;  %v384_v24 = vshll.u32 %v346_v13, 16  ;;  %294 = vst [vmem:[#allocation2 + $0x8] sm:$0x1] %v293_v20  ;;  %v389_v26 = vshrl.u32 %v347_v14, 16 }
  0x1f   : > { %v237_v25 = vsel %vm7847_vm3, 0, %v236_v22  ;;  %v392_v27 = vshll.u32 %v347_v14, 16  ;;  %v349_v28 = vld [vmem:[%s7871_s9 + $0xc] sm:$0xf]  ;;  %v398_v29 = vshrl.u32 %v348_v15, 16  ;;  %v383_v31 = vrot.slane %v381_v23, 7 }
  0x20   : > { %v1413_v30 = vrot.slane %v6870_v21, 1  ;;  %238 = vst [vmem:[#allocation2] sm:$0x1] %v237_v25  ;;  %v703_v32 = vld [vmem:[#allocation2 + $0xc] sm:$0xf]  ;;  %v401_v33 = vshll.u32 %v348_v15, 16 }
  0x21   : > { %v406_v34 = vshrl.u32 %v349_v28, 16  ;;  %v391_v36 = vrot.slane %v389_v26, 7  ;;  %v400_v37 = vrot.slane %v398_v29, 7  ;;  %v409_v38 = vshll.u32 %v349_v28, 16  ;;  %v713_v39 = vld [vmem:[#allocation2 + $0x18] sm:$0xf] }
  0x22   : > { %v302_v40 = vsel %vm7864_vm5, 0, %v301_v16  ;;  %v386_v42 = vor.u32 %v384_v24, %v383_v31  ;;  %v387_v43 = vrot.slane %v383_v31, 4  ;;  %v350_v45 = vld [vmem:[%s7871_s9 + $0x10] sm:$0xf]  ;;  %v351_v46 = vld [vmem:[%s7871_s9 + $0x14] sm:$0xf] }
  0x23   : > { %v408_v44 = vrot.slane %v406_v34, 7  ;;  %303 = vst [vmem:[#allocation2 + $0x2c] sm:$0x1] %v302_v40  ;;  %v394_v47 = vor.u32 %v392_v27, %v391_v36  ;;  %v396_v48 = vrot.slane %v391_v36, 4  ;;  %v403_v49 = vor.u32 %v401_v33, %v400_v37  ;;  %v710_v52 = vld [vmem:[#allocation2 + $0x14] sm:$0x1] }
  0x24   : > { %v404_v50 = vrot.slane %v400_v37, 4  ;;  %v704_v53 = vsel %vm7890_vm9, %v386_v42, %v703_v32  ;;  %v415_v56 = vshrl.u32 %v350_v45, 16  ;;  %v717_v57 = vld [vmem:[#allocation2 + $0x20] sm:$0x1]  ;;  %v418_v60 = vshll.u32 %v350_v45, 16  ;;  %s7762_s6 = smov [#allocation3]  }
  0x25   : > { %v411_v54 = vor.u32 %v409_v38, %v408_v44  ;;  %v413_v55 = vrot.slane %v408_v44, 4  ;;  %v395_v58 = vsel %vm7898_vm10, %v387_v43, %v394_v47  ;;  %705 = vst [vmem:[#allocation2 + $0xc] sm:$0xf] %v704_v53  ;;  %v714_v59 = vsel %vm7890_vm9, %v403_v49, %v713_v39  ;;  %v720_v62 = vld [vmem:[#allocation2 + $0x24] sm:$0xf]  ;;  %s7690_s7 = sshll.u32 %s7762_s6, 4  ;;  %s7691_s7 = int_to_ptr.vmem [resolvable:$false] %s7690_s7 }
  0x26   : > { %v423_v61 = vshrl.u32 %v351_v46, 16  ;;  %v248_v63 = vld [vmem:[#allocation2 + $0x30] sm:$0x1]  ;;  %v7415_v0 = vld [vmem:[#allocation2 + $0x8] ss:$0 sps:$4 sm:$0x11]   ;;  %v711_v4 = vsel %vm7906_vm11, %v396_v48, %v710_v52 }
  0x27   : > { %707 = vst.msk [vmem:[#allocation2 + $0x10] sm:$0xf] %vm10635_vm6, %v395_v58  ;;  %v412_v2 = vsel %vm7898_vm10, %v404_v50, %v411_v54  ;;  %715 = vst [vmem:[#allocation2 + $0x18] sm:$0xf] %v714_v59  ;;  %v417_v3 = vrot.slane %v415_v56, 7  ;;  %v718_v5 = vsel %vm7906_vm11, %v413_v55, %v717_v57  ;;  %vm1412_vm12 = vcmask 1046528  }
  0x28   : > { %v818_v6 = vld [vmem:[#allocation2] sm:$0xf]  ;;  %716 = vst.msk [vmem:[#allocation2 + $0x1c] sm:$0xf] %vm10635_vm6, %v412_v2  ;;  %v425_v7 = vrot.slane %v423_v61, 7  ;;  %v426_v9 = vshll.u32 %v351_v46, 16 }
  0x29   : > { %712 = vst [vmem:[#allocation2 + $0x14] sm:$0x1] %v711_v4  ;;  %719 = vst [vmem:[#allocation2 + $0x20] sm:$0x1] %v718_v5  ;;  %v249_v10 = vsel %vm7847_vm3, 0, %v248_v63  ;;  %v1414_v11 = vrot.slane %v7415_v0, 1  ;;  %v7927_v12 = vcombine.low %v818_v6, %v7880_v18  ;;  %v420_v13 = vor.u32 %v418_v60, %v417_v3 }
  0x2a   : > { %v421_v14 = vrot.slane %v417_v3, 4  ;;  %250 = vst [vmem:[#allocation2 + $0x30] sm:$0x1] %v249_v10  ;;  %v7930_v15 = vld [vmem:[%s7871_s9 + $0x18] sm:$0xf]  ;;  %v428_v16 = vor.u32 %v426_v9, %v425_v7  ;;  %v430_v17 = vrot.slane %v425_v7, 4 }
  0x2b   : > { %v724_v19 = vld [vmem:[#allocation2 + $0x2c] sm:$0x1]  ;;  %v1415_v20 = vsel %vm1412_vm12, %v1413_v30, %v1414_v11  ;;  %v721_v21 = vsel %vm7890_vm9, %v420_v13, %v720_v62  ;;  %vm1139_vm13 = vsmask.f32 7424  ;;  %v1143_v22 = vshll.u32 %v7927_v12, 16 }
  0x2c   : > { %1461 = vrot.lane.b32.xlu1 %v1415_v20, %s7749_s10  ;;  %v429_v18 = vsel %vm7898_vm10, %v421_v14, %v428_v16  ;;  %722 = vst [vmem:[#allocation2 + $0x24] sm:$0xf] %v721_v21  ;;  %v1148_v23 = vshll.u32 %v7415_v0, 16  ;;  %v725_v24 = vsel %vm7906_vm11, %v430_v17, %v724_v19  ;;  %v432_v25 = vshrl.u32 %v7930_v15, 16  ;;  %v882_v26 = vld [vmem:[#allocation2 + $0xc] sm:$0xf] }
  0x2d   : > { %723 = vst.msk [vmem:[#allocation2 + $0x28] sm:$0xf] %vm10635_vm6, %v429_v18  ;;  %v1141_v27 = vshrl.u32 %v7927_v12, 16  ;;  %v1145_v28 = vrot.slane %v1143_v22, 1  ;;  %v867_v29 = vld [vmem:[#allocation2 + $0xc] sm:$0xe] }
  0x2e   : > { %726 = vst [vmem:[#allocation2 + $0x2c] sm:$0x1] %v725_v24  ;;  %v883_v30 = vld [vmem:[#allocation2 + $0x10] sm:$0xf]  ;;  %v884_v31 = vld [vmem:[#allocation2 + $0x18] sm:$0xf] }
  0x2f   : > { %v947_v32 = vld [vmem:[#allocation2 + $0x18] sm:$0xf]  ;;  %v7944_v33 = vcombine.low %v882_v26, %v883_v30  ;;  %v885_v34 = vld [vmem:[#allocation2 + $0x1c] sm:$0xf]  ;;  %v821_v37 = vld [vmem:[#allocation2 + $0x10] sm:$0xf]  ;;  %v1146_v44 = vor.u32 %v1145_v28, %v1141_v27 }
  0x30   : > { %v948_v36 = vld [vmem:[#allocation2 + $0x1c] sm:$0xf]  ;;  %v7946_v38 = vcombine.low %v884_v31, %v885_v34  ;;  %v7948_v39 = vld [vmem:[#allocation2 + $0x14] ss:$0 sps:$4 sm:$0x11]   ;;  %v6871_v40 = vcombine.low %v867_v29, %v821_v37  ;;  %v7950_v42 = vrot.slane %v432_v25, 7 }
  0x31   : > { %1573 = vrot.lane.b32.xlu0 %v7944_v33, %s7750_s11  ;;  %v7954_v43 = vcombine.low %v947_v32, %v948_v36  ;;  %v1150_v45 = vrot.slane %v1148_v23, 1  ;;  %v820_v46 = vld [vmem:[#allocation2 + $0xc] sm:$0xf]  ;;  %v435_v47 = vshll.u32 %v7930_v15, 16  ;;  %v1656_v48 = vshll.u32 %v7944_v33, 16 }
  0x32   : > { %1575 = vrot.lane.b32.xlu1 %v7946_v38, %s7750_s11  ;;  %v1668_v49 = vshll.u32 %v7946_v38, 16  ;;  %v1416_v50 = vrot.slane %v6871_v40, 1  ;;  %v930_v52 = vld [vmem:[#allocation2 + $0xc] sm:$0xe]  ;;  %v1654_v53 = vshrl.u32 %v7944_v33, 16  ;;  %v1417_v55 = vrot.slane %v7948_v39, 1 }
  0x33   : > { %v949_v54 = vld [vmem:[#allocation2 + $0x24] sm:$0xf]  ;;  %v7963_v56 = vld [vmem:[#allocation2 + $0x14] ss:$0 sps:$4 sm:$0x11]   ;;  %v6918_v57 = vcombine.low %v930_v52, %v883_v30  ;;  %v7967_v59 = vcombine.low %v820_v46, %v821_v37  ;;  %v1666_v2 = vshrl.u32 %v7946_v38, 16  ;;  %v1151_v3 = vsel %vm1139_vm13, %v1146_v44, %v1150_v45 }
  0x34   : > { %v7965_v58 = vld [vmem:[#allocation2 + $0x28] sm:$0xf]  ;;  %v931_v60 = vld [vmem:[#allocation2 + $0x18] sm:$0xe]  ;;  %v1926_v4 = vrot.slane %v7963_v56, 1  ;;  %v1670_v6 = vrot.slane %v1668_v49, 1  ;;  %v1418_v9 = vsel %vm1412_vm12, %v1416_v50, %v1417_v55 }
  0x35   : > { %2085 = vrot.lane.b32.xlu0 %v7954_v43, %s7751_s12  ;;  %v6935_v61 = vcombine.low %v949_v54, %v7965_v58  ;;  %v1925_v62 = vrot.slane %v6918_v57, 1  ;;  %v7425_v63 = vld [vmem:[#allocation2 + $0x20] ss:$0 sps:$4 sm:$0x11]   ;;  %v6919_v0 = vcombine.low %v931_v60, %v885_v34  ;;  %v995_v5 = vld [vmem:[#allocation2 + $0x18] sm:$0xe] }
  0x36   : > { %v7977_v11 = vld [vmem:[#allocation2 + $0x20] ss:$0 sps:$4 sm:$0x11]   ;;  %v1153_v13 = vshrl.u32 %v7967_v59, 16  ;;  %v1929_v14 = vrot.slane %v7425_v63, 1  ;;  %v6966_v16 = vcombine.low %v995_v5, %v948_v36  ;;  %v1673_v17 = vshll.u32 %v7425_v63, 16 }
  0x37   : > { %v2180_v7 = vshll.u32 %v6935_v61, 16  ;;  %2087 = vrot.lane.b32.xlu1 %v6935_v61, %s7751_s12  ;;  %v1928_v10 = vrot.slane %v6919_v0, 1  ;;  %v1155_v19 = vshll.u32 %v7967_v59, 16  ;;  %v1160_v20 = vshll.u32 %v7948_v39, 16  ;;  %v822_v22 = vld [vmem:[#allocation2 + $0x18] sm:$0xf] }
  0x38   : > { %v7983_v21 = vld [vmem:[#allocation2 + $0x2c] ss:$0 sps:$4 sm:$0x11]   ;;  %v1927_v18 = vsel %vm1412_vm12, %v1925_v62, %v1926_v4  ;;  %v2437_v23 = vrot.slane %v6966_v16, 1  ;;  %v2438_v24 = vrot.slane %v7977_v11, 1  ;;  %v2168_v28 = vshll.u32 %v7954_v43, 16 }
  0x39   : > { %1332 = vrot.lane.b32.xlu0 %v1151_v3, %s7752_s13  ;;  %v1157_v25 = vrot.slane %v1155_v19, 1  ;;  %v7987_v26 = vld [vmem:[#allocation2 + $0x1c] sm:$0xf]  ;;  %v2178_v29 = vshrl.u32 %v6935_v61, 16  ;;  %v2182_v30 = vrot.slane %v2180_v7, 1  ;;  %v2185_v31 = vshll.u32 %v7983_v21, 16 }
  0x3a   : > { %v7990_v27 = vld [vmem:[%s7871_s9 + $0x1c] sm:$0xf]  ;;  %v1930_v32 = vsel %vm1412_vm12, %v1928_v10, %v1929_v14  ;;  %v1671_v34 = vor.u32 %v1670_v6, %v1666_v2  ;;  %v1675_v36 = vrot.slane %v1673_v17, 1  ;;  %v1162_v37 = vrot.slane %v1160_v20, 1  ;;  %v824_v40 = vld [vmem:[#allocation2 + $0x24] sm:$0xf] }
  0x3b   : > { %1463 = vrot.lane.b32.xlu1 %v1418_v9, %s7749_s10  ;;  %v7996_v38 = vld [vmem:[#allocation2 + $0x20] ss:$0 sps:$4 sm:$0x11]   ;;  %v8000_v39 = vcombine.low %v822_v22, %v7987_v26  ;;  %v8002_v44 = vld [vmem:[#allocation2 + $0x28] sm:$0xf]  ;;  %v2439_v45 = vsel %vm1412_vm12, %v2437_v23, %v2438_v24  ;;  %v1158_v46 = vor.u32 %v1157_v25, %v1153_v13  ;;  %v1658_v49 = vrot.slane %v1656_v48, 1 }
  0x3c   : > { %v1661_v50 = vshll.u32 %v7963_v56, 16  ;;  %v2183_v52 = vor.u32 %v2182_v30, %v2178_v29  ;;  %v2187_v54 = vrot.slane %v2185_v31, 1  ;;  %v8008_v57 = vld [vmem:[#allocation2 + $0x2c] ss:$0 sps:$4 sm:$0x11]   ;;  %v440_v60 = vshrl.u32 %v7990_v27, 16 }
  0x3d   : > { %1973 = vrot.lane.b32.xlu0 %v1927_v18, %s7753_s14  ;;  %v1167_v55 = vshll.u32 %v8000_v39, 16  ;;  %v1676_v61 = vsel %vm1139_vm13, %v1671_v34, %v1675_v36  ;;  %v1165_v62 = vshrl.u32 %v8000_v39, 16  ;;  %v1172_v63 = vshll.u32 %v7996_v38, 16  ;;  %v996_v4 = vld [vmem:[#allocation2 + $0x24] sm:$0xe] }
  0x3e   : > { %v8015_v48 = vcombine.low %v824_v40, %v8002_v44  ;;  %v2166_v0 = vshrl.u32 %v7954_v43, 16  ;;  %v2170_v2 = vrot.slane %v2168_v28, 1  ;;  %v2173_v3 = vshll.u32 %v7977_v11, 16  ;;  %v869_v10 = vld [vmem:[#allocation2 + $0x24] sm:$0xe] }
  0x3f   : > { %1975 = vrot.lane.b32.xlu1 %v1930_v32, %s7753_s14  ;;  %v1169_v56 = vrot.slane %v1167_v55, 1  ;;  %v1163_v5 = vsel %vm1139_vm13, %v1158_v46, %v1162_v37  ;;  %v1659_v6 = vor.u32 %v1658_v49, %v1654_v53  ;;  %v1663_v7 = vrot.slane %v1661_v50, 1  ;;  %v727_v19 = vld [vmem:[#allocation2 + $0x30] sm:$0xf]  ;;  %v304_v20 = vld [vmem:[#allocation2 + $0x38] sm:$0x1] }
  0x40   : > { %v1179_v9 = vshll.u32 %v8015_v48, 16  ;;  %v2188_v13 = vsel %vm1139_vm13, %v2183_v52, %v2187_v54  ;;  %v1177_v43 = vshrl.u32 %v8015_v48, 16  ;;  %v1184_v14 = vshll.u32 %v8008_v57, 16  ;;  %v251_v25 = vld [vmem:[#allocation2 + $0x3c] sm:$0x1] }
  0x41   : > { %2485 = vrot.lane.b32.xlu0 %v2439_v45, %s7754_s15  ;;  %v437_v11 = vor.u32 %v435_v47, %v7950_v42  ;;  %v1170_v16 = vor.u32 %v1169_v56, %v1165_v62  ;;  %v1174_v33 = vrot.slane %v1172_v63, 1  ;;  %v6967_v17 = vcombine.low %v996_v4, %v7965_v58  ;;  %v886_v29 = vld [vmem:[#allocation2 + $0x24] sm:$0xf]  ;;  %v8039_v58 = vld [vmem:[#allocation2 + $0x28] sm:$0xf] }
  0x42   : > { %v1181_v53 = vrot.slane %v1179_v9, 1  ;;  %v2171_v22 = vor.u32 %v2170_v2, %v2166_v0  ;;  %v2175_v18 = vrot.slane %v2173_v3, 1  ;;  %v6873_v23 = vcombine.low %v869_v10, %v8002_v44  ;;  %v868_v32 = vld [vmem:[#allocation2 + $0x18] sm:$0xe]  ;;  %v354_v37 = vld [vmem:[%s7871_s9 + $0x20] sm:$0xf] }
  0x43   : > { %1847 = vrot.lane.b32.xlu1 %v1676_v61, %s7755_s16  ;;  %v8034_v24 = vrot.slane %v440_v60, 7  ;;  %v1664_v15 = vsel %vm1139_vm13, %v1659_v6, %v1663_v7  ;;  %v438_v47 = vrot.slane %v7950_v42, 4  ;;  %v443_v28 = vshll.u32 %v7990_v27, 16  ;;  %v355_v45 = vld [vmem:[%s7871_s9 + $0x24] sm:$0xf] }
  0x44   : > { %v1182_v30 = vor.u32 %v1181_v53, %v1177_v43  ;;  %v1186_v31 = vrot.slane %v1184_v14, 1  ;;  %v728_v34 = vsel %vm7890_vm9, %v437_v11, %v727_v19  ;;  %v305_v36 = vsel %vm7864_vm5, 0, %v304_v20  ;;  %v307_v54 = vld [vmem:[#allocation2 + $0x44] sm:$0x1]  ;;  %v254_v55 = vld [vmem:[#allocation2 + $0x48] sm:$0x1] }
  0x45   : > { %1334 = vrot.lane.b32.xlu0 %v1163_v5, %s7752_s13  ;;  %v1175_v42 = vsel %vm1139_vm13, %v1170_v16, %v1174_v33  ;;  %v2440_v27 = vrot.slane %v6967_v17, 1  ;;  %v2441_v40 = vrot.slane %v7983_v21, 1  ;;  %v445_v44 = vor.u32 %v443_v28, %v8034_v24  ;;  %729 = vst [vmem:[#allocation2 + $0x30] sm:$0xf] %v728_v34  ;;  %306 = vst [vmem:[#allocation2 + $0x38] sm:$0x1] %v305_v36 }
  0x46   : > { %v2176_v46 = vsel %vm1139_vm13, %v2171_v22, %v2175_v18  ;;  %v1422_v49 = vrot.slane %v6873_v23, 1  ;;  %v1423_v50 = vrot.slane %v8008_v57, 1  ;;  %v8055_v52 = vcombine.low %v886_v29, %v8039_v58  ;;  %v356_v63 = vld [vmem:[%s7871_s9 + $0x28] sm:$0xf]  ;;  %v357_v10 = vld [vmem:[%s7871_s9 + $0x2c] sm:$0xf] }
  0x47   : > { %2359 = vrot.lane.b32.xlu1 %v2188_v13, %s7756_s17  ;;  %v6872_v21 = vcombine.low %v868_v32, %v7987_v26  ;;  %v446_v60 = vsel %vm7898_vm10, %v438_v47, %v445_v44  ;;  %v252_v61 = vsel %vm7847_vm3, 0, %v251_v25  ;;  %v449_v62 = vshrl.u32 %v354_v37, 16  ;;  %v8067_v0 = vld [vmem:[#allocation2 + $0x2c] ss:$0 sps:$4 sm:$0x11]  }
  0x48   : > { %v1187_v56 = vsel %vm1139_vm13, %v1182_v30, %v1186_v31  ;;  %v447_v57 = vrot.slane %v8034_v24, 4  ;;  %730 = vst.msk [vmem:[#allocation2 + $0x34] sm:$0xf] %vm10635_vm6, %v446_v60  ;;  %253 = vst [vmem:[#allocation2 + $0x3c] sm:$0x1] %v252_v61  ;;  %v452_v26 = vshll.u32 %v354_v37, 16  ;;  %v2442_v43 = vsel %vm1412_vm12, %v2440_v27, %v2441_v40 }
  0x49   : > { %1845 = vrot.lane.b32.xlu0 %v1664_v15, %s7755_s16  ;;  %v457_v2 = vshrl.u32 %v355_v45, 16  ;;  %v451_v3 = vrot.slane %v449_v62, 7  ;;  %v460_v4 = vshll.u32 %v355_v45, 16  ;;  %v308_v5 = vsel %vm7864_vm5, 0, %v307_v54  ;;  %v932_v19 = vld [vmem:[#allocation2 + $0x24] sm:$0xe] }
  0x4a   : > { %v255_v6 = vsel %vm7847_vm3, 0, %v254_v55  ;;  %v1680_v7 = vshll.u32 %v8055_v52, 16  ;;  %309 = vst [vmem:[#allocation2 + $0x44] sm:$0x1] %v308_v5  ;;  %v466_v13 = vshrl.u32 %v356_v63, 16  ;;  %v1419_v14 = vrot.slane %v6872_v21, 1 }
  0x4b   : > { %1336 = vrot.lane.b32.xlu1 %v1175_v42, %s7752_s13  ;;  %v459_v9 = vrot.slane %v457_v2, 7  ;;  %256 = vst [vmem:[#allocation2 + $0x48] sm:$0x1] %v255_v6  ;;  %v1420_v11 = vrot.slane %v7996_v38, 1  ;;  %v455_v16 = vrot.slane %v451_v3, 4  ;;  %v1424_v33 = vsel %vm1412_vm12, %v1422_v49, %v1423_v50 }
  0x4c   : > { %v731_v53 = vld [vmem:[#allocation2 + $0x38] sm:$0x1]  ;;  %v1685_v17 = vshll.u32 %v8067_v0, 16  ;;  %v454_v20 = vor.u32 %v452_v26, %v451_v3  ;;  %v888_v18 = vld [vmem:[#allocation2 + $0x30] sm:$0xf]  ;;  %v468_v24 = vrot.slane %v466_v13, 7  ;;  %v6920_v42 = vcombine.low %v932_v19, %v8039_v58 }
  0x4d   : > { %2357 = vrot.lane.b32.xlu0 %v2176_v46, %s7756_s17  ;;  %v462_v22 = vor.u32 %v460_v4, %v459_v9  ;;  %v732_v23 = vsel %vm7906_vm11, %v447_v57, %v731_v53  ;;  %v469_v25 = vshll.u32 %v356_v63, 16  ;;  %v474_v15 = vshrl.u32 %v357_v10, 16  ;;  %v951_v30 = vld [vmem:[#allocation2 + $0x30] sm:$0xf] }
  0x4e   : > { %733 = vst [vmem:[#allocation2 + $0x38] sm:$0x1] %v732_v23  ;;  %v1678_v38 = vshrl.u32 %v8055_v52, 16  ;;  %v1682_v47 = vrot.slane %v1680_v7, 1  ;;  %v464_v29 = vrot.slane %v459_v9, 4  ;;  %v1421_v31 = vsel %vm1412_vm12, %v1419_v14, %v1420_v11 }
  0x4f   : > { %1338 = vrot.lane.b32.xlu1 %v1187_v56, %s7752_s13  ;;  %v463_v28 = vsel %vm7898_vm10, %v455_v16, %v462_v22  ;;  %v889_v32 = vld [vmem:[#allocation2 + $0x34] sm:$0xf]  ;;  %v734_v34 = vld [vmem:[#allocation2 + $0x3c] sm:$0xf]  ;;  %v933_v40 = vld [vmem:[#allocation2 + $0x30] sm:$0xe]  ;;  %v471_v46 = vor.u32 %v469_v25, %v468_v24 }
  0x50   : > { %737 = vst.msk [vmem:[#allocation2 + $0x40] sm:$0xf] %vm10635_vm6, %v463_v28  ;;  %v8089_v36 = vld [vmem:[#allocation2 + $0x34] sm:$0xf]  ;;  %v6889_v37 = vcombine.low %v888_v18, %v889_v32  ;;  %v735_v27 = vsel %vm7890_vm9, %v454_v20, %v734_v34  ;;  %v8098_v49 = vrot.slane %v474_v15, 7  ;;  %v477_v50 = vshll.u32 %v357_v10, 16 }
  0x51   : > { %2487 = vrot.lane.b32.xlu0 %v2442_v43, %s7754_s15  ;;  %736 = vst [vmem:[#allocation2 + $0x3c] sm:$0xf] %v735_v27  ;;  %v8096_v44 = vcombine.low %v951_v30, %v8089_v36  ;;  %v738_v45 = vld [vmem:[#allocation2 + $0x44] sm:$0x1]  ;;  %v1687_v55 = vrot.slane %v1685_v17, 1  ;;  %v1683_v58 = vor.u32 %v1682_v47, %v1678_v38  ;;  %v472_v56 = vrot.slane %v468_v24, 4 }
  0x52   : > { %v1692_v54 = vshll.u32 %v6889_v37, 16  ;;  %v741_v21 = vld [vmem:[#allocation2 + $0x48] sm:$0xf]  ;;  %v1690_v60 = vshrl.u32 %v6889_v37, 16  ;;  %v739_v61 = vsel %vm7906_vm11, %v464_v29, %v738_v45  ;;  %v826_v62 = vld [vmem:[#allocation2 + $0x30] sm:$0xf]  ;;  %v6921_v26 = vcombine.low %v933_v40, %v889_v32 }
  0x53   : > { %1467 = vrot.lane.b32.xlu1 %v1424_v33, %s7749_s10  ;;  %v8103_v63 = vld [vmem:[#allocation2 + $0x34] sm:$0xf]  ;;  %v1931_v2 = vrot.slane %v6920_v42, 1  ;;  %v1932_v3 = vrot.slane %v8067_v0, 1  ;;  %740 = vst [vmem:[#allocation2 + $0x44] sm:$0x1] %v739_v61  ;;  %v479_v6 = vor.u32 %v477_v50, %v8098_v49  ;;  %v742_v7 = vsel %vm7890_vm9, %v471_v46, %v741_v21 }
  0x54   : > { %v1694_v57 = vrot.slane %v1692_v54, 1  ;;  %v2192_v5 = vshll.u32 %v8096_v44, 16  ;;  %v8116_v10 = vcombine.low %v826_v62, %v8103_v63  ;;  %743 = vst [vmem:[#allocation2 + $0x48] sm:$0xf] %v742_v7  ;;  %v1688_v43 = vsel %vm1139_vm13, %v1683_v58, %v1687_v55  ;;  %v997_v11 = vld [vmem:[#allocation2 + $0x30] sm:$0xe] }
  0x55   : > { %1465 = vrot.lane.b32.xlu0 %v1421_v31, %s7749_s10  ;;  %v7436_v4 = vld [vmem:[#allocation2 + $0x38] ss:$0 sps:$4 sm:$0x11]   ;;  %v480_v16 = vsel %vm7898_vm10, %v472_v56, %v479_v6  ;;  %v1934_v33 = vrot.slane %v6921_v26, 1  ;;  %v2190_v17 = vshrl.u32 %v8096_v44, 16  ;;  %v6968_v47 = vcombine.low %v997_v11, %v8089_v36 }
  0x56   : > { %v1695_v13 = vor.u32 %v1694_v57, %v1690_v60  ;;  %v1697_v0 = vshll.u32 %v7436_v4, 16  ;;  %v7443_v14 = vld [vmem:[#allocation2 + $0x38] ss:$0 sps:$4 sm:$0x11]   ;;  %744 = vst.msk [vmem:[#allocation2 + $0x4c] sm:$0xf] %vm10635_vm6, %v480_v16  ;;  %v1933_v29 = vsel %vm1412_vm12, %v1931_v2, %v1932_v3 }
  0x57   : > { %1579 = vrot.lane.b32.xlu1 %v6889_v37, %s7750_s11  ;;  %v8113_v9 = vld [vmem:[#allocation2 + $0x40] sm:$0xf]  ;;  %v1935_v19 = vrot.slane %v7436_v4, 1  ;;  %v870_v23 = vld [vmem:[#allocation2 + $0x30] sm:$0xe]  ;;  %v2194_v24 = vrot.slane %v2192_v5, 1 }
  0x58   : > { %v953_v53 = vld [vmem:[#allocation2 + $0x3c] sm:$0xf]  ;;  %v829_v18 = vld [vmem:[#allocation2 + $0x40] sm:$0xf]  ;;  %v2197_v25 = vshll.u32 %v7443_v14, 16  ;;  %v1191_v38 = vshll.u32 %v8116_v10, 16  ;;  %v6874_v54 = vcombine.low %v870_v23, %v8103_v63 }
  0x59   : > { %1577 = vrot.lane.b32.xlu0 %v8055_v52, %s7750_s11  ;;  %v1699_v52 = vrot.slane %v1697_v0, 1  ;;  %v6937_v20 = vcombine.low %v953_v53, %v8113_v9  ;;  %v828_v22 = vld [vmem:[#allocation2 + $0x3c] sm:$0xf]  ;;  %v8125_v15 = vld [vmem:[#allocation2 + $0x38] ss:$0 sps:$4 sm:$0x11]   ;;  %v1936_v34 = vsel %vm1412_vm12, %v1934_v33, %v1935_v19  ;;  %v2195_v55 = vor.u32 %v2194_v24, %v2190_v17 }
  0x5a   : > { %v8131_v31 = vld [vmem:[#allocation2 + $0x44] ss:$0 sps:$4 sm:$0x11]   ;;  %v8134_v32 = vcombine.low %v828_v22, %v829_v18  ;;  %v998_v40 = vld [vmem:[#allocation2 + $0x3c] sm:$0xe]  ;;  %v1189_v36 = vshrl.u32 %v8116_v10, 16 }
  0x5b   : > { %v1700_v28 = vsel %vm1139_vm13, %v1695_v13, %v1699_v52  ;;  %v2204_v30 = vshll.u32 %v6937_v20, 16  ;;  %v2202_v37 = vshrl.u32 %v6937_v20, 16  ;;  %v2209_v27 = vshll.u32 %v8131_v31, 16  ;;  %v871_v50 = vld [vmem:[#allocation2 + $0x3c] sm:$0xe] }
  0x5c   : > { %1851 = vrot.lane.b32.xlu1 %v1700_v28, %s7755_s16  ;;  %v1193_v45 = vrot.slane %v1191_v38, 1  ;;  %v2443_v46 = vrot.slane %v6968_v47, 1  ;;  %v2199_v21 = vrot.slane %v2197_v25, 1  ;;  %v1196_v60 = vshll.u32 %v8125_v15, 16  ;;  %v310_v57 = vld [vmem:[#allocation2 + $0x50] sm:$0x1] }
  0x5d   : > { %1849 = vrot.lane.b32.xlu0 %v1688_v43, %s7755_s16  ;;  %v2206_v42 = vrot.slane %v2204_v30, 1  ;;  %v2444_v58 = vrot.slane %v7443_v14, 1  ;;  %v7448_v61 = vld [vmem:[#allocation2 + $0x44] ss:$0 sps:$4 sm:$0x11]   ;;  %v1203_v62 = vshll.u32 %v8134_v32, 16  ;;  %v6969_v56 = vcombine.low %v998_v40, %v8113_v9 }
  0x5e   : > { %v2211_v2 = vrot.slane %v2209_v27, 1  ;;  %v6875_v3 = vcombine.low %v871_v50, %v829_v18  ;;  %v257_v4 = vld [vmem:[#allocation2 + $0x54] sm:$0x1]  ;;  %v358_v5 = vld [vmem:[%s7871_s9 + $0x30] sm:$0xf]  ;;  %v1194_v63 = vor.u32 %v1193_v45, %v1189_v36  ;;  %v1425_v6 = vrot.slane %v6874_v54, 1 }
  0x5f   : > { %v2207_v26 = vor.u32 %v2206_v42, %v2202_v37  ;;  %v481_v7 = vrot.slane %v8098_v49, 4  ;;  %v892_v13 = vld [vmem:[#allocation2 + $0x48] sm:$0xf]  ;;  %v8149_v0 = vld [vmem:[#allocation2 + $0x4c] sm:$0xf]  ;;  %v2200_v43 = vsel %vm1139_vm13, %v2195_v55, %v2199_v21  ;;  %v1198_v9 = vrot.slane %v1196_v60, 1 }
  0x60   : > { %1979 = vrot.lane.b32.xlu1 %v1936_v34, %s7753_s14  ;;  %v2445_v14 = vsel %vm1412_vm12, %v2443_v46, %v2444_v58  ;;  %v890_v11 = vld [vmem:[#allocation2 + $0x3c] sm:$0xf]  ;;  %v8153_v16 = vld [vmem:[#allocation2 + $0x40] sm:$0xf]  ;;  %v311_v33 = vsel %vm7864_vm5, 0, %v310_v57  ;;  %v1205_v53 = vrot.slane %v1203_v62, 1  ;;  %v8163_v24 = vcombine.low %v892_v13, %v8149_v0 }
  0x61   : > { %1977 = vrot.lane.b32.xlu0 %v1933_v29, %s7753_s14  ;;  %v1208_v17 = vshll.u32 %v7448_v61, 16  ;;  %v2446_v52 = vrot.slane %v6969_v56, 1  ;;  %312 = vst [vmem:[#allocation2 + $0x50] sm:$0x1] %v311_v33  ;;  %v359_v19 = vld [vmem:[%s7871_s9 + $0x34] sm:$0xf]  ;;  %v2212_v22 = vsel %vm1139_vm13, %v2207_v26, %v2211_v2  ;;  %v8169_v38 = vcombine.low %v890_v11, %v8153_v16 }
  0x62   : > { %v2447_v18 = vrot.slane %v8131_v31, 1  ;;  %v1428_v23 = vrot.slane %v6875_v3, 1  ;;  %v8165_v25 = vld [vmem:[#allocation2 + $0x44] ss:$0 sps:$4 sm:$0x11]   ;;  %v258_v47 = vsel %vm7847_vm3, 0, %v257_v4  ;;  %v1199_v30 = vsel %vm1139_vm13, %v1194_v63, %v1198_v9 }
  0x63   : > { %v483_v28 = vshrl.u32 %v358_v5, 16  ;;  %v313_v29 = vld [vmem:[#allocation2 + $0x5c] sm:$0x1]  ;;  %v1426_v31 = vrot.slane %v8125_v15, 1  ;;  %259 = vst [vmem:[#allocation2 + $0x54] sm:$0x1] %v258_v47 }
  0x64   : > { %2091 = vrot.lane.b32.xlu1 %v6937_v20, %s7751_s12  ;;  %v1429_v20 = vrot.slane %v7448_v61, 1  ;;  %v486_v34 = vshll.u32 %v358_v5, 16  ;;  %v491_v37 = vshrl.u32 %v359_v19, 16  ;;  %v1210_v27 = vrot.slane %v1208_v17, 1  ;;  %v935_v40 = vld [vmem:[#allocation2 + $0x48] sm:$0xe] }
  0x65   : > { %2089 = vrot.lane.b32.xlu0 %v8096_v44, %s7751_s12  ;;  %v1201_v44 = vshrl.u32 %v8134_v32, 16  ;;  %v485_v36 = vrot.slane %v483_v28, 7  ;;  %v494_v45 = vshll.u32 %v359_v19, 16  ;;  %v260_v46 = vld [vmem:[#allocation2 + $0x60] sm:$0x1]  ;;  %v1716_v54 = vshll.u32 %v8163_v24, 16 }
  0x66   : > { %v8177_v50 = vld [vmem:[%s7871_s9 + $0x38] sm:$0xf]  ;;  %v1709_v55 = vshll.u32 %v8165_v25, 16  ;;  %v8181_v21 = vld [vmem:[#allocation2 + $0x3c] sm:$0xe]  ;;  %v493_v15 = vrot.slane %v491_v37, 7  ;;  %v2448_v58 = vsel %vm1412_vm12, %v2446_v52, %v2447_v18  ;;  %v8188_v61 = vsel %vm1412_vm12, %v1428_v23, %v1429_v20 }
  0x67   : > { %v1206_v42 = vor.u32 %v1205_v53, %v1201_v44  ;;  %v314_v60 = vsel %vm7864_vm5, 0, %v313_v29  ;;  %v1704_v62 = vshll.u32 %v8169_v38, 16  ;;  %v489_v56 = vrot.slane %v485_v36, 4  ;;  %v361_v57 = vld [vmem:[%s7871_s9 + $0x3c] sm:$0xf] }
  0x68   : > { %2363 = vrot.lane.b32.xlu1 %v2212_v22, %s7756_s17  ;;  %315 = vst [vmem:[#allocation2 + $0x5c] sm:$0x1] %v314_v60  ;;  %v1427_v26 = vsel %vm1412_vm12, %v1425_v6, %v1426_v31  ;;  %v745_v2 = vld [vmem:[#allocation2 + $0x50] sm:$0x1]  ;;  %v1714_v3 = vshrl.u32 %v8163_v24, 16  ;;  %v488_v4 = vor.u32 %v486_v34, %v485_v36  ;;  %v496_v5 = vor.u32 %v494_v45, %v493_v15 }
  0x69   : > { %2361 = vrot.lane.b32.xlu0 %v2200_v43, %s7756_s17  ;;  %v955_v63 = vld [vmem:[#allocation2 + $0x48] sm:$0xf]  ;;  %v263_v43 = vld [vmem:[#allocation2 + $0x6c] sm:$0x1]  ;;  %v1211_v9 = vsel %vm1139_vm13, %v1206_v42, %v1210_v27  ;;  %v1702_v6 = vshrl.u32 %v8169_v38, 16  ;;  %v6923_v11 = vcombine.low %v935_v40, %v8149_v0  ;;  %v1718_v44 = vrot.slane %v1716_v54, 1 }
  0x6a   : > { %v316_v13 = vld [vmem:[#allocation2 + $0x68] sm:$0x1]  ;;  %v8202_v33 = vld [vmem:[#allocation2 + $0x4c] sm:$0xf]  ;;  %v497_v53 = vsel %vm7898_vm10, %v489_v56, %v496_v5  ;;  %v261_v17 = vsel %vm7847_vm3, 0, %v260_v46  ;;  %v500_v49 = vshrl.u32 %v8177_v50, 16  ;;  %v6922_v0 = vcombine.low %v8181_v21, %v8153_v16 }
  0x6b   : > { %v8210_v52 = vld [vmem:[%s7871_s9 + $0x40] sm:$0xf]  ;;  %v1711_v19 = vrot.slane %v1709_v55, 1  ;;  %v498_v22 = vrot.slane %v493_v15, 4  ;;  %v748_v18 = vld [vmem:[#allocation2 + $0x54] sm:$0xf]  ;;  %v8219_v20 = vcombine.low %v955_v63, %v8202_v33 }
  0x6c   : > { %1340 = vrot.lane.b32.xlu1 %v1199_v30, %s7752_s13  ;;  %751 = vst.msk [vmem:[#allocation2 + $0x58] sm:$0xf] %vm10635_vm6, %v497_v53  ;;  %262 = vst [vmem:[#allocation2 + $0x60] sm:$0x1] %v261_v17  ;;  %v749_v23 = vsel %vm7890_vm9, %v488_v4, %v748_v18  ;;  %v8221_v47 = vrot.slane %v500_v49, 7  ;;  %v508_v28 = vshrl.u32 %v361_v57, 16 }
  0x6d   : > { %2489 = vrot.lane.b32.xlu0 %v2445_v14, %s7754_s15  ;;  %v746_v14 = vsel %vm7906_vm11, %v481_v7, %v745_v2  ;;  %v1706_v7 = vrot.slane %v1704_v62, 1  ;;  %v363_v29 = vld [vmem:[%s7871_s9 + $0x44] sm:$0xf]  ;;  %v1938_v30 = vrot.slane %v8165_v25, 1  ;;  %750 = vst [vmem:[#allocation2 + $0x54] sm:$0xf] %v749_v23  ;;  %v1719_v2 = vor.u32 %v1718_v44, %v1714_v3 }
  0x6e   : > { %747 = vst [vmem:[#allocation2 + $0x50] sm:$0x1] %v746_v14  ;;  %v511_v16 = vshll.u32 %v361_v57, 16  ;;  %v317_v31 = vsel %vm7864_vm5, 0, %v316_v13  ;;  %v264_v34 = vsel %vm7847_vm3, 0, %v263_v43  ;;  %v1940_v42 = vrot.slane %v6923_v11, 1 }
  0x6f   : > { %v319_v37 = vld [vmem:[#allocation2 + $0x74] sm:$0x1]  ;;  %v752_v27 = vld [vmem:[#allocation2 + $0x5c] sm:$0x1]  ;;  %v506_v40 = vrot.slane %v8221_v47, 4  ;;  %v8231_v36 = vrot.slane %v508_v28, 7  ;;  %v1707_v25 = vor.u32 %v1706_v7, %v1702_v6 }
  0x70   : > { %1342 = vrot.lane.b32.xlu1 %v1211_v9, %s7752_s13  ;;  %318 = vst [vmem:[#allocation2 + $0x68] sm:$0x1] %v317_v31  ;;  %265 = vst [vmem:[#allocation2 + $0x6c] sm:$0x1] %v264_v34  ;;  %v517_v45 = vshrl.u32 %v8210_v52, 16  ;;  %v753_v46 = vsel %vm7906_vm11, %v498_v22, %v752_v27  ;;  %v525_v21 = vshrl.u32 %v363_v29, 16 }
  0x71   : > { %2491 = vrot.lane.b32.xlu0 %v2448_v58, %s7754_s15  ;;  %v830_v54 = vld [vmem:[#allocation2 + $0x48] sm:$0xf]  ;;  %v8237_v55 = vld [vmem:[#allocation2 + $0x4c] sm:$0xf]  ;;  %v528_v15 = vshll.u32 %v363_v29, 16  ;;  %v2216_v60 = vshll.u32 %v8219_v20, 16  ;;  %v513_v58 = vor.u32 %v511_v16, %v8231_v36  ;;  %v1712_v3 = vsel %vm1139_vm13, %v1707_v25, %v1711_v19 }
  0x72   : > { %754 = vst [vmem:[#allocation2 + $0x5c] sm:$0x1] %v753_v46  ;;  %v519_v62 = vrot.slane %v517_v45, 7  ;;  %v320_v56 = vsel %vm7864_vm5, 0, %v319_v37  ;;  %v8250_v5 = vcombine.low %v830_v54, %v8237_v55  ;;  %v1937_v43 = vrot.slane %v6922_v0, 1 }
  0x73   : > { %321 = vst [vmem:[#allocation2 + $0x74] sm:$0x1] %v320_v56  ;;  %v8247_v4 = vld [vmem:[#allocation2 + $0x58] sm:$0xf]  ;;  %v514_v63 = vsel %vm7898_vm10, %v506_v40, %v513_v58  ;;  %v2214_v11 = vshrl.u32 %v8219_v20, 16  ;;  %v503_v17 = vshll.u32 %v8177_v50, 16 }
  0x74   : > { %1471 = vrot.lane.b32.xlu1 %v8188_v61, %s7749_s10  ;;  %758 = vst.msk [vmem:[#allocation2 + $0x64] sm:$0xf] %vm10635_vm6, %v514_v63  ;;  %v523_v61 = vrot.slane %v519_v62, 4  ;;  %v957_v14 = vld [vmem:[#allocation2 + $0x54] sm:$0xf]  ;;  %v2218_v49 = vrot.slane %v2216_v60, 1  ;;  %v1939_v50 = vsel %vm1412_vm12, %v1937_v43, %v1938_v30 }
  0x75   : > { %1469 = vrot.lane.b32.xlu0 %v1427_v26, %s7749_s10  ;;  %v7453_v57 = vld [vmem:[#allocation2 + $0x50] ss:$0 sps:$4 sm:$0x11]   ;;  %v8245_v26 = vrot.slane %v525_v21, 7  ;;  %v1215_v7 = vshll.u32 %v8250_v5, 16  ;;  %v505_v34 = vor.u32 %v503_v17, %v8221_v47  ;;  %v520_v37 = vshll.u32 %v8210_v52, 16 }
  0x76   : > { %v1721_v13 = vshll.u32 %v7453_v57, 16  ;;  %v8259_v6 = vld [vmem:[#allocation2 + $0x50] ss:$0 sps:$4 sm:$0x11]   ;;  %v1941_v53 = vrot.slane %v7453_v57, 1  ;;  %v2219_v46 = vor.u32 %v2218_v49, %v2214_v11  ;;  %v1213_v54 = vshrl.u32 %v8250_v5, 16 }
  0x77   : > { %v530_v9 = vor.u32 %v528_v15, %v8245_v26  ;;  %v999_v0 = vld [vmem:[#allocation2 + $0x48] sm:$0xe]  ;;  %v832_v22 = vld [vmem:[#allocation2 + $0x54] sm:$0xf]  ;;  %v8267_v19 = vld [vmem:[#allocation2 + $0x58] sm:$0xf]  ;;  %v522_v63 = vor.u32 %v520_v37, %v519_v62 }
  0x78   : > { %1583 = vrot.lane.b32.xlu1 %v8163_v24, %s7750_s11  ;;  %v1723_v44 = vrot.slane %v1721_v13, 1  ;;  %v2221_v29 = vshll.u32 %v8259_v6, 16  ;;  %v8278_v16 = vld [vmem:[#allocation2 + $0x50] ss:$0 sps:$4 sm:$0x11]   ;;  %v1942_v31 = vsel %vm1412_vm12, %v1940_v42, %v1941_v53  ;;  %v8286_v25 = vcombine.low %v832_v22, %v8267_v19 }
  0x79   : > { %1581 = vrot.lane.b32.xlu0 %v8169_v38, %s7750_s11  ;;  %v6939_v38 = vcombine.low %v957_v14, %v8247_v4  ;;  %v531_v18 = vsel %vm7898_vm10, %v523_v61, %v530_v9  ;;  %v8273_v28 = vld [vmem:[#allocation2 + $0x5c] ss:$0 sps:$4 sm:$0x11]   ;;  %v755_v30 = vld [vmem:[#allocation2 + $0x60] sm:$0xf]  ;;  %v6970_v21 = vcombine.low %v999_v0, %v8202_v33  ;;  %v515_v42 = vrot.slane %v8231_v36, 4 }
  0x7a   : > { %v1724_v23 = vsel %vm1139_vm13, %v1719_v2, %v1723_v44  ;;  %765 = vst.msk [vmem:[#allocation2 + $0x70] sm:$0xf] %vm10635_vm6, %v531_v18  ;;  %v2233_v45 = vshll.u32 %v8273_v28, 16  ;;  %v2223_v47 = vrot.slane %v2221_v29, 1  ;;  %v1217_v15 = vrot.slane %v1215_v7, 1 }
  0x7b   : > { %v2228_v24 = vshll.u32 %v6939_v38, 16  ;;  %v2226_v27 = vshrl.u32 %v6939_v38, 16  ;;  %v1220_v52 = vshll.u32 %v8278_v16, 16  ;;  %v872_v60 = vld [vmem:[#allocation2 + $0x48] sm:$0xe]  ;;  %v532_v58 = vrot.slane %v8245_v26, 4 }
  0x7c   : > { %1855 = vrot.lane.b32.xlu1 %v1724_v23, %s7755_s16  ;;  %v1000_v56 = vld [vmem:[#allocation2 + $0x54] sm:$0xe]  ;;  %v756_v57 = vsel %vm7890_vm9, %v505_v34, %v755_v30  ;;  %v759_v2 = vld [vmem:[#allocation2 + $0x68] sm:$0x1]  ;;  %v2235_v43 = vrot.slane %v2233_v45, 1  ;;  %v1227_v36 = vshll.u32 %v8286_v25, 16  ;;  %v2224_v62 = vsel %vm1139_vm13, %v2219_v46, %v2223_v47 }
  0x7d   : > { %1853 = vrot.lane.b32.xlu0 %v1712_v3, %s7755_s16  ;;  %v2230_v40 = vrot.slane %v2228_v24, 1  ;;  %v8297_v33 = vld [vmem:[#allocation2 + $0x5c] ss:$0 sps:$4 sm:$0x11]   ;;  %757 = vst [vmem:[#allocation2 + $0x60] sm:$0xf] %v756_v57  ;;  %v760_v9 = vsel %vm7906_vm11, %v515_v42, %v759_v2  ;;  %v6971_v11 = vcombine.low %v1000_v56, %v8247_v4  ;;  %v6876_v44 = vcombine.low %v872_v60, %v8237_v55 }
  0x7e   : > { %v2449_v61 = vrot.slane %v6970_v21, 1  ;;  %v2450_v26 = vrot.slane %v8259_v6, 1  ;;  %v762_v3 = vld [vmem:[#allocation2 + $0x6c] sm:$0xf]  ;;  %v266_v14 = vld [vmem:[#allocation2 + $0x78] sm:$0x1] }
  0x7f   : > { %v2231_v13 = vor.u32 %v2230_v40, %v2226_v27  ;;  %v894_v53 = vld [vmem:[#allocation2 + $0x54] sm:$0xf]  ;;  %v8308_v17 = vld [vmem:[#allocation2 + $0x58] sm:$0xf]  ;;  %761 = vst [vmem:[#allocation2 + $0x68] sm:$0x1] %v760_v9  ;;  %v763_v0 = vsel %vm7890_vm9, %v522_v63, %v762_v3 }
  0x80   : > { %1983 = vrot.lane.b32.xlu1 %v1942_v31, %s7753_s14  ;;  %v766_v49 = vld [vmem:[#allocation2 + $0x74] sm:$0x1]  ;;  %v1222_v6 = vrot.slane %v1220_v52, 1  ;;  %v873_v7 = vld [vmem:[#allocation2 + $0x54] sm:$0xe]  ;;  %v1225_v55 = vshrl.u32 %v8286_v25, 16  ;;  %v8322_v24 = vcombine.low %v894_v53, %v8308_v17  ;;  %v2451_v29 = vsel %vm1412_vm12, %v2449_v61, %v2450_v26 }
  0x81   : > { %1981 = vrot.lane.b32.xlu0 %v1939_v50, %s7753_s14  ;;  %v767_v22 = vsel %vm7906_vm11, %v532_v58, %v766_v49  ;;  %v2236_v4 = vsel %vm1139_vm13, %v2231_v13, %v2235_v43  ;;  %v1229_v18 = vrot.slane %v1227_v36, 1  ;;  %v1232_v23 = vshll.u32 %v8297_v33, 16  ;;  %764 = vst [vmem:[#allocation2 + $0x6c] sm:$0xf] %v763_v0  ;;  %v364_v21 = vld [vmem:[%s7871_s9 + $0x48] sm:$0xf] }
  0x82   : > { %768 = vst [vmem:[#allocation2 + $0x74] sm:$0x1] %v767_v22  ;;  %v267_v50 = vsel %vm7847_vm3, 0, %v266_v14  ;;  %v2452_v31 = vrot.slane %v6971_v11, 1  ;;  %v2453_v34 = vrot.slane %v8273_v28, 1  ;;  %v6877_v37 = vcombine.low %v873_v7, %v8267_v19 }
  0x83   : > { %268 = vst [vmem:[#allocation2 + $0x78] sm:$0x1] %v267_v50  ;;  %v1431_v27 = vrot.slane %v6876_v44, 1  ;;  %v1230_v30 = vor.u32 %v1229_v18, %v1225_v55  ;;  %v1234_v46 = vrot.slane %v1232_v23, 1  ;;  %v1728_v42 = vshll.u32 %v8322_v24, 16 }
  0x84   : > { %2095 = vrot.lane.b32.xlu1 %v6939_v38, %s7751_s12  ;;  %v8319_v38 = vld [vmem:[#allocation2 + $0x64] sm:$0xf]  ;;  %v896_v40 = vld [vmem:[#allocation2 + $0x60] sm:$0xf]  ;;  %v2454_v19 = vsel %vm1412_vm12, %v2452_v31, %v2453_v34  ;;  %v1434_v47 = vrot.slane %v6877_v37, 1  ;;  %v1435_v60 = vrot.slane %v8297_v33, 1 }
  0x85   : > { %2093 = vrot.lane.b32.xlu0 %v8219_v20, %s7751_s12  ;;  %v1218_v20 = vor.u32 %v1217_v15, %v1213_v54  ;;  %v8332_v54 = vcombine.low %v896_v40, %v8319_v38  ;;  %v8337_v28 = vld [vmem:[#allocation2 + $0x5c] ss:$0 sps:$4 sm:$0x11]   ;;  %v1432_v15 = vrot.slane %v8278_v16, 1  ;;  %v8341_v52 = vld [vmem:[#allocation2 + $0x64] sm:$0xf]  ;;  %v1235_v57 = vsel %vm1139_vm13, %v1230_v30, %v1234_v46 }
  0x86   : > { %v959_v58 = vld [vmem:[#allocation2 + $0x60] sm:$0xf]  ;;  %v534_v56 = vshrl.u32 %v364_v21, 16  ;;  %v8347_v63 = vld [vmem:[#allocation2 + $0x68] ss:$0 sps:$4 sm:$0x11]   ;;  %v1436_v53 = vsel %vm1412_vm12, %v1434_v47, %v1435_v60 }
  0x87   : > { %v1223_v45 = vsel %vm1139_vm13, %v1218_v20, %v1222_v6  ;;  %v1740_v2 = vshll.u32 %v8332_v54, 16  ;;  %v936_v13 = vld [vmem:[#allocation2 + $0x54] sm:$0xe]  ;;  %v1726_v16 = vshrl.u32 %v8322_v24, 16  ;;  %v1730_v43 = vrot.slane %v1728_v42, 1 }
  0x88   : > { %2367 = vrot.lane.b32.xlu1 %v2236_v4, %s7756_s17  ;;  %v1733_v36 = vshll.u32 %v8337_v28, 16  ;;  %v1433_v61 = vsel %vm1412_vm12, %v1431_v27, %v1432_v15  ;;  %v8353_v26 = vld [vmem:[#allocation2 + $0x70] sm:$0xf]  ;;  %v8356_v33 = vcombine.low %v959_v58, %v8341_v52  ;;  %v365_v9 = vld [vmem:[%s7871_s9 + $0x4c] sm:$0xf]  ;;  %v1738_v3 = vshrl.u32 %v8332_v54, 16 }
  0x89   : > { %2365 = vrot.lane.b32.xlu0 %v2224_v62, %s7756_s17  ;;  %v937_v14 = vld [vmem:[#allocation2 + $0x60] sm:$0xe]  ;;  %v6924_v62 = vcombine.low %v936_v13, %v8308_v17  ;;  %v8362_v11 = vrot.slane %v534_v56, 7  ;;  %v537_v44 = vshll.u32 %v364_v21, 16  ;;  %v1742_v49 = vrot.slane %v1740_v2, 1 }
  0x8a   : > { %v1745_v20 = vshll.u32 %v8347_v63, 16  ;;  %v961_v6 = vld [vmem:[#allocation2 + $0x6c] sm:$0xf]  ;;  %v1731_v7 = vor.u32 %v1730_v43, %v1726_v16  ;;  %v1735_v0 = vrot.slane %v1733_v36, 1  ;;  %v6925_v22 = vcombine.low %v937_v14, %v8319_v38  ;;  %v834_v55 = vld [vmem:[#allocation2 + $0x60] sm:$0xf] }
  0x8b   : > { %v2240_v4 = vshll.u32 %v8356_v33, 16  ;;  %v8369_v18 = vld [vmem:[#allocation2 + $0x64] sm:$0xf]  ;;  %v1943_v17 = vrot.slane %v6924_v62, 1  ;;  %v8373_v23 = vcombine.low %v961_v6, %v8353_v26  ;;  %v1743_v34 = vor.u32 %v1742_v49, %v1738_v3  ;;  %v8390_v46 = vld [vmem:[#allocation2 + $0x70] sm:$0xf] }
  0x8c   : > { %1344 = vrot.lane.b32.xlu1 %v1223_v45, %s7752_s13  ;;  %v8375_v50 = vld [vmem:[#allocation2 + $0x74] ss:$0 sps:$4 sm:$0x11]   ;;  %v7486_v31 = vld [vmem:[%s10627_s1 + $0x10] ss:$0 sps:$4 sm:$0x33]   ;;  %v539_v27 = vor.u32 %v537_v44, %v8362_v11  ;;  %v1736_v40 = vsel %vm1139_vm13, %v1731_v7, %v1735_v0  ;;  %v8388_v30 = vcombine.low %v834_v55, %v8369_v18 }
  0x8d   : > { %2493 = vrot.lane.b32.xlu0 %v2451_v29, %s7754_s15  ;;  %v542_v29 = vshrl.u32 %v365_v9, 16  ;;  %v1747_v38 = vrot.slane %v1745_v20, 1  ;;  %v8380_v37 = vld [vmem:[#allocation2 + $0x68] ss:$0 sps:$4 sm:$0x11]   ;;  %v1944_v45 = vrot.slane %v8337_v28, 1 }
  0x8e   : > { %v545_v21 = vshll.u32 %v365_v9, 16  ;;  %v769_v42 = vld [vmem:[#allocation2 + $0x78] sm:$0xf]  ;;  %v1947_v47 = vrot.slane %v8347_v63, 1  ;;  %v2238_v15 = vshrl.u32 %v8356_v33, 16  ;;  %v2242_v60 = vrot.slane %v2240_v4, 1 }
  0x8f   : > { %v1001_v58 = vld [vmem:[#allocation2 + $0x60] sm:$0xe]  ;;  %v2257_v28 = vshll.u32 %v8375_v50, 16  ;;  %v836_v56 = vld [vmem:[#allocation2 + $0x6c] sm:$0xf]  ;;  %v8399_v2 = vrot.slane %v542_v29, 7  ;;  %v1748_v13 = vsel %vm1139_vm13, %v1743_v34, %v1747_v38  ;;  %v770_v16 = vsel %vm7890_vm9, %v539_v27, %v769_v42 }
  0x90   : > { %1346 = vrot.lane.b32.xlu1 %v1235_v57, %s7752_s13  ;;  %v540_v57 = vrot.slane %v8362_v11, 4  ;;  %v2245_v63 = vshll.u32 %v8380_v37, 16  ;;  %vm10632_vm14 = vcmask 1041408   ;;  %v322_v43 = vld [vmem:[#allocation2 + $0x80] sm:$0x1]  ;;  %v6972_v9 = vcombine.low %v1001_v58, %v8341_v52 }
  0x91   : > { %2495 = vrot.lane.b32.xlu0 %v2454_v19, %s7754_s15  ;;  %v1946_v19 = vrot.slane %v6925_v22, 1  ;;  %v8409_v36 = vld [vmem:[#allocation2 + $0x68] ss:$0 sps:$4 sm:$0x11]   ;;  %v547_v3 = vor.u32 %v545_v21, %v8399_v2  ;;  %771 = vst [vmem:[#allocation2 + $0x78] sm:$0xf] %v770_v16  ;;  %7359 = vmatprep.subr.msk.bf16.mxu0 %vm10632_vm14, %v7486_v31  ;;  %v1945_v11 = vsel %vm1412_vm12, %v1943_v17, %v1944_v45 }
  0x92   : > { %v269_v14 = vld [vmem:[#allocation2 + $0x84] sm:$0x1]  ;;  %v2843_v49 = vsel %vm10632_vm14, %v7486_v31, 0  ;;  %v8427_v20 = vld [vmem:[%s7871_s9 + $0x50] sm:$0xf]  ;;  %v2250_v7 = vshrl.u32 %v8373_v23, 16  ;;  %v2243_v22 = vor.u32 %v2242_v60, %v2238_v15 }
  0x93   : > { %v1948_v62 = vsel %vm1412_vm12, %v1946_v19, %v1947_v47  ;;  %v7492_v52 = vld [vmem:[%s10627_s1] sm:$0xff]   ;;  %v8430_v6 = vld [vmem:[%s7871_s9 + $0x54] sm:$0xf]  ;;  %v548_v55 = vsel %vm7898_vm10, %v540_v57, %v547_v3  ;;  %7280 = vmatpush3.bf16.msra.mxu0 %v2843_v49  ;;  %v325_v17 = vld [vmem:[#allocation2 + $0x8c] sm:$0x1]  ;;  %v2259_v29 = vrot.slane %v2257_v28, 1 }
  0x94   : > { %1475 = vrot.lane.b32.xlu1 %v1436_v53, %s7749_s10  ;;  %v8420_v53 = vcombine.low %v836_v56, %v8390_v46  ;;  %v8434_v4 = vld [vmem:[#allocation2 + $0x60] sm:$0xe]  ;;  %v2247_v31 = vrot.slane %v2245_v63, 1  ;;  %v1237_v34 = vshrl.u32 %v8388_v30, 16  ;;  %772 = vst.msk [vmem:[#allocation2 + $0x7c] sm:$0xf] %vm10635_vm6, %v548_v55 }
  0x95   : > { %1473 = vrot.lane.b32.xlu0 %v1433_v61, %s7749_s10  ;;  %v1239_v61 = vshll.u32 %v8388_v30, 16  ;;  %v323_v38 = vsel %vm7864_vm5, 0, %v322_v43  ;;  %v272_v27 = vld [vmem:[#allocation2 + $0x90] sm:$0x1]  ;;  %v1244_v45 = vshll.u32 %v8409_v36, 16  ;;  %v2455_v21 = vrot.slane %v6972_v9, 1 }
  0x96   : > { %v2456_v42 = vrot.slane %v8380_v37, 1  ;;  %v1002_v19 = vld [vmem:[#allocation2 + $0x6c] sm:$0xe]  ;;  %v8445_v47 = vld [vmem:[#allocation2 + $0x70] sm:$0xf]  ;;  %v1251_v60 = vshll.u32 %v8420_v53, 16  ;;  %v6878_v58 = vcombine.low %v8434_v4, %v8369_v18 }
  0x97   : > { %324 = vst [vmem:[#allocation2 + $0x80] sm:$0x1] %v323_v38  ;;  %v8447_v15 = vld [vmem:[#allocation2 + $0x74] ss:$0 sps:$4 sm:$0x11]   ;;  %v551_v28 = vshrl.u32 %v8427_v20, 16  ;;  %v6973_v9 = vcombine.low %v1002_v19, %v8353_v26 }
  0x98   : > { %1587 = vrot.lane.b32.xlu1 %v8332_v54, %s7750_s11  ;;  %v7489_v54 = vld [vmem:[%s10627_s1 + $0x8] sm:$0xff]   ;;  %v559_v63 = vshrl.u32 %v8430_v6, 16  ;;  %v562_v16 = vshll.u32 %v8430_v6, 16  ;;  %v273_v49 = vsel %vm7847_vm3, 0, %v272_v27  ;;  %v1256_v26 = vshll.u32 %v8447_v15, 16 }
  0x99   : > { %1585 = vrot.lane.b32.xlu0 %v8322_v24, %s7750_s11  ;;  %v2252_v24 = vshll.u32 %v8373_v23, 16  ;;  %7281 = vmatprep.subr.bf16.mxu0 %v7489_v54  ;;  %v898_v57 = vld [vmem:[#allocation2 + $0x6c] sm:$0xf]  ;;  %v553_v3 = vrot.slane %v551_v28, 7  ;;  %274 = vst [vmem:[#allocation2 + $0x90] sm:$0x1] %v273_v49  ;;  %v2457_v19 = vsel %vm1412_vm12, %v2455_v21, %v2456_v42 }
  0x9a   : > { %7282 = vmatpush3.bf16.msra.mxu0 %v7489_v54  ;;  %v1249_v54 = vshrl.u32 %v8420_v53, 16  ;;  %v875_v6 = vld [vmem:[#allocation2 + $0x6c] sm:$0xe]  ;;  %v8481_v55 = vld [vmem:[#allocation2 + $0x74] ss:$0 sps:$4 sm:$0x11]  }
  0x9b   : > { %v2254_v0 = vrot.slane %v2252_v24, 1  ;;  %v270_v24 = vsel %vm7847_vm3, 0, %v269_v14  ;;  %7283 = vmatprep.subr.bf16.mxu0 %v7492_v52  ;;  %v326_v14 = vsel %vm7864_vm5, 0, %v325_v17  ;;  %v368_v38 = vld [vmem:[%s7871_s9 + $0x58] sm:$0xf]  ;;  %vm2517_vm15 = vcmask 31744  }
  0x9c   : > { %1859 = vrot.lane.b32.xlu1 %v1748_v13, %s7755_s16  ;;  %271 = vst [vmem:[#allocation2 + $0x84] sm:$0x1] %v270_v24  ;;  %v554_v13 = vshll.u32 %v8427_v20, 16  ;;  %327 = vst [vmem:[#allocation2 + $0x8c] sm:$0x1] %v326_v14  ;;  %v1253_v20 = vrot.slane %v1251_v60, 1 }
  0x9d   : > { %1857 = vrot.lane.b32.xlu0 %v1736_v40, %s7755_s16  ;;  %v1241_v40 = vrot.slane %v1239_v61, 1  ;;  %v2255_v37 = vor.u32 %v2254_v0, %v2250_v7  ;;  %v2248_v61 = vsel %vm1139_vm13, %v2243_v22, %v2247_v31  ;;  %v8475_v7 = vcombine.low %v898_v57, %v8445_v47  ;;  %v275_v18 = vld [vmem:[#allocation2 + $0x9c] sm:$0x1] }
  0x9e   : > { %v8417_v44 = vpop.permute.xlu1 %1461  ;;  %v557_v0 = vrot.slane %v553_v3, 4  ;;  %v1246_v22 = vrot.slane %v1244_v45, 1  ;;  %7284 = vmatpush3.bf16.msra.mxu0 %v7492_v52  ;;  %v556_v17 = vor.u32 %v554_v13, %v553_v3  ;;  %v2458_v60 = vrot.slane %v6973_v9, 1  ;;  %v773_v28 = vld [vmem:[#allocation2 + $0x80] sm:$0x1] }
  0x9f   : > { %v2260_v27 = vsel %vm1139_vm13, %v2255_v37, %v2259_v29  ;;  %v2459_v24 = vrot.slane %v8375_v50, 1  ;;  %v8491_v45 = vld [vmem:[#allocation2 + $0x7c] sm:$0xf]  ;;  %v1254_v42 = vor.u32 %v1253_v20, %v1249_v54  ;;  %v1258_v50 = vrot.slane %v1256_v26, 1  ;;  %v328_v3 = vld [vmem:[#allocation2 + $0x98] sm:$0x1] }
  0xa0   : > { %1987 = vrot.lane.b32.xlu1 %v1948_v62, %s7753_s14  ;;  %v549_v62 = vrot.slane %v8399_v2, 4  ;;  %v1242_v2 = vor.u32 %v1241_v40, %v1237_v34  ;;  %v6879_v34 = vcombine.low %v875_v6, %v8390_v46  ;;  %v900_v40 = vld [vmem:[#allocation2 + $0x78] sm:$0xf]  ;;  %v1752_v37 = vshll.u32 %v8475_v7, 16  ;;  %v369_v9 = vld [vmem:[%s7871_s9 + $0x5c] sm:$0xf] }
  0xa1   : > { %1985 = vrot.lane.b32.xlu0 %v1945_v11, %s7753_s14  ;;  %v561_v11 = vrot.slane %v559_v63, 7  ;;  %v568_v46 = vshrl.u32 %v368_v38, 16  ;;  %vm2550_vm1 = vcmask 64512   ;;  %v1441_v14 = vrot.slane %v8447_v15, 1 }
  0xa2   : > { %v774_v52 = vsel %vm7906_vm11, %v549_v62, %v773_v28  ;;  %v1247_v63 = vsel %vm1139_vm13, %v1242_v2, %v1246_v22  ;;  %v1437_v54 = vrot.slane %v6878_v58, 1  ;;  %v8510_v62 = vcombine.low %v900_v40, %v8491_v45  ;;  %v938_v22 = vld [vmem:[#allocation2 + $0x6c] sm:$0xe]  ;;  %v963_v28 = vld [vmem:[#allocation2 + $0x78] sm:$0xf] }
  0xa3   : > { %v8456_v56 = vpop.permute.xlu0 %1573  ;;  %v564_v31 = vor.u32 %v562_v16, %v561_v11  ;;  %v566_v21 = vrot.slane %v561_v11, 4  ;;  %775 = vst [vmem:[#allocation2 + $0x80] sm:$0x1] %v774_v52  ;;  %v776_v57 = vld [vmem:[#allocation2 + $0x84] sm:$0xf]  ;;  %v1757_v16 = vshll.u32 %v8481_v55, 16  ;;  %v2460_v26 = vsel %vm1412_vm12, %v2458_v60, %v2459_v24 }
  0xa4   : > { %v8461_v43 = vpop.permute.xlu1 %1575  ;;  %2099 = vrot.lane.b32.xlu1 %v8373_v23, %s7751_s12  ;;  %v780_v11 = vld [vmem:[#allocation2 + $0x8c] sm:$0x1]  ;;  %v571_v49 = vshll.u32 %v368_v38, 16  ;;  %v1440_v6 = vrot.slane %v6879_v34, 1  ;;  %v1259_v4 = vsel %vm1139_vm13, %v1254_v42, %v1258_v50  ;;  %v1750_v58 = vshrl.u32 %v8475_v7, 16 }
  0xa5   : > { %2097 = vrot.lane.b32.xlu0 %v8356_v33, %s7751_s12  ;;  %v565_v29 = vsel %vm7898_vm10, %v557_v0, %v564_v31  ;;  %v1438_v0 = vrot.slane %v8409_v36, 1  ;;  %v781_v15 = vsel %vm7906_vm11, %v566_v21, %v780_v11  ;;  %v1754_v2 = vrot.slane %v1752_v37, 1  ;;  %v783_v31 = vld [vmem:[#allocation2 + $0x90] sm:$0xf]  ;;  %v8537_v37 = vld [vmem:[#allocation2 + $0x7c] sm:$0xf] }
  0xa6   : > { %779 = vst.msk [vmem:[#allocation2 + $0x88] sm:$0xf] %vm10635_vm6, %v565_v29  ;;  %782 = vst [vmem:[#allocation2 + $0x8c] sm:$0x1] %v781_v15  ;;  %v579_v36 = vshll.u32 %v369_v9, 16  ;;  %v329_v60 = vsel %vm7864_vm5, 0, %v328_v3 }
  0xa7   : > { %v8479_v33 = vpop.permute.xlu0 %2085  ;;  %vm2583_vm2 = vcmask 97280   ;;  %v1764_v24 = vshll.u32 %v8510_v62, 16  ;;  %vm2616_vm7 = vcmask 130048   ;;  %330 = vst [vmem:[#allocation2 + $0x98] sm:$0x1] %v329_v60  ;;  %v276_v52 = vsel %vm7847_vm3, 0, %v275_v18 }
  0xa8   : > { %2371 = vrot.lane.b32.xlu1 %v2260_v27, %s7756_s17  ;;  %v1759_v27 = vrot.slane %v1757_v16, 1  ;;  %277 = vst [vmem:[#allocation2 + $0x9c] sm:$0x1] %v276_v52  ;;  %v1439_v50 = vsel %vm1412_vm12, %v1437_v54, %v1438_v0  ;;  %vm2649_vm8 = vcmask 162816   ;;  %v939_v16 = vld [vmem:[#allocation2 + $0x78] sm:$0xe]  ;;  %v8557_v18 = vcombine.low %v963_v28, %v8537_v37 }
  0xa9   : > { %2369 = vrot.lane.b32.xlu0 %v2248_v61, %s7756_s17  ;;  %v8488_v23 = vpop.permute.xlu1 %2087  ;;  %v777_v61 = vsel %vm7890_vm9, %v556_v17, %v776_v57  ;;  %v570_v17 = vrot.slane %v568_v46, 7  ;;  %v8546_v3 = vld [vmem:[#allocation2 + $0x7c] sm:$0xf]  ;;  %vm2682_vm14 = vcmask 195584   ;;  %vm10637_vm0 = vcmask 228352  }
  0xaa   : > { %778 = vst [vmem:[#allocation2 + $0x84] sm:$0xf] %v777_v61  ;;  %v8532_v21 = vld [vmem:[#allocation2 + $0x80] ss:$0 sps:$4 sm:$0x11]   ;;  %v6926_v61 = vcombine.low %v938_v22, %v8445_v47  ;;  %vm2748_vm4 = vcmask 261120  }
  0xab   : > { %v1333_v13 = vpop.permute.xlu0 %1332  ;;  %v573_v34 = vor.u32 %v571_v49, %v570_v17  ;;  %v574_v40 = vrot.slane %v570_v17, 4  ;;  %v1762_v49 = vshrl.u32 %v8510_v62, 16  ;;  %v1769_v0 = vshll.u32 %v8532_v21, 16 }
  0xac   : > { %1348 = vrot.lane.b32.xlu1 %v1247_v63, %s7752_s13  ;;  %v1442_v63 = vsel %vm1412_vm12, %v1440_v6, %v1441_v14  ;;  %v2519_v11 = vsel %vm2517_vm15, %v7927_v12, %v1333_v13  ;;  %v1755_v6 = vor.u32 %v1754_v2, %v1750_v58  ;;  %v6927_v12 = vcombine.low %v939_v16, %v8491_v45 }
  0xad   : > { %2497 = vrot.lane.b32.xlu0 %v2457_v19, %s7754_s15  ;;  %v8513_v20 = vpop.permute.xlu1 %1463  ;;  %v576_v19 = vshrl.u32 %v369_v9, 16  ;;  %v784_v57 = vsel %vm7890_vm9, %v573_v34, %v783_v31  ;;  %v838_v9 = vld [vmem:[#allocation2 + $0x78] sm:$0xf]  ;;  %v8554_v47 = vld [vmem:[#allocation2 + $0x88] sm:$0xf]  ;;  %v1950_v13 = vrot.slane %v8481_v55, 1  ;;  %v2552_v58 = vsel %vm2550_vm1, %v2519_v11, %v8417_v44 }
  0xae   : > { %785 = vst [vmem:[#allocation2 + $0x90] sm:$0xf] %v784_v57  ;;  %v8564_v22 = vcombine.low %v838_v9, %v8546_v3  ;;  %v1949_v17 = vrot.slane %v6926_v61, 1  ;;  %v1003_v31 = vld [vmem:[#allocation2 + $0x78] sm:$0xe]  ;;  %v1771_v55 = vrot.slane %v1769_v0, 1 }
  0xaf   : > { %v8522_v38 = vpop.permute.xlu0 %1973  ;;  %v8534_v42 = vrot.slane %v576_v19, 7  ;;  %v2264_v28 = vshll.u32 %v8557_v18, 16  ;;  %v1952_v34 = vrot.slane %v6927_v12, 1  ;;  %v1953_v57 = vrot.slane %v8532_v21, 1 }
  0xb0   : > { %1350 = vrot.lane.b32.xlu1 %v1259_v4, %s7752_s13  ;;  %v1263_v52 = vshll.u32 %v8564_v22, 16  ;;  %v1261_v0 = vshrl.u32 %v8564_v22, 16 }
  0xb1   : > { %2499 = vrot.lane.b32.xlu0 %v2460_v26, %s7754_s15  ;;  %v8530_v29 = vpop.permute.xlu1 %1975  ;;  %v581_v54 = vor.u32 %v579_v36, %v8534_v42  ;;  %v1766_v26 = vrot.slane %v1764_v24, 1  ;;  %v965_v15 = vld [vmem:[#allocation2 + $0x84] sm:$0xf]  ;;  %v1760_v24 = vsel %vm1139_vm13, %v1755_v6, %v1759_v27  ;;  %v1954_v12 = vsel %vm1412_vm12, %v1952_v34, %v1953_v57 }
  0xb2   : > { %v8573_v36 = vcombine.low %v965_v15, %v8554_v47  ;;  %v840_v9 = vld [vmem:[#allocation2 + $0x84] sm:$0xf]  ;;  %v1265_v15 = vrot.slane %v1263_v52, 1 }
  0xb3   : > { %v8542_v46 = vpop.permute.xlu0 %2485  ;;  %v582_v4 = vsel %vm7898_vm10, %v574_v40, %v581_v54  ;;  %v1767_v19 = vor.u32 %v1766_v26, %v1762_v49  ;;  %v8583_v40 = vld [vmem:[#allocation2 + $0x80] ss:$0 sps:$4 sm:$0x11]   ;;  %v8600_v54 = vld [vmem:[#allocation2 + $0x88] sm:$0xf]  ;;  %v2266_v49 = vrot.slane %v2264_v28, 1 }
  0xb4   : > { %786 = vst.msk [vmem:[#allocation2 + $0x94] sm:$0xf] %vm10635_vm6, %v582_v4  ;;  %1479 = vrot.lane.b32.xlu1 %v1442_v63, %s7749_s10  ;;  %vm10636_vm6 = vcmask 293888   ;;  %v8594_v63 = vld [vmem:[#allocation2 + $0x8c] ss:$0 sps:$4 sm:$0x11]  }
  0xb5   : > { %1477 = vrot.lane.b32.xlu0 %v1439_v50, %s7749_s10  ;;  %v1848_v14 = vpop.permute.xlu1 %1847  ;;  %v6974_v50 = vcombine.low %v1003_v31, %v8537_v37  ;;  %v1772_v61 = vsel %vm1139_vm13, %v1767_v19, %v1771_v55  ;;  %v2276_v37 = vshll.u32 %v8573_v36, 16  ;;  %v8609_v26 = vld [vmem:[#allocation2 + $0x80] ss:$0 sps:$4 sm:$0x11]   ;;  %v2269_v6 = vshll.u32 %v8583_v40, 16 }
  0xb6   : > { %v8626_v19 = vld [vmem:[#allocation2 + $0x78] sm:$0xe]  ;;  %v583_v55 = vrot.slane %v8534_v42, 4  ;;  %v1268_v28 = vshll.u32 %v8609_v26, 16  ;;  %v2462_v52 = vrot.slane %v8583_v40, 1 }
  0xb7   : > { %v1335_v2 = vpop.permute.xlu0 %1334  ;;  %v2461_v4 = vrot.slane %v6974_v50, 1  ;;  %v2271_v34 = vrot.slane %v2269_v6, 1  ;;  %v8637_v50 = vld [vmem:[#allocation2 + $0x8c] ss:$0 sps:$4 sm:$0x11]  }
  0xb8   : > { %v2521_v45 = vsel %vm2517_vm15, %v7967_v59, %v1335_v2  ;;  %1591 = vrot.lane.b32.xlu1 %v8510_v62, %s7750_s11  ;;  %v2262_v62 = vshrl.u32 %v8557_v18, 16  ;;  %v8621_v2 = vcombine.low %v840_v9, %v8600_v54  ;;  %v331_v9 = vld [vmem:[#allocation2 + $0xa4] sm:$0x1]  ;;  %v8655_v6 = vld [vmem:[#allocation2 + $0x88] sm:$0xf] }
  0xb9   : > { %v2554_v60 = vsel %vm2550_vm1, %v2521_v45, %v8513_v20  ;;  %1589 = vrot.lane.b32.xlu0 %v8475_v7, %s7750_s11  ;;  %v2360_v44 = vpop.permute.xlu1 %2359  ;;  %v2585_v20 = vsel %vm2583_vm2, %v2552_v58, %v8456_v56  ;;  %v2281_v58 = vshll.u32 %v8594_v63, 16  ;;  %v2278_v45 = vrot.slane %v2276_v37, 1 }
  0xba   : > { %v2587_v59 = vsel %vm2583_vm2, %v2554_v60, %v8461_v43  ;;  %v1951_v43 = vsel %vm1412_vm12, %v1949_v17, %v1950_v13  ;;  %v2274_v13 = vshrl.u32 %v8573_v36, 16  ;;  %v787_v17 = vld [vmem:[#allocation2 + $0x98] sm:$0x1]  ;;  %v6880_v37 = vcombine.low %v8626_v19, %v8546_v3 }
  0xbb   : > { %v2620_v7 = vsel %vm2616_vm7, %v2587_v59, %v1848_v14  ;;  %v1846_v27 = vpop.permute.xlu0 %1845  ;;  %v788_v42 = vsel %vm7906_vm11, %v583_v55, %v787_v17 }
  0xbc   : > { %v2618_v16 = vsel %vm2616_vm7, %v2585_v20, %v1846_v27  ;;  %v2653_v56 = vsel %vm2649_vm8, %v2620_v7, %v8530_v29  ;;  %v370_v29 = vld [vmem:[%s7871_s9 + $0x60] sm:$0xf]  ;;  %1863 = vrot.lane.b32.xlu1 %v1772_v61, %s7755_s16  ;;  %v1004_v20 = vld [vmem:[#allocation2 + $0x84] sm:$0xe]  ;;  %789 = vst [vmem:[#allocation2 + $0x98] sm:$0x1] %v788_v42  ;;  %v2279_v57 = vor.u32 %v2278_v45, %v2274_v13 }
  0xbd   : > { %v2651_v21 = vsel %vm2649_vm8, %v2618_v16, %v8522_v38  ;;  %1861 = vrot.lane.b32.xlu0 %v1760_v24, %s7755_s16  ;;  %v8607_v11 = vpop.permute.xlu1 %1336  ;;  %v585_v59 = vshrl.u32 %v370_v29, 16  ;;  %v1275_v16 = vshll.u32 %v8621_v2, 16  ;;  %v371_v61 = vld [vmem:[%s7871_s9 + $0x64] sm:$0xf]  ;;  %v588_v3 = vshll.u32 %v370_v29, 16 }
  0xbe   : > { %v2684_v14 = vsel %vm2682_vm14, %v2651_v21, %v8479_v33  ;;  %v2686_v33 = vsel %vm2682_vm14, %v2653_v56, %v8488_v23  ;;  %v2267_v23 = vor.u32 %v2266_v49, %v2262_v62  ;;  %v902_v62 = vld [vmem:[#allocation2 + $0x84] sm:$0xf]  ;;  %v1270_v21 = vrot.slane %v1268_v28, 1  ;;  %v790_v45 = vld [vmem:[#allocation2 + $0x9c] sm:$0xf] }
  0xbf   : > { %v2358_v38 = vpop.permute.xlu0 %2357  ;;  %v2719_v7 = vsel %vm10637_vm0, %v2686_v33, %v2360_v44  ;;  %v1266_v44 = vor.u32 %v1265_v15, %v1261_v0  ;;  %v6975_v49 = vcombine.low %v1004_v20, %v8554_v47  ;;  %v1273_v0 = vshrl.u32 %v8621_v2, 16  ;;  %v8662_v15 = vld [vmem:[#allocation2 + $0x94] sm:$0xf] }
  0xc0   : > { %v2717_v31 = vsel %vm10637_vm0, %v2684_v14, %v2358_v38  ;;  %1991 = vrot.lane.b32.xlu1 %v1954_v12, %s7753_s14  ;;  %v2272_v56 = vsel %vm1139_vm13, %v2267_v23, %v2271_v34  ;;  %v904_v14 = vld [vmem:[#allocation2 + $0x90] sm:$0xf]  ;;  %v587_v38 = vrot.slane %v585_v59, 7  ;;  %v593_v12 = vshrl.u32 %v371_v61, 16 }
  0xc1   : > { %1989 = vrot.lane.b32.xlu0 %v1951_v43, %s7753_s14  ;;  %v8630_v60 = vpop.permute.xlu1 %1338  ;;  %v2750_v24 = vsel %vm2748_vm4, %v2717_v31, %v8542_v46  ;;  %v2283_v43 = vrot.slane %v2281_v58, 1  ;;  %v596_v13 = vshll.u32 %v371_v61, 16  ;;  %v2463_v47 = vsel %vm1412_vm12, %v2461_v4, %v2462_v52  ;;  %v877_v31 = vld [vmem:[#allocation2 + $0x84] sm:$0xe]  ;;  %v941_v23 = vld [vmem:[#allocation2 + $0x90] sm:$0xe] }
  0xc2   : > { %7285 = vmatprep.mubr.msk.bf16.mxu0 %vm10636_vm6, %v2750_v24  ;;  %v1277_v17 = vrot.slane %v1275_v16, 1  ;;  %v1280_v33 = vshll.u32 %v8637_v50, 16  ;;  %v591_v19 = vrot.slane %v587_v38, 4  ;;  %v595_v55 = vrot.slane %v593_v12, 7 }
  0xc3   : > { %v2488_v46 = vpop.permute.xlu0 %2487  ;;  %v2284_v58 = vsel %vm1139_vm13, %v2279_v57, %v2283_v43  ;;  %v332_v24 = vsel %vm7864_vm5, 0, %v331_v9  ;;  %v2464_v29 = vrot.slane %v6975_v49, 1  ;;  %v2465_v28 = vrot.slane %v8594_v63, 1  ;;  %v940_v43 = vld [vmem:[#allocation2 + $0x84] sm:$0xe] }
  0xc4   : > { %v2752_v27 = vsel %vm2748_vm4, %v2719_v7, %v2488_v46  ;;  %2103 = vrot.lane.b32.xlu1 %v8573_v36, %s7751_s12  ;;  %v590_v36 = vor.u32 %v588_v3, %v587_v38  ;;  %v8672_v59 = vcombine.low %v904_v14, %v8662_v15  ;;  %v8675_v4 = vcombine.low %v902_v62, %v8655_v6  ;;  %v8683_v7 = vld [vmem:[#allocation2 + $0x8c] ss:$0 sps:$4 sm:$0x11]   ;;  %v967_v62 = vld [vmem:[#allocation2 + $0x90] sm:$0xf] }
  0xc5   : > { %2101 = vrot.lane.b32.xlu0 %v8557_v18, %s7751_s12  ;;  %7286 = vmatmul.mubr.msk.bf16.vlgmr.msra.gmra.mxu0 %vm10636_vm6, %v2752_v27  ;;  %v8649_v40 = vpop.permute.xlu1 %1467  ;;  %333 = vst [vmem:[#allocation2 + $0xa4] sm:$0x1] %v332_v24  ;;  %v6881_v42 = vcombine.low %v877_v31, %v8600_v54  ;;  %v598_v46 = vor.u32 %v596_v13, %v595_v55  ;;  %v1282_v57 = vrot.slane %v1280_v33, 1  ;;  %v1443_v16 = vrot.slane %v6880_v37, 1  ;;  %v8692_v9 = vld [vmem:[#allocation2 + $0x94] sm:$0xf] }
  0xc6   : > { %v791_v63 = vsel %vm7890_vm9, %v590_v36, %v790_v45  ;;  %v1271_v20 = vsel %vm1139_vm13, %v1266_v44, %v1270_v21  ;;  %v1278_v27 = vor.u32 %v1277_v17, %v1273_v0  ;;  %v1444_v61 = vrot.slane %v8609_v26, 1  ;;  %v278_v3 = vld [vmem:[#allocation2 + $0xa8] sm:$0x1]  ;;  %v8705_v13 = vld [vmem:[#allocation2 + $0x98] ss:$0 sps:$4 sm:$0x11]  }
  0xc7   : > { %v8659_v18 = vpop.permute.xlu0 %1465  ;;  %792 = vst [vmem:[#allocation2 + $0x9c] sm:$0xf] %v791_v63  ;;  %v599_v54 = vsel %vm7898_vm10, %v591_v19, %v598_v46  ;;  %v1788_v44 = vshll.u32 %v8672_v59, 16  ;;  %v1776_v21 = vshll.u32 %v8675_v4, 16  ;;  %v600_v49 = vrot.slane %v595_v55, 4 }
  0xc8   : > { %2375 = vrot.lane.b32.xlu1 %v2284_v58, %s7756_s17  ;;  %vm10650_vm6 = vcmask 27648   ;;  %v1446_v26 = vrot.slane %v6881_v42, 1  ;;  %v1447_v14 = vrot.slane %v8637_v50, 1  ;;  %v1781_v38 = vshll.u32 %v8683_v7, 16  ;;  %v8712_v17 = vld [vmem:[%s7871_s9 + $0x68] sm:$0xf] }
  0xc9   : > { %2373 = vrot.lane.b32.xlu0 %v2272_v56, %s7756_s17  ;;  %v8678_v34 = vpop.permute.xlu1 %1579  ;;  %v2466_v56 = vsel %vm1412_vm12, %v2464_v29, %v2465_v28  ;;  %793 = vst.msk [vmem:[#allocation2 + $0xa0] sm:$0xf] %vm10650_vm6, %v599_v54  ;;  %v6929_v0 = vcombine.low %v941_v23, %v8662_v15  ;;  %v1283_v12 = vsel %vm1139_vm13, %v1278_v27, %v1282_v57  ;;  %v1786_v31 = vshrl.u32 %v8672_v59, 16  ;;  %v842_v36 = vld [vmem:[#allocation2 + $0x90] sm:$0xf] }
  0xca   : > { %v6928_v58 = vcombine.low %v940_v43, %v8655_v6  ;;  %v2525_v50 = vsel %vm2517_vm15, %v8015_v48, %v8630_v60  ;;  %v1445_v15 = vsel %vm1412_vm12, %v1443_v16, %v1444_v61  ;;  %v1790_v6 = vrot.slane %v1788_v44, 1  ;;  %v8725_v29 = vld [vmem:[#allocation2 + $0x94] sm:$0xf]  ;;  %v1005_v57 = vld [vmem:[#allocation2 + $0x90] sm:$0xe] }
  0xcb   : > { %v8680_v52 = vpop.permute.xlu0 %1577  ;;  %v1774_v19 = vshrl.u32 %v8675_v4, 16  ;;  %v1778_v55 = vrot.slane %v1776_v21, 1  ;;  %v1448_v60 = vsel %vm1412_vm12, %v1446_v26, %v1447_v14  ;;  %v1783_v28 = vrot.slane %v1781_v38, 1  ;;  %v373_v38 = vld [vmem:[%s7871_s9 + $0x6c] sm:$0xf] }
  0xcc   : > { %1352 = vrot.lane.b32.xlu1 %v1271_v20, %s7752_s13  ;;  %v794_v45 = vld [vmem:[#allocation2 + $0xa4] sm:$0x1]  ;;  %v1958_v23 = vrot.slane %v6929_v0, 1  ;;  %v1956_v42 = vrot.slane %v8683_v7, 1  ;;  %v1793_v63 = vshll.u32 %v8705_v13, 16  ;;  %v1955_v20 = vrot.slane %v6928_v58, 1 }
  0xcd   : > { %2501 = vrot.lane.b32.xlu0 %v2463_v47, %s7754_s15  ;;  %v8709_v47 = vcombine.low %v967_v62, %v8692_v9  ;;  %v795_v24 = vsel %vm7906_vm11, %v600_v49, %v794_v45  ;;  %v279_v43 = vsel %vm7847_vm3, 0, %v278_v3  ;;  %v2523_v16 = vsel %vm2517_vm15, %v8000_v39, %v8607_v11  ;;  %v8744_v62 = vld [vmem:[#allocation2 + $0x98] ss:$0 sps:$4 sm:$0x11]  }
  0xce   : > { %v8717_v33 = vpop.permute.xlu1 %1851  ;;  %v969_v46 = vld [vmem:[#allocation2 + $0x9c] sm:$0xf]  ;;  %796 = vst [vmem:[#allocation2 + $0xa4] sm:$0x1] %v795_v24  ;;  %v2558_v61 = vsel %vm2550_vm1, %v2525_v50, %v8649_v40  ;;  %280 = vst [vmem:[#allocation2 + $0xa8] sm:$0x1] %v279_v43  ;;  %v2556_v39 = vsel %vm2550_vm1, %v2523_v16, %v8659_v18  ;;  %v1791_v11 = vor.u32 %v1790_v6, %v1786_v31 }
  0xcf   : > { %v8699_v37 = vpop.permute.xlu0 %1849  ;;  %v2288_v27 = vshll.u32 %v8709_v47, 16  ;;  %v602_v44 = vshrl.u32 %v8712_v17, 16  ;;  %v1779_v40 = vor.u32 %v1778_v55, %v1774_v19  ;;  %v1959_v26 = vrot.slane %v8705_v13, 1 }
  0xd0   : > { %1354 = vrot.lane.b32.xlu1 %v1283_v12, %s7752_s13  ;;  %v8742_v54 = vld [vmem:[#allocation2 + $0xa0] sm:$0xf]  ;;  %v6976_v14 = vcombine.low %v1005_v57, %v8692_v9  ;;  %v605_v3 = vshll.u32 %v8712_v17, 16  ;;  %v1795_v12 = vrot.slane %v1793_v63, 1  ;;  %v1957_v18 = vsel %vm1412_vm12, %v1955_v20, %v1956_v42 }
  0xd1   : > { %2503 = vrot.lane.b32.xlu0 %v2466_v56, %s7754_s15  ;;  %v8747_v56 = vcombine.low %v842_v36, %v8725_v29  ;;  %v8753_v21 = vcombine.low %v969_v46, %v8742_v54  ;;  %v8759_v0 = vrot.slane %v602_v44, 7  ;;  %v2286_v58 = vshrl.u32 %v8709_v47, 16  ;;  %v844_v36 = vld [vmem:[#allocation2 + $0x9c] sm:$0xf]  ;;  %v8777_v24 = vld [vmem:[#allocation2 + $0xa0] sm:$0xf] }
  0xd2   : > { %v8739_v7 = vpop.permute.xlu1 %1979  ;;  %v2290_v50 = vrot.slane %v2288_v27, 1  ;;  %v2591_v31 = vsel %vm2583_vm2, %v2558_v61, %v8678_v34  ;;  %v2293_v9 = vshll.u32 %v8744_v62, 16  ;;  %v2589_v6 = vsel %vm2583_vm2, %v2556_v39, %v8680_v52 }
  0xd3   : > { %v1978_v48 = vpop.permute.xlu0 %1977  ;;  %v1285_v13 = vshrl.u32 %v8747_v56, 16  ;;  %v1287_v17 = vshll.u32 %v8747_v56, 16  ;;  %v1784_v19 = vsel %vm1139_vm13, %v1779_v40, %v1783_v28  ;;  %v2300_v55 = vshll.u32 %v8753_v21, 16 }
  0xd4   : > { %1483 = vrot.lane.b32.xlu1 %v1448_v60, %s7749_s10  ;;  %v610_v34 = vshrl.u32 %v373_v38, 16  ;;  %v334_v60 = vld [vmem:[#allocation2 + $0xb0] sm:$0x1]  ;;  %v1960_v46 = vsel %vm1412_vm12, %v1958_v23, %v1959_v26  ;;  %v8786_v52 = vrot.slane %v6976_v14, 1  ;;  %v607_v28 = vor.u32 %v605_v3, %v8759_v0 }
  0xd5   : > { %1481 = vrot.lane.b32.xlu0 %v1445_v15, %s7749_s10  ;;  %v8764_v15 = vld [vmem:[#allocation2 + $0x98] ss:$0 sps:$4 sm:$0x11]   ;;  %v8784_v63 = vld [vmem:[#allocation2 + $0xa4] ss:$0 sps:$4 sm:$0x11]   ;;  %v1796_v27 = vsel %vm1139_vm13, %v1791_v11, %v1795_v12  ;;  %v2291_v57 = vor.u32 %v2290_v50, %v2286_v58  ;;  %v8795_v44 = vcombine.low %v844_v36, %v8777_v24 }
  0xd6   : > { %v2092_v45 = vpop.permute.xlu1 %2091  ;;  %v613_v43 = vshll.u32 %v373_v38, 16  ;;  %v797_v16 = vld [vmem:[#allocation2 + $0xa8] sm:$0xf]  ;;  %v1292_v23 = vshll.u32 %v8764_v15, 16  ;;  %v2298_v39 = vshrl.u32 %v8753_v21, 16  ;;  %v2302_v40 = vrot.slane %v2300_v55, 1 }
  0xd7   : > { %v2090_v49 = vpop.permute.xlu0 %2089  ;;  %v8799_v11 = vrot.slane %v610_v34, 7  ;;  %v2305_v14 = vshll.u32 %v8784_v63, 16  ;;  %v798_v38 = vsel %vm7890_vm9, %v607_v28, %v797_v16  ;;  %v335_v3 = vsel %vm7864_vm5, 0, %v334_v60  ;;  %v281_v12 = vld [vmem:[#allocation2 + $0xb4] sm:$0x1] }
  0xd8   : > { %1595 = vrot.lane.b32.xlu1 %v8672_v59, %s7750_s11  ;;  %v2295_v59 = vrot.slane %v2293_v9, 1  ;;  %v2468_v50 = vrot.slane %v8744_v62, 1  ;;  %799 = vst [vmem:[#allocation2 + $0xa8] sm:$0xf] %v798_v38  ;;  %336 = vst [vmem:[#allocation2 + $0xb0] sm:$0x1] %v335_v3  ;;  %v2303_v28 = vor.u32 %v2302_v40, %v2298_v39 }
  0xd9   : > { %1593 = vrot.lane.b32.xlu0 %v8675_v4, %s7750_s11  ;;  %v2622_v4 = vsel %vm2616_vm7, %v2589_v6, %v8699_v37  ;;  %v615_v9 = vor.u32 %v613_v43, %v8799_v11  ;;  %v374_v36 = vld [vmem:[%s7871_s9 + $0x70] sm:$0xf]  ;;  %v375_v6 = vld [vmem:[%s7871_s9 + $0x74] sm:$0xf]  ;;  %vm10651_vm6 = vcmask 293888   ;;  %v8822_v34 = vrot.slane %v1292_v23, 1 }
  0xda   : > { %v2655_v20 = vsel %vm2649_vm8, %v2622_v4, %v1978_v48  ;;  %v2364_v61 = vpop.permute.xlu1 %2363  ;;  %v608_v48 = vrot.slane %v8759_v0, 4  ;;  %v2624_v0 = vsel %vm2616_vm7, %v2591_v31, %v8717_v33  ;;  %v2296_v33 = vsel %vm1139_vm13, %v2291_v57, %v2295_v59  ;;  %v337_v60 = vld [vmem:[#allocation2 + $0xbc] sm:$0x1]  ;;  %v284_v4 = vld [vmem:[#allocation2 + $0xc0] sm:$0x1] }
  0xdb   : > { %v2362_v42 = vpop.permute.xlu0 %2361  ;;  %v2688_v37 = vsel %vm2682_vm14, %v2655_v20, %v2090_v49  ;;  %v1289_v31 = vrot.slane %v1287_v17, 1  ;;  %v1299_v20 = vshll.u32 %v8795_v44, 16  ;;  %v906_v43 = vld [vmem:[#allocation2 + $0x9c] sm:$0xf]  ;;  %v2307_v17 = vrot.slane %v2305_v14, 1 }
  0xdc   : > { %v2721_v49 = vsel %vm10637_vm0, %v2688_v37, %v2362_v42  ;;  %1867 = vrot.lane.b32.xlu1 %v1796_v27, %s7755_s16  ;;  %v1006_v27 = vld [vmem:[#allocation2 + $0x9c] sm:$0xe]  ;;  %v8830_v16 = vld [vmem:[#allocation2 + $0xa4] ss:$0 sps:$4 sm:$0x11]   ;;  %v619_v37 = vshrl.u32 %v374_v36, 16 }
  0xdd   : > { %1865 = vrot.lane.b32.xlu0 %v1784_v19, %s7755_s16  ;;  %v2657_v19 = vsel %vm2649_vm8, %v2624_v0, %v8739_v7  ;;  %v616_v7 = vsel %vm7898_vm10, %v608_v48, %v615_v9  ;;  %v617_v23 = vrot.slane %v8799_v11, 4  ;;  %v8837_v39 = vld [vmem:[#allocation2 + $0xa0] sm:$0xf]  ;;  %v627_v40 = vshrl.u32 %v375_v6, 16 }
  0xde   : > { %v8817_v55 = vpop.permute.xlu1 %1340  ;;  %v2690_v42 = vsel %vm2682_vm14, %v2657_v19, %v2092_v45  ;;  %v282_v45 = vsel %vm7847_vm3, 0, %v281_v12  ;;  %v1290_v48 = vor.u32 %v1289_v31, %v1285_v13  ;;  %v630_v14 = vshll.u32 %v375_v6, 16  ;;  %v879_v12 = vld [vmem:[#allocation2 + $0x9c] sm:$0xe] }
  0xdf   : > { %v2490_v26 = vpop.permute.xlu0 %2489  ;;  %283 = vst [vmem:[#allocation2 + $0xb4] sm:$0x1] %v282_v45  ;;  %v338_v11 = vsel %vm7864_vm5, 0, %v337_v60  ;;  %v1297_v38 = vshrl.u32 %v8795_v44, 16  ;;  %v6977_v3 = vcombine.low %v1006_v27, %v8742_v54  ;;  %v629_v0 = vrot.slane %v627_v40, 7 }
  0xe0   : > { %v2754_v58 = vsel %vm2748_vm4, %v2721_v49, %v2490_v26  ;;  %1995 = vrot.lane.b32.xlu1 %v1960_v46, %s7753_s14  ;;  %v878_v49 = vld [vmem:[#allocation2 + $0x90] sm:$0xe]  ;;  %v621_v26 = vrot.slane %v619_v37, 7  ;;  %339 = vst [vmem:[#allocation2 + $0xbc] sm:$0x1] %v338_v11  ;;  %v1301_v9 = vrot.slane %v1299_v20, 1  ;;  %v8859_v6 = vcombine.low %v906_v43, %v8837_v39 }
  0xe1   : > { %1993 = vrot.lane.b32.xlu0 %v1957_v18, %s7753_s14  ;;  %7289 = vmatprep.mubr.msk.bf16.mxu0 %vm10651_vm6, %v2754_v58  ;;  %v2723_v18 = vsel %vm10637_vm0, %v2690_v42, %v2364_v61  ;;  %vm10652_vm6 = vcmask 27648   ;;  %v622_v61 = vshll.u32 %v374_v36, 16  ;;  %vm10653_vm0 = vcmask 293888   ;;  %v801_v54 = vld [vmem:[#allocation2 + $0xb0] sm:$0x1] }
  0xe2   : > { %800 = vst.msk [vmem:[#allocation2 + $0xac] sm:$0xf] %vm10652_vm6, %v616_v7  ;;  %v8839_v46 = vpop.permute.xlu1 %1342  ;;  %v2308_v58 = vsel %vm1139_vm13, %v2303_v28, %v2307_v17  ;;  %v1304_v36 = vshll.u32 %v8830_v16, 16  ;;  %v802_v19 = vsel %vm7906_vm11, %v617_v23, %v801_v54  ;;  %v625_v60 = vrot.slane %v621_v26, 4  ;;  %v908_v27 = vld [vmem:[#allocation2 + $0xa8] sm:$0xf] }
  0xe3   : > { %v2492_v57 = vpop.permute.xlu0 %2491  ;;  %v624_v31 = vor.u32 %v622_v61, %v621_v26  ;;  %v6883_v28 = vcombine.low %v879_v12, %v8777_v24  ;;  %v6882_v20 = vcombine.low %v878_v49, %v8725_v29  ;;  %803 = vst [vmem:[#allocation2 + $0xb0] sm:$0x1] %v802_v19  ;;  %v2470_v7 = vrot.slane %v6977_v3, 1  ;;  %v943_v54 = vld [vmem:[#allocation2 + $0xa8] sm:$0xe] }
  0xe4   : > { %v2756_v59 = vsel %vm2748_vm4, %v2723_v18, %v2492_v57  ;;  %2107 = vrot.lane.b32.xlu1 %v8753_v21, %s7751_s12  ;;  %v2469_v21 = vsel %vm1412_vm12, %v8786_v52, %v2468_v50  ;;  %v2471_v43 = vrot.slane %v8784_v63, 1  ;;  %v1295_v24 = vsel %vm1139_vm13, %v1290_v48, %v8822_v34  ;;  %v8882_v52 = vld [vmem:[#allocation2 + $0xa4] ss:$0 sps:$4 sm:$0x11]  }
  0xe5   : > { %2105 = vrot.lane.b32.xlu0 %v8709_v47, %s7751_s12  ;;  %7290 = vmatmul.mubr.msk.bf16.gmra.mxu0 %vm10653_vm0, %v2756_v59  ;;  %v285_v47 = vsel %vm7847_vm3, 0, %v284_v4  ;;  %v632_v4 = vor.u32 %v630_v14, %v629_v0  ;;  %v1800_v29 = vshll.u32 %v8859_v6, 16  ;;  %vm10654_vm0 = vmmov %vm10652_vm6  ;;  %v1302_v63 = vor.u32 %v1301_v9, %v1297_v38  ;;  %v942_v14 = vld [vmem:[#allocation2 + $0x9c] sm:$0xe] }
  0xe6   : > { %286 = vst [vmem:[#allocation2 + $0xc0] sm:$0x1] %v285_v47  ;;  %v8863_v42 = vpop.permute.xlu1 %1471  ;;  %v804_v50 = vld [vmem:[#allocation2 + $0xb4] sm:$0xf]  ;;  %v1306_v17 = vrot.slane %v1304_v36, 1  ;;  %v1452_v34 = vrot.slane %v6883_v28, 1  ;;  %v2472_v48 = vsel %vm1412_vm12, %v2470_v7, %v2471_v43  ;;  %v6930_v28 = vcombine.low %v942_v14, %v8837_v39 }
  0xe7   : > { %v8854_v13 = vpop.permute.xlu0 %1469  ;;  %v633_v57 = vsel %vm7898_vm10, %v625_v60, %v632_v4  ;;  %v805_v37 = vsel %vm7890_vm9, %v624_v31, %v804_v50  ;;  %v1449_v23 = vrot.slane %v6882_v20, 1  ;;  %v1450_v61 = vrot.slane %v8764_v15, 1  ;;  %v808_v40 = vld [vmem:[#allocation2 + $0xbc] sm:$0x1]  ;;  %v971_v15 = vld [vmem:[#allocation2 + $0xa8] sm:$0xf] }
  0xe8   : > { %2379 = vrot.lane.b32.xlu1 %v2308_v58, %s7756_s17  ;;  %807 = vst.msk [vmem:[#allocation2 + $0xb8] sm:$0xf] %vm10654_vm0, %v633_v57  ;;  %806 = vst [vmem:[#allocation2 + $0xb4] sm:$0xf] %v805_v37  ;;  %v1453_v49 = vrot.slane %v8830_v16, 1  ;;  %v1798_v26 = vshrl.u32 %v8859_v6, 16  ;;  %v1307_v47 = vsel %vm1139_vm13, %v1302_v63, %v1306_v17  ;;  %v2527_v37 = vsel %vm2517_vm15, %v8116_v10, %v8817_v55 }
  0xe9   : > { %2377 = vrot.lane.b32.xlu0 %v2296_v33, %s7756_s17  ;;  %v8873_v18 = vld [vmem:[#allocation2 + $0xac] sm:$0xf]  ;;  %v634_v33 = vrot.slane %v629_v0, 4  ;;  %v1802_v3 = vrot.slane %v1800_v29, 1  ;;  %v1805_v12 = vshll.u32 %v8882_v52, 16  ;;  %v1451_v36 = vsel %vm1412_vm12, %v1449_v23, %v1450_v61 }
  0xea   : > { %v8887_v45 = vcombine.low %v908_v27, %v8873_v18  ;;  %v8891_v59 = vpop.permute.xlu1 %1583  ;;  %v8902_v0 = vld [vmem:[#allocation2 + $0xac] sm:$0xf]  ;;  %v8905_v16 = vld [vmem:[#allocation2 + $0xb0] ss:$0 sps:$4 sm:$0x11]   ;;  %v1454_v7 = vsel %vm1412_vm12, %v1452_v34, %v1453_v49  ;;  %v6931_v39 = vcombine.low %v943_v54, %v8873_v18  ;;  %v1961_v61 = vrot.slane %v6930_v28, 1 }
  0xeb   : > { %v8878_v62 = vpop.permute.xlu0 %1581  ;;  %v809_v11 = vsel %vm7906_vm11, %v634_v33, %v808_v40  ;;  %v8911_v19 = vcombine.low %v971_v15, %v8902_v0  ;;  %v8914_v31 = vld [vmem:[%s7871_s9 + $0x78] sm:$0xf]  ;;  %v1803_v4 = vor.u32 %v1802_v3, %v1798_v26  ;;  %v846_v20 = vld [vmem:[#allocation2 + $0xa8] sm:$0xf]  ;;  %v8918_v27 = vld [vmem:[#allocation2 + $0xac] sm:$0xf] }
  0xec   : > { %1356 = vrot.lane.b32.xlu1 %v1295_v24, %s7752_s13  ;;  %810 = vst [vmem:[#allocation2 + $0xbc] sm:$0x1] %v809_v11  ;;  %v1812_v58 = vshll.u32 %v8887_v45, 16  ;;  %v1810_v43 = vshrl.u32 %v8887_v45, 16  ;;  %v1817_v33 = vshll.u32 %v8905_v16, 16  ;;  %v2529_v24 = vsel %vm2517_vm15, %v8134_v32, %v8839_v46 }
  0xed   : > { %2505 = vrot.lane.b32.xlu0 %v2469_v21, %s7754_s15  ;;  %v1807_v21 = vrot.slane %v1805_v12, 1  ;;  %v636_v17 = vshrl.u32 %v8914_v31, 16  ;;  %v2312_v34 = vshll.u32 %v8911_v19, 16  ;;  %v8938_v23 = vcombine.low %v846_v20, %v8918_v27  ;;  %v8950_v26 = vld [vmem:[#allocation2 + $0xb0] ss:$0 sps:$4 sm:$0x11]  }
  0xee   : > { %v1856_v9 = vpop.permute.xlu1 %1855  ;;  %v1814_v57 = vrot.slane %v1812_v58, 1  ;;  %v2560_v32 = vsel %vm2550_vm1, %v2527_v37, %v8854_v13  ;;  %v1962_v40 = vrot.slane %v8882_v52, 1  ;;  %v2562_v10 = vsel %vm2550_vm1, %v2529_v24, %v8863_v42  ;;  %v8952_v13 = vld [vmem:[#allocation2 + $0xa8] sm:$0xe]  ;;  %v377_v52 = vld [vmem:[%s7871_s9 + $0x7c] sm:$0xf] }
  0xef   : > { %v1854_v38 = vpop.permute.xlu0 %1853  ;;  %v973_v50 = vld [vmem:[#allocation2 + $0xb4] sm:$0xf]  ;;  %v8930_v63 = vld [vmem:[#allocation2 + $0xb8] sm:$0xf]  ;;  %v1808_v18 = vsel %vm1139_vm13, %v1803_v4, %v1807_v21  ;;  %v1964_v11 = vrot.slane %v6931_v39, 1  ;;  %v1965_v3 = vrot.slane %v8905_v16, 1  ;;  %v2593_v15 = vsel %vm2583_vm2, %v2560_v32, %v8878_v62 }
  0xf0   : > { %1358 = vrot.lane.b32.xlu1 %v1307_v47, %s7752_s13  ;;  %v1815_v55 = vor.u32 %v1814_v57, %v1810_v43  ;;  %v8948_v49 = vcombine.low %v973_v50, %v8930_v63  ;;  %v8958_v12 = vrot.slane %v636_v17, 7  ;;  %v639_v42 = vshll.u32 %v8914_v31, 16  ;;  %v811_v54 = vld [vmem:[#allocation2 + $0xc0] sm:$0xf]  ;;  %v848_v21 = vld [vmem:[#allocation2 + $0xb4] sm:$0xf] }
  0xf1   : > { %2507 = vrot.lane.b32.xlu0 %v2472_v48, %s7754_s15  ;;  %v1819_v48 = vrot.slane %v1817_v33, 1  ;;  %v2310_v47 = vshrl.u32 %v8911_v19, 16  ;;  %v2314_v58 = vrot.slane %v2312_v34, 1  ;;  %v2626_v4 = vsel %vm2616_vm7, %v2593_v15, %v1854_v38  ;;  %v8973_v28 = vld [vmem:[#allocation2 + $0xb8] sm:$0xf] }
  0xf2   : > { %v8926_v29 = vpop.permute.xlu1 %1983  ;;  %v1963_v31 = vsel %vm1412_vm12, %v1961_v61, %v1962_v40  ;;  %v6978_v62 = vcombine.low %v8952_v13, %v8902_v0  ;;  %v2317_v38 = vshll.u32 %v8950_v26, 16  ;;  %v1966_v33 = vsel %vm1412_vm12, %v1964_v11, %v1965_v3  ;;  %v340_v50 = vld [vmem:[#allocation2 + $0xc8] sm:$0x1]  ;;  %v8986_v17 = vld [vmem:[#allocation2 + $0xb0] ss:$0 sps:$4 sm:$0x11]  }
  0xf3   : > { %v1982_v60 = vpop.permute.xlu0 %1981  ;;  %v8977_v43 = vld [vmem:[#allocation2 + $0xbc] ss:$0 sps:$4 sm:$0x11]   ;;  %v641_v24 = vor.u32 %v639_v42, %v8958_v12  ;;  %v644_v39 = vshrl.u32 %v377_v52, 16  ;;  %v8989_v37 = vcombine.low %v848_v21, %v8973_v28  ;;  %v642_v34 = vrot.slane %v8958_v12, 4 }
  0xf4   : > { %1487 = vrot.lane.b32.xlu1 %v1454_v7, %s7749_s10  ;;  %v1820_v7 = vsel %vm1139_vm13, %v1815_v55, %v1819_v48  ;;  %v647_v32 = vshll.u32 %v377_v52, 16  ;;  %vm10655_vm6 = vcmask 228352   ;;  %v2322_v61 = vshrl.u32 %v8948_v49, 16  ;;  %v343_v52 = vld [vmem:[#allocation2 + $0xd4] sm:$0x1] }
  0xf5   : > { %1485 = vrot.lane.b32.xlu0 %v1451_v36, %s7749_s10  ;;  %v1311_v36 = vshll.u32 %v8938_v23, 16  ;;  %v8995_v40 = vrot.slane %v644_v39, 7  ;;  %v2329_v11 = vshll.u32 %v8977_v43, 16  ;;  %v341_v3 = vsel %vm7864_vm5, 0, %v340_v50 }
  0xf6   : > { %v2096_v14 = vpop.permute.xlu1 %2095  ;;  %vm10656_vm0 = vcmask 293888   ;;  %v1309_v35 = vshrl.u32 %v8938_v23, 16  ;;  %342 = vst [vmem:[#allocation2 + $0xc8] sm:$0x1] %v341_v3  ;;  %v1316_v21 = vshll.u32 %v8986_v17, 16  ;;  %v2474_v39 = vrot.slane %v8950_v26, 1 }
  0xf7   : > { %v2094_v46 = vpop.permute.xlu0 %2093  ;;  %v1313_v15 = vrot.slane %v1311_v36, 1  ;;  %v651_v8 = vrot.slane %v8995_v40, 4  ;;  %v1321_v0 = vshrl.u32 %v8989_v37, 16 }
  0xf8   : > { %1599 = vrot.lane.b32.xlu1 %v8887_v45, %s7750_s11  ;;  %v2659_v45 = vsel %vm2649_vm8, %v2626_v4, %v1982_v60  ;;  %v2315_v4 = vor.u32 %v2314_v58, %v2310_v47  ;;  %v2331_v58 = vrot.slane %v2329_v11, 1  ;;  %v2477_v11 = vrot.slane %v8977_v43, 1 }
  0xf9   : > { %1597 = vrot.lane.b32.xlu0 %v8859_v6, %s7750_s11  ;;  %v2595_v6 = vsel %vm2583_vm2, %v2562_v10, %v8891_v59  ;;  %v2324_v59 = vshll.u32 %v8948_v49, 16  ;;  %v287_v10 = vld [vmem:[#allocation2 + $0xcc] sm:$0x1] }
  0xfa   : > { %v2628_v20 = vsel %vm2616_vm7, %v2595_v6, %v1856_v9  ;;  %v2368_v57 = vpop.permute.xlu1 %2367  ;;  %v2692_v9 = vsel %vm2682_vm14, %v2659_v45, %v2094_v46  ;;  %v812_v46 = vsel %vm7890_vm9, %v641_v24, %v811_v54  ;;  %v649_v54 = vor.u32 %v647_v32, %v8995_v40  ;;  %vm10657_vm9 = vmmov %vm10655_vm6 }
  0xfb   : > { %v2366_v16 = vpop.permute.xlu0 %2365  ;;  %v2326_v48 = vrot.slane %v2324_v59, 1  ;;  %813 = vst [vmem:[#allocation2 + $0xc0] sm:$0xf] %v812_v46  ;;  %v2661_v12 = vsel %vm2649_vm8, %v2628_v20, %v8926_v29  ;;  %v288_v36 = vsel %vm7847_vm3, 0, %v287_v10  ;;  %v344_v59 = vsel %vm7864_vm5, 0, %v343_v52  ;;  %vm10659_vm5 = vmmov %vm10657_vm9 }
  0xfc   : > { %v2725_v60 = vsel %vm10655_vm6, %v2692_v9, %v2366_v16  ;;  %1871 = vrot.lane.b32.xlu1 %v1820_v7, %s7755_s16  ;;  %v2694_v6 = vsel %vm2682_vm14, %v2661_v12, %v2096_v14  ;;  %v2319_v16 = vrot.slane %v2317_v38, 1  ;;  %v650_v7 = vsel %vm7898_vm10, %v642_v34, %v649_v54  ;;  %v9022_v38 = vld [vmem:[#allocation2 + $0xbc] ss:$0 sps:$4 sm:$0x11]   ;;  %289 = vst [vmem:[#allocation2 + $0xcc] sm:$0x1] %v288_v36 }
  0xfd   : > { %1869 = vrot.lane.b32.xlu0 %v1808_v18, %s7755_s16  ;;  %v2727_v29 = vsel %vm10657_vm9, %v2694_v6, %v2368_v57  ;;  %v2327_v47 = vor.u32 %v2326_v48, %v2322_v61  ;;  %v1323_v45 = vshll.u32 %v8989_v37, 16  ;;  %vm10658_vm6 = vcmask 27648   ;;  %345 = vst [vmem:[#allocation2 + $0xd4] sm:$0x1] %v344_v59  ;;  %v880_v9 = vld [vmem:[#allocation2 + $0xa8] sm:$0xe]  ;;  %vm10661_vm9 = vmmov %vm10659_vm5 }
  0xfe   : > { %v9005_v42 = vpop.permute.xlu1 %1344  ;;  %814 = vst.msk [vmem:[#allocation2 + $0xc4] sm:$0xf] %vm10658_vm6, %v650_v7  ;;  %v2473_v24 = vrot.slane %v6978_v62, 1  ;;  %v1318_v32 = vrot.slane %v1316_v21, 1  ;;  %v1328_v26 = vshll.u32 %v9022_v38, 16  ;;  %v6884_v40 = vcombine.low %v880_v9, %v8918_v27  ;;  %vm10662_vm6 = vmmov %vm10656_vm0 }
  0xff   : > { %v2494_v18 = vpop.permute.xlu0 %2493  ;;  %v2332_v61 = vsel %vm1139_vm13, %v2327_v47, %v2331_v58  ;;  %v1325_v13 = vrot.slane %v1323_v45, 1  ;;  %v815_v62 = vld [vmem:[#allocation2 + $0xc8] sm:$0x1]  ;;  %v9069_v21 = vld [vmem:[#allocation2 + $0xbc] ss:$0 sps:$4 sm:$0x11]  }
 0x100   : > { %v2758_v55 = vsel %vm2748_vm4, %v2725_v60, %v2494_v18  ;;  %1999 = vrot.lane.b32.xlu1 %v1966_v33, %s7753_s14  ;;  %v2320_v33 = vsel %vm1139_vm13, %v2315_v4, %v2319_v16  ;;  %v910_v60 = vld [vmem:[#allocation2 + $0xb4] sm:$0xf]  ;;  %v9042_v18 = vld [vmem:[#allocation2 + $0xb8] sm:$0xf]  ;;  %v816_v10 = vsel %vm7906_vm11, %v651_v8, %v815_v62  ;;  %v1455_v4 = vrot.slane %v6884_v40, 1  ;;  %vm10660_vm11 = vmmov %vm10656_vm0 }
 0x101   : > { %1997 = vrot.lane.b32.xlu0 %v1963_v31, %s7753_s14  ;;  %7293 = vmatprep.mubr.msk.bf16.mxu0 %vm10656_vm0, %v2758_v55  ;;  %v1008_v31 = vld [vmem:[#allocation2 + $0xb4] sm:$0xe]  ;;  %v2475_v55 = vsel %vm1412_vm12, %v2473_v24, %v2474_v39  ;;  %v6900_v3 = vcombine.low %v910_v60, %v9042_v18  ;;  %817 = vst [vmem:[#allocation2 + $0xc8] sm:$0x1] %v816_v10  ;;  %v1456_v16 = vrot.slane %v8986_v17, 1  ;;  %v1459_v7 = vrot.slane %v9022_v38, 1 }
 0x102   : > { %v9026_v57 = vpop.permute.xlu1 %1346  ;;  %v6979_v50 = vcombine.low %v1008_v31, %v8930_v63  ;;  %v912_v46 = vld [vmem:[#allocation2 + $0xc0] sm:$0xf]  ;;  %v1326_v27 = vor.u32 %v1325_v13, %v1321_v0  ;;  %v944_v59 = vld [vmem:[#allocation2 + $0xb4] sm:$0xe]  ;;  %v1829_v8 = vshll.u32 %v9069_v21, 16 }
 0x103   : > { %v2496_v20 = vpop.permute.xlu0 %2495  ;;  %v1457_v17 = vsel %vm1412_vm12, %v1455_v4, %v1456_v16  ;;  %v1822_v58 = vshrl.u32 %v6900_v3, 16  ;;  %v975_v24 = vld [vmem:[#allocation2 + $0xc0] sm:$0xf]  ;;  %v977_v0 = vld [vmem:[#allocation2 + $0xcc] sm:$0xf]  ;;  %v2533_v10 = vsel %vm2517_vm15, %v8286_v25, %v9026_v57 }
 0x104   : > { %v2760_v14 = vsel %vm2748_vm4, %v2727_v29, %v2496_v20  ;;  %2111 = vrot.lane.b32.xlu1 %v8948_v49, %s7751_s12  ;;  %v881_v49 = vld [vmem:[#allocation2 + $0xb4] sm:$0xe]  ;;  %v2476_v48 = vrot.slane %v6979_v50, 1  ;;  %v1824_v29 = vshll.u32 %v6900_v3, 16  ;;  %v9088_v13 = vld [vmem:[#allocation2 + $0xd0] sm:$0xf] }
 0x105   : > { %2109 = vrot.lane.b32.xlu0 %v8911_v19, %s7751_s12  ;;  %7294 = vmatmul.mubr.msk.bf16.gmra.mxu0 %vm10656_vm0, %v2760_v14  ;;  %v1314_v19 = vor.u32 %v1313_v15, %v1309_v35  ;;  %v9060_v35 = vld [vmem:[#allocation2 + $0xc4] sm:$0xf]  ;;  %v1330_v15 = vrot.slane %v1328_v26, 1  ;;  %v6885_v51 = vcombine.low %v881_v49, %v8973_v28  ;;  %v1831_v62 = vrot.slane %v1829_v8, 1  ;;  %v3567_v16 = vld [vmem:[#allocation2] sm:$0xf]  ;;  %vm10663_vm0 = vmmov %vm10659_vm5 }
 0x106   : > { %v9047_v63 = vpop.permute.xlu1 %1475  ;;  %v6901_v54 = vcombine.low %v912_v46, %v9060_v35  ;;  %v2478_v43 = vsel %vm1412_vm12, %v2476_v48, %v2477_v11  ;;  %v1826_v45 = vrot.slane %v1824_v29, 1  ;;  %v9082_v39 = vld [vmem:[#allocation2 + $0xc4] sm:$0xf]  ;;  %v2531_v11 = vsel %vm2517_vm15, %v8250_v5, %v9005_v42 }
 0x107   : > { %v9040_v34 = vpop.permute.xlu0 %1473  ;;  %v1319_v12 = vsel %vm1139_vm13, %v1314_v19, %v1318_v32  ;;  %v1331_v31 = vsel %vm1139_vm13, %v1326_v27, %v1330_v15  ;;  %v1458_v28 = vrot.slane %v6885_v51, 1  ;;  %v945_v32 = vld [vmem:[#allocation2 + $0xc0] sm:$0xe]  ;;  %v9091_v49 = vcombine.low %v975_v24, %v9082_v39 }
 0x108   : > { %2383 = vrot.lane.b32.xlu1 %v2332_v61, %s7756_s17  ;;  %v1836_v36 = vshll.u32 %v6901_v54, 16  ;;  %v9077_v47 = vld [vmem:[#allocation2 + $0xc8] ss:$0 sps:$4 sm:$0x11]   ;;  %v1834_v50 = vshrl.u32 %v6901_v54, 16  ;;  %v6932_v61 = vcombine.low %v944_v59, %v9042_v18  ;;  %v1827_v26 = vor.u32 %v1826_v45, %v1822_v58 }
 0x109   : > { %2381 = vrot.lane.b32.xlu0 %v2320_v33, %s7756_s17  ;;  %v1460_v38 = vsel %vm1412_vm12, %v1458_v28, %v1459_v7  ;;  %v1841_v19 = vshll.u32 %v9077_v47, 16  ;;  %v6933_v46 = vcombine.low %v945_v32, %v9060_v35  ;;  %v9099_v18 = vcombine.low %v977_v0, %v9088_v13  ;;  %v9106_v35 = vld [vmem:[#allocation2 + $0xd4] ss:$0 sps:$4 sm:$0x11]  }
 0x10a   : > { %v9064_v6 = vpop.permute.xlu1 %1587  ;;  %v1838_v9 = vrot.slane %v1836_v36, 1  ;;  %v1967_v27 = vrot.slane %v6932_v61, 1  ;;  %v1968_v15 = vrot.slane %v9069_v21, 1  ;;  %v2564_v25 = vsel %vm2550_vm1, %v2531_v11, %v9040_v34  ;;  %v9111_v51 = vld [vmem:[#allocation2 + $0xc8] ss:$0 sps:$4 sm:$0x11]  }
 0x10b   : > { %v9057_v52 = vpop.permute.xlu0 %1585  ;;  %v1843_v48 = vrot.slane %v1841_v19, 1  ;;  %v1832_v57 = vsel %vm1139_vm13, %v1827_v26, %v1831_v62  ;;  %v2566_v5 = vsel %vm2550_vm1, %v2533_v10, %v9047_v63  ;;  %v1970_v4 = vrot.slane %v6933_v46, 1  ;;  %v9119_v21 = vld [vmem:[#allocation2 + $0x4] sm:$0xf]  ;;  %v1010_v61 = vld [vmem:[#allocation2 + $0xcc] sm:$0xe] }
 0x10c   : > { %1360 = vrot.lane.b32.xlu1 %v1319_v12, %s7752_s13  ;;  %v2597_v42 = vsel %vm2583_vm2, %v2564_v25, %v9057_v52  ;;  %v2348_v28 = vshll.u32 %v9099_v18, 16  ;;  %v1969_v52 = vsel %vm1412_vm12, %v1967_v27, %v1968_v15  ;;  %v9132_v58 = vcombine.low %v3567_v16, %v9119_v21 }
 0x10d   : > { %2509 = vrot.lane.b32.xlu0 %v2475_v55, %s7754_s15  ;;  %v1839_v55 = vor.u32 %v1838_v9, %v1834_v50  ;;  %v2353_v24 = vshll.u32 %v9106_v35, 16  ;;  %v6981_v27 = vcombine.low %v1010_v61, %v9088_v13  ;;  %v3615_v13 = vld [vmem:[#allocation2] sm:$0xe] }
 0x10e   : > { %v9074_v14 = vpop.permute.xlu1 %1859  ;;  %v2350_v19 = vrot.slane %v2348_v28, 1  ;;  %v3890_v46 = vshll.u32 %v9132_v58, 16 }
 0x10f   : > { %v1858_v20 = vpop.permute.xlu0 %1857  ;;  %v1844_v29 = vsel %vm1139_vm13, %v1839_v55, %v1843_v48  ;;  %v2355_v11 = vrot.slane %v2353_v24, 1 }
 0x110   : > { %1362 = vrot.lane.b32.xlu1 %v1331_v31, %s7752_s13  ;;  %v2630_v34 = vsel %vm2616_vm7, %v2597_v42, %v1858_v20  ;;  %v1971_v31 = vrot.slane %v9077_v47, 1  ;;  %v2341_v20 = vshll.u32 %v9111_v51, 16  ;;  %v2599_v47 = vsel %vm2583_vm2, %v2566_v5, %v9064_v6  ;;  %s7758_s13 = smov 40  }
 0x111   : > { %2511 = vrot.lane.b32.xlu0 %v2478_v43, %s7754_s15  ;;  %v2336_v43 = vshll.u32 %v9091_v49, 16 }
 0x112   : > { %v1988_v60 = vpop.permute.xlu1 %1987  ;;  %v1972_v9 = vsel %vm1412_vm12, %v1970_v4, %v1971_v31  ;;  %v2482_v4 = vrot.slane %v6981_v27, 1  ;;  %v7066_v31 = vcombine.low %v3615_v13, %v9119_v21 }
 0x113   : > { %v1986_v33 = vpop.permute.xlu0 %1985  ;;  %v2338_v59 = vrot.slane %v2336_v43, 1  ;;  %v3892_v43 = vrot.slane %v3890_v46, 1 }
 0x114   : > { %1491 = vrot.lane.b32.xlu1 %v1460_v38, %s7749_s10  ;;  %v2663_v63 = vsel %vm2649_vm8, %v2630_v34, %v1986_v33  ;;  %v2346_v33 = vshrl.u32 %v9099_v18, 16  ;;  %v2632_v38 = vsel %vm2616_vm7, %v2599_v47, %v9074_v14  ;;  %v7551_v14 = vld [vmem:[#allocation2 + $0x8] ss:$0 sps:$4 sm:$0x11]  }
 0x115   : > { %1489 = vrot.lane.b32.xlu0 %v1457_v17, %s7749_s10  ;;  %v1009_v17 = vld [vmem:[#allocation2 + $0xc0] sm:$0xe]  ;;  %v2665_v32 = vsel %vm2649_vm8, %v2632_v38, %v1988_v60  ;;  %v3895_v5 = vshll.u32 %v7551_v14, 16 }
 0x116   : > { %v2100_v12 = vpop.permute.xlu1 %2099  ;;  %v6980_v0 = vcombine.low %v1009_v17, %v9082_v39  ;;  %v2351_v48 = vor.u32 %v2350_v19, %v2346_v33 }
 0x117   : > { %v2098_v40 = vpop.permute.xlu0 %2097  ;;  %v2698_v26 = vsel %vm2682_vm14, %v2665_v32, %v2100_v12  ;;  %v2480_v12 = vrot.slane %v9111_v51, 1 }
 0x118   : > { %1603 = vrot.lane.b32.xlu1 %v6901_v54, %s7750_s11  ;;  %v2334_v54 = vshrl.u32 %v9091_v49, 16  ;;  %v2696_v36 = vsel %vm2682_vm14, %v2663_v63, %v2098_v40  ;;  %v2343_v40 = vrot.slane %v2341_v20, 1  ;;  %v2479_v39 = vrot.slane %v6980_v0, 1 }
 0x119   : > { %1601 = vrot.lane.b32.xlu0 %v6900_v3, %s7750_s11  ;;  %s7757_s11 = smov 48  }
 0x11a   : > { %v2372_v7 = vpop.permute.xlu1 %2371  ;;  %v2339_v62 = vor.u32 %v2338_v59, %v2334_v54  ;;  %v2481_v51 = vsel %vm1412_vm12, %v2479_v39, %v2480_v12 }
 0x11b   : > { %v2370_v3 = vpop.permute.xlu0 %2369  ;;  %v2731_v10 = vsel %vm10661_vm9, %v2698_v26, %v2372_v7 }
 0x11c   : > { %v2729_v45 = vsel %vm10659_vm5, %v2696_v36, %v2370_v3  ;;  %1875 = vrot.lane.b32.xlu1 %v1844_v29, %s7755_s16  ;;  %v2344_v25 = vsel %vm1139_vm13, %v2339_v62, %v2343_v40  ;;  %v2356_v3 = vsel %vm1139_vm13, %v2351_v48, %v2355_v11  ;;  %v3897_v29 = vrot.slane %v3895_v5, 1  ;;  %vm10664_vm5 = vmmov %vm10662_vm6 }
 0x11d   : > { %1873 = vrot.lane.b32.xlu0 %v1832_v57, %s7755_s16  ;;  %v3888_v57 = vshrl.u32 %v9132_v58, 16  ;;  %vm10666_vm9 = vmmov %vm10664_vm5 }
 0x11e   : > { %v1349_v6 = vpop.permute.xlu1 %1348 }
 0x11f   : > { %v2498_v8 = vpop.permute.xlu0 %2497  ;;  %v3893_v34 = vor.u32 %v3892_v43, %v3888_v57  ;;  %v2535_v47 = vsel %vm2517_vm15, %v8388_v30, %v1349_v6 }
 0x120   : > { %v2762_v50 = vsel %vm2748_vm4, %v2729_v45, %v2498_v8  ;;  %2003 = vrot.lane.b32.xlu1 %v1972_v9, %s7753_s14 }
 0x121   : > { %2001 = vrot.lane.b32.xlu0 %v1969_v52, %s7753_s14  ;;  %7297 = vmatprep.mubr.msk.bf16.mxu0 %vm10660_vm11, %v2762_v50  ;;  %v3898_v7 = vsel %vm1139_vm13, %v3893_v34, %v3897_v29  ;;  %v4160_v52 = vrot.slane %v7551_v14, 1  ;;  %vm10665_vm11 = vmmov %vm10663_vm0  ;;  %s7759_s14 = smov 64  }
 0x122   : > { %v1351_v15 = vpop.permute.xlu1 %1350 }
 0x123   : > { %v2500_v60 = vpop.permute.xlu0 %2499  ;;  %v2537_v45 = vsel %vm2517_vm15, %v8420_v53, %v1351_v15 }
 0x124   : > { %v2764_v55 = vsel %vm2748_vm4, %v2731_v10, %v2500_v60  ;;  %2115 = vrot.lane.b32.xlu1 %v9099_v18, %s7751_s12 }
 0x125   : > { %2113 = vrot.lane.b32.xlu0 %v9091_v49, %s7751_s12  ;;  %7298 = vmatmul.mubr.msk.bf16.gmra.mxu0 %vm10662_vm6, %v2764_v55  ;;  %v2483_v49 = vrot.slane %v9106_v35, 1  ;;  %v4159_v35 = vrot.slane %v7066_v31, 1  ;;  %vm10667_vm6 = vmmov %vm10663_vm0 }
 0x126   : > { %v1480_v16 = vpop.permute.xlu1 %1479 }
 0x127   : > { %v1478_v42 = vpop.permute.xlu0 %1477  ;;  %v2484_v18 = vsel %vm1412_vm12, %v2482_v4, %v2483_v49  ;;  %v4161_v21 = vsel %vm1412_vm12, %v4159_v35, %v4160_v52  ;;  %v2570_v50 = vsel %vm2550_vm1, %v2537_v45, %v1480_v16 }
 0x128   : > { %2387 = vrot.lane.b32.xlu1 %v2356_v3, %s7756_s17  ;;  %v2568_v33 = vsel %vm2550_vm1, %v2535_v47, %v1478_v42 }
 0x129   : > { %2385 = vrot.lane.b32.xlu0 %v2344_v25, %s7756_s17  ;;  %s7760_s17 = smov 56  }
 0x12a   : > { %v1592_v63 = vpop.permute.xlu1 %1591 }
 0x12b   : > { %v1590_v28 = vpop.permute.xlu0 %1589  ;;  %v2603_v30 = vsel %vm2583_vm2, %v2570_v50, %v1592_v63 }
 0x12c   : > { %2515 = vrot.lane.b32.xlu1 %v2484_v18, %s7754_s15  ;;  %v2601_v24 = vsel %vm2583_vm2, %v2568_v33, %v1590_v28 }
 0x12d   : > { %2513 = vrot.lane.b32.xlu0 %v2481_v51, %s7754_s15 }
 0x12e   : > { %v1864_v36 = vpop.permute.xlu1 %1863 }
 0x12f   : > { %v1862_v54 = vpop.permute.xlu0 %1861  ;;  %v2636_v0 = vsel %vm2616_vm7, %v2603_v30, %v1864_v36 }
 0x130   : > { %v2634_v9 = vsel %vm2616_vm7, %v2601_v24, %v1862_v54 }
 0x131   : > { %4079 = vrot.lane.b32.xlu0 %v3898_v7, %s7749_s10 }
 0x132   : > { %v1992_v20 = vpop.permute.xlu1 %1991 }
 0x133   : > { %v1990_v59 = vpop.permute.xlu0 %1989  ;;  %v2669_v62 = vsel %vm2649_vm8, %v2636_v0, %v1992_v20 }
 0x134   : > { %v2667_v19 = vsel %vm2649_vm8, %v2634_v9, %v1990_v59 }
 0x135   : > { %4207 = vrot.lane.b32.xlu0 %v4161_v21, %s7755_s16 }
 0x136   : > { %v2104_v8 = vpop.permute.xlu1 %2103 }
 0x137   : > { %v2102_v17 = vpop.permute.xlu0 %2101  ;;  %v2702_v14 = vsel %vm2682_vm14, %v2669_v62, %v2104_v8 }
 0x138   : > { %v2700_v61 = vsel %vm2682_vm14, %v2667_v19, %v2102_v17 }
 0x13a   : > { %v2376_v32 = vpop.permute.xlu1 %2375 }
 0x13b   : > { %v2374_v38 = vpop.permute.xlu0 %2373  ;;  %v2735_v46 = vsel %vm10665_vm11, %v2702_v14, %v2376_v32 }
 0x13c   : > { %v2733_v6 = vsel %vm10663_vm0, %v2700_v61, %v2374_v38  ;;  %vm10668_vm0 = vmmov %vm10664_vm5 }
 0x13d   : > { %vm10670_vm11 = vmmov %vm10668_vm0 }
 0x13e   : > { %v1353_v40 = vpop.permute.xlu1 %1352 }
 0x13f   : > { %v2502_v53 = vpop.permute.xlu0 %2501  ;;  %v2539_v5 = vsel %vm2517_vm15, %v8564_v22, %v1353_v40 }
 0x140   : > { %v2766_v26 = vsel %vm2748_vm4, %v2733_v6, %v2502_v53 }
 0x141   : > { %7301 = vmatprep.mubr.msk.bf16.mxu0 %vm10664_vm5, %v2766_v26  ;;  %vm10669_vm5 = vmmov %vm10667_vm6 }
 0x142   : > { %v1355_v55 = vpop.permute.xlu1 %1354 }
 0x143   : > { %v2504_v10 = vpop.permute.xlu0 %2503  ;;  %v2541_v42 = vsel %vm2517_vm15, %v8621_v2, %v1355_v55 }
 0x144   : > { %v2768_v60 = vsel %vm2748_vm4, %v2735_v46, %v2504_v10 }
 0x145   : > { %7302 = vmatmul.mubr.msk.bf16.gmra.mxu0 %vm10666_vm9, %v2768_v60  ;;  %vm10671_vm9 = vmmov %vm10669_vm5 }
 0x146   : > { %v1484_v11 = vpop.permute.xlu1 %1483 }
 0x147   : > { %v1482_v48 = vpop.permute.xlu0 %1481  ;;  %v2574_v16 = vsel %vm2550_vm1, %v2541_v42, %v1484_v11 }
 0x148   : > { %v2572_v3 = vsel %vm2550_vm1, %v2539_v5, %v1482_v48 }
 0x14a   : > { %v1596_v15 = vpop.permute.xlu1 %1595 }
 0x14b   : > { %v1594_v27 = vpop.permute.xlu0 %1593  ;;  %v2607_v22 = vsel %vm2583_vm2, %v2574_v16, %v1596_v15  ;;  %v9238_v15 = vld [vmem:[%s10628_s2] ss:$0 sm:$0xff] }
 0x14c   : > { %v2605_v4 = vsel %vm2583_vm2, %v2572_v3, %v1594_v27 }
 0x14e   : > { %v1868_v12 = vpop.permute.xlu1 %1867 }
 0x14f   : > { %v1866_v39 = vpop.permute.xlu0 %1865  ;;  %v2640_v18 = vsel %vm2616_vm7, %v2607_v22, %v1868_v12 }
 0x150   : > { %v2638_v51 = vsel %vm2616_vm7, %v2605_v4, %v1866_v39 }
 0x152   : > { %v1996_v57 = vpop.permute.xlu1 %1995 }
 0x153   : > { %v1994_v25 = vpop.permute.xlu0 %1993  ;;  %v2673_v7 = vsel %vm2649_vm8, %v2640_v18, %v1996_v57 }
 0x154   : > { %v2671_v34 = vsel %vm2649_vm8, %v2638_v51, %v1994_v25 }
 0x156   : > { %v2108_v13 = vpop.permute.xlu1 %2107 }
 0x157   : > { %v2106_v43 = vpop.permute.xlu0 %2105  ;;  %v2706_v52 = vsel %vm2682_vm14, %v2673_v7, %v2108_v13 }
 0x158   : > { %v2704_v31 = vsel %vm2682_vm14, %v2671_v34, %v2106_v43 }
 0x15a   : > { %v2380_v29 = vpop.permute.xlu1 %2379 }
 0x15b   : > { %v2378_v49 = vpop.permute.xlu0 %2377  ;;  %v2739_v54 = vsel %vm10669_vm5, %v2706_v52, %v2380_v29 }
 0x15c   : > { %v2737_v28 = vsel %vm10667_vm6, %v2704_v31, %v2378_v49  ;;  %vm10672_vm6 = vmmov %vm10668_vm0 }
 0x15e   : > { %v1357_v35 = vpop.permute.xlu1 %1356 }
 0x15f   : > { %v2506_v2 = vpop.permute.xlu0 %2505  ;;  %v2543_v9 = vsel %vm2517_vm15, %v8747_v56, %v1357_v35 }
 0x160   : > { %v2770_v63 = vsel %vm2748_vm4, %v2737_v28, %v2506_v2 }
 0x161   : > { %7305 = vmatprep.mubr.msk.bf16.mxu0 %vm10668_vm0, %v2770_v63  ;;  %vm10673_vm0 = vmmov %vm10669_vm5 }
 0x162   : > { %v1359_v59 = vpop.permute.xlu1 %1358  ;;  %vm10674_vm5 = vmmov %vm10672_vm6 }
 0x163   : > { %v2508_v36 = vpop.permute.xlu0 %2507  ;;  %v2545_v19 = vsel %vm2517_vm15, %v8795_v44, %v1359_v59 }
 0x164   : > { %v2772_v21 = vsel %vm2748_vm4, %v2739_v54, %v2508_v36  ;;  %v3462_v36 = vld [vmem:[#allocation2 + $0x18] sm:$0xf] }
 0x165   : > { %7306 = vmatmul.mubr.msk.bf16.gmra.mxu0 %vm10670_vm11, %v2772_v21  ;;  %vm10675_vm11 = vsmask.f32 7938 }
 0x166   : > { %v1488_v17 = vpop.permute.xlu1 %1487 }
 0x167   : > { %v1486_v20 = vpop.permute.xlu0 %1485  ;;  %v2578_v53 = vsel %vm2550_vm1, %v2545_v19, %v1488_v17  ;;  %v3466_v19 = vld [vmem:[#allocation2 + $0x20] sm:$0x1] }
 0x168   : > { %v2576_v61 = vsel %vm2550_vm1, %v2543_v9, %v1486_v20 }
 0x16a   : > { %v1600_v45 = vpop.permute.xlu1 %1599 }
 0x16b   : > { %v1598_v47 = vpop.permute.xlu0 %1597  ;;  %v2611_v56 = vsel %vm2583_vm2, %v2578_v53, %v1600_v45 }
 0x16c   : > { %v2609_v30 = vsel %vm2583_vm2, %v2576_v61, %v1598_v47 }
 0x16e   : > { %v1872_v33 = vpop.permute.xlu1 %1871 }
 0x16f   : > { %v1870_v8 = vpop.permute.xlu0 %1869  ;;  %v2644_v46 = vsel %vm2616_vm7, %v2611_v56, %v1872_v33 }
 0x170   : > { %v2642_v0 = vsel %vm2616_vm7, %v2609_v30, %v1870_v8 }
 0x172   : > { %v2000_v38 = vpop.permute.xlu1 %1999 }
 0x173   : > { %v1998_v24 = vpop.permute.xlu0 %1997  ;;  %v2677_v60 = vsel %vm2649_vm8, %v2644_v46, %v2000_v38 }
 0x174   : > { %v2675_v26 = vsel %vm2649_vm8, %v2642_v0, %v1998_v24 }
 0x176   : > { %v2112_v32 = vpop.permute.xlu1 %2111 }
 0x177   : > { %v2110_v50 = vpop.permute.xlu0 %2109  ;;  %v2710_v48 = vsel %vm2682_vm14, %v2677_v60, %v2112_v32 }
 0x178   : > { %v2708_v40 = vsel %vm2682_vm14, %v2675_v26, %v2110_v50 }
 0x17a   : > { %v2384_v62 = vpop.permute.xlu1 %2383 }
 0x17b   : > { %v2382_v6 = vpop.permute.xlu0 %2381  ;;  %v2743_v11 = vsel %vm10673_vm0, %v2710_v48, %v2384_v62 }
 0x17c   : > { %v2741_v14 = vsel %vm10671_vm9, %v2708_v40, %v2382_v6  ;;  %vm10676_vm9 = vcmask 60416   ;;  %v7682_v6 = vld [vmem:[#allocation2 + $0xc] sm:$0xf] }
 0x17d   : > { %vm10679_vm0 = vmmov %vm10676_vm9 }
 0x17e   : > { %v9230_v55 = vpop.permute.xlu1 %1360 }
 0x17f   : > { %v2510_v44 = vpop.permute.xlu0 %2509 }
 0x180   : > { %v2774_v10 = vsel %vm2748_vm4, %v2741_v14, %v2510_v44 }
 0x181   : > { %7309 = vmatprep.mubr.msk.bf16.mxu0 %vm10672_vm6, %v2774_v10  ;;  %vm9248_vm6 = vmand %vm10676_vm9, %vm10675_vm11  ;;  %v3459_v10 = vld [vmem:[#allocation2 + $0x14] sm:$0x1] }
 0x182   : > { %v1363_v12 = vpop.permute.xlu1 %1362  ;;  %vm10685_vm9 = vmmov %vm10679_vm0 }
 0x183   : > { %v2512_v27 = vpop.permute.xlu0 %2511  ;;  %v2549_v14 = vsel %vm2517_vm15, %v8989_v37, %v1363_v12 }
 0x184   : > { %v2776_v39 = vsel %vm2748_vm4, %v2743_v11, %v2512_v27 }
 0x185   : > { %v7287_v25 = vpop.f32.mrf.mxu0  ;;  %7310 = vmatmul.mubr.msk.bf16.gmra.mxu0 %vm10674_vm5, %v2776_v39  ;;  %v2547_v39 = vsel %vm2517_vm15, %v8938_v23, %v9230_v55  ;;  %vm10680_vm5 = vmmov %vm10679_vm0  ;;  %vm10681_vm15 = vcmask 228352  }
 0x186   : > { %v2888_v57 = vadd.f32 %v7287_v25, %v9238_v15  ;;  %v1492_v3 = vpop.permute.xlu1 %1491 }
 0x187   : > { %v2879_v43 = vpop.f32.mrf.mxu0  ;;  %v1490_v5 = vpop.permute.xlu0 %1489  ;;  %v2582_v37 = vsel %vm2550_vm1, %v2549_v14, %v1492_v3 }
 0x188   : > { %v3008_v42 = vmax.f32 %v2888_v57, 0.0  ;;  %v2880_v13 = vadd.f32 %v9238_v15, %v2879_v43  ;;  %v2580_v12 = vsel %vm2550_vm1, %v2547_v39, %v1490_v5 }
 0x189   : > { %v7288_v4 = vpop.f32.mrf.mxu0 }
 0x18a   : > { %v7208_v49 = vpack.c.bf16 %v3008_v42, %v3008_v42  ;;  %v3006_v16 = vmax.f32 %v2880_v13, 0.0  ;;  %v2891_v51 = vadd.f32 %v7288_v4, %v9238_v15  ;;  %v1604_v2 = vpop.permute.xlu1 %1603 }
 0x18b   : > { %v2882_v34 = vpop.f32.mrf.mxu0  ;;  %v1602_v29 = vpop.permute.xlu0 %1601  ;;  %v2615_v23 = vsel %vm2583_vm2, %v2582_v37, %v1604_v2 }
 0x18c   : > { %v3152_v31 = vshrl.u32 %v7208_v49, 16  ;;  %v7206_v22 = vpack.c.bf16 %v3006_v16, %v3006_v16  ;;  %v3009_v28 = vmax.f32 %v2891_v51, 0.0  ;;  %v2883_v18 = vadd.f32 %v9238_v15, %v2882_v34 }
 0x18d   : > { %v3155_v7 = vshll.u32 %v7208_v49, 16  ;;  %v2613_v42 = vsel %vm2583_vm2, %v2580_v12, %v1602_v29  ;;  %vm10682_vm2 = vmmov %vm10681_vm15 }
 0x18e   : > { %v3154_v63 = vrot.slane %v3152_v31, 7  ;;  %v3135_v35 = vshrl.u32 %v7206_v22, 16  ;;  %v7209_v52 = vpack.c.bf16 %v3009_v28, %v3009_v28  ;;  %v3007_v21 = vmax.f32 %v2883_v18, 0.0  ;;  %v1876_v33 = vpop.permute.xlu1 %1875 }
 0x18f   : > { %v1874_v59 = vpop.permute.xlu0 %1873  ;;  %v3138_v47 = vshll.u32 %v7206_v22, 16  ;;  %v2648_v3 = vsel %vm2616_vm7, %v2615_v23, %v1876_v33 }
 0x190   : > { %v3157_v20 = vor.u32 %v3155_v7, %v3154_v63  ;;  %v3137_v17 = vrot.slane %v3135_v35, 7  ;;  %v3160_v45 = vshrl.u32 %v7209_v52, 16  ;;  %v7207_v8 = vpack.c.bf16 %v3007_v21, %v3007_v21 }
 0x191   : > { %v3163_v9 = vshll.u32 %v7209_v52, 16  ;;  %v3158_v30 = vrot.slane %v3154_v63, 4  ;;  %v2646_v13 = vsel %vm2616_vm7, %v2613_v42, %v1874_v59 }
 0x192   : > { %v3463_v24 = vsel %vm9248_vm6, %v3157_v20, %v3462_v36  ;;  %v3140_v38 = vor.u32 %v3138_v47, %v3137_v17  ;;  %v3162_v50 = vrot.slane %v3160_v45, 7  ;;  %v3143_v32 = vshrl.u32 %v7207_v8, 16  ;;  %v2004_v56 = vpop.permute.xlu1 %2003 }
 0x193   : > { %3464 = vst [vmem:[#allocation2 + $0x18] sm:$0xf] %v3463_v24  ;;  %v2002_v61 = vpop.permute.xlu0 %2001  ;;  %v3146_v40 = vshll.u32 %v7207_v8, 16  ;;  %v3141_v60 = vrot.slane %v3137_v17, 4  ;;  %v2681_v22 = vsel %vm2649_vm8, %v2648_v3, %v2004_v56 }
 0x194   : > { %v3456_v53 = vsel %vm9248_vm6, %v3140_v38, %v7682_v6  ;;  %v3165_v0 = vor.u32 %v3163_v9, %v3162_v50  ;;  %v3167_v26 = vrot.slane %v3162_v50, 4  ;;  %v3145_v62 = vrot.slane %v3143_v32, 7 }
 0x195   : > { %3457 = vst [vmem:[#allocation2 + $0xc] sm:$0xf] %v3456_v53  ;;  %v2679_v55 = vsel %vm2649_vm8, %v2646_v13, %v2002_v61  ;;  %vm10683_vm8 = vcmask 293888  }
 0x196   : > { %v3166_v44 = vsel %vm7898_vm10, %v3158_v30, %v3165_v0  ;;  %v3467_v46 = vsel %vm7847_vm3, %v3167_v26, %v3466_v19  ;;  %v3148_v48 = vor.u32 %v3146_v40, %v3145_v62  ;;  %v3150_v11 = vrot.slane %v3145_v62, 4  ;;  %v2116_v43 = vpop.permute.xlu1 %2115  ;;  %vm10684_vm11 = vmmov %vm10683_vm8 }
 0x197   : > { %3465 = vst.msk [vmem:[#allocation2 + $0x1c] sm:$0xf] %vm10679_vm0, %v3166_v44  ;;  %3468 = vst [vmem:[#allocation2 + $0x20] sm:$0x1] %v3467_v46  ;;  %v2114_v27 = vpop.permute.xlu0 %2113  ;;  %v2714_v17 = vsel %vm2682_vm14, %v2681_v22, %v2116_v43 }
 0x198   : > { %v3149_v25 = vsel %vm7898_vm10, %v3141_v60, %v3148_v48  ;;  %v3460_v57 = vsel %vm7847_vm3, %v3150_v11, %v3459_v10  ;;  %v2712_v49 = vsel %vm2682_vm14, %v2679_v55, %v2114_v27 }
 0x199   : > { %3458 = vst.msk [vmem:[#allocation2 + $0x10] sm:$0xf] %vm10680_vm5, %v3149_v25  ;;  %3461 = vst [vmem:[#allocation2 + $0x14] sm:$0x1] %v3460_v57 }
 0x19a   : > { %v3633_v5 = vld [vmem:[#allocation2 + $0x18] sm:$0xf]  ;;  %v2388_v16 = vpop.permute.xlu1 %2387  ;;  %vm10686_vm5 = vmmov %vm10679_vm0 }
 0x19b   : > { %v2386_v4 = vpop.permute.xlu0 %2385  ;;  %v3695_v51 = vld [vmem:[#allocation2 + $0x18] sm:$0xf]  ;;  %v2747_v24 = vsel %vm10682_vm2, %v2714_v17, %v2388_v16  ;;  %vm10688_vm2 = vmmov %vm10679_vm0 }
 0x19c   : > { %v3680_v34 = vld [vmem:[#allocation2 + $0x18] sm:$0xe]  ;;  %v2745_v29 = vsel %vm10681_vm15, %v2712_v49, %v2386_v4  ;;  %v3616_v21 = vld [vmem:[#allocation2 + $0xc] sm:$0xe]  ;;  %vm10687_vm15 = vmmov %vm10679_vm0 }
 0x19d   : > { %v3743_v31 = vld [vmem:[#allocation2 + $0x18] sm:$0xe]  ;;  %v3631_v45 = vld [vmem:[#allocation2 + $0xc] sm:$0xf] }
 0x19e   : > { %v3634_v28 = vld [vmem:[#allocation2 + $0x1c] sm:$0xf]  ;;  %v3571_v63 = vld [vmem:[#allocation2 + $0x18] sm:$0xf]  ;;  %v2516_v38 = vpop.permute.xlu1 %2515  ;;  %v3679_v10 = vld [vmem:[#allocation2 + $0xc] sm:$0xe] }
 0x19f   : > { %v3696_v18 = vld [vmem:[#allocation2 + $0x1c] sm:$0xf]  ;;  %v2514_v7 = vpop.permute.xlu0 %2513  ;;  %v7083_v2 = vcombine.low %v3633_v5, %v3634_v28  ;;  %v7555_v52 = vld [vmem:[#allocation2 + $0x20] ss:$0 sps:$4 sm:$0x11]   ;;  %v7115_v36 = vcombine.low %v3680_v34, %v3634_v28  ;;  %v2780_v30 = vsel %vm2748_vm4, %v2747_v24, %v2516_v38 }
 0x1a0   : > { %v9281_v35 = vcombine.low %v3695_v51, %v3696_v18  ;;  %v7162_v59 = vcombine.low %v3743_v31, %v3696_v18  ;;  %v3617_v20 = vld [vmem:[#allocation2 + $0x18] sm:$0xe]  ;;  %v2778_v47 = vsel %vm2748_vm4, %v2745_v29, %v2514_v7  ;;  %v9285_v8 = vld [vmem:[#allocation2 + $0x20] ss:$0 sps:$4 sm:$0x11]   ;;  %v4675_v9 = vrot.slane %v7555_v52, 1 }
 0x1a1   : > { %v3572_v33 = vld [vmem:[#allocation2 + $0x1c] sm:$0xf]  ;;  %4321 = vrot.lane.b32.xlu1 %v7083_v2, %s7751_s12  ;;  %v4674_v50 = vrot.slane %v7115_v36, 1  ;;  %v3632_v19 = vld [vmem:[#allocation2 + $0x10] sm:$0xf]  ;;  %7313 = vmatprep.mubr.msk.bf16.mxu0 %vm10683_vm8, %v2778_v47  ;;  %v5184_v56 = vrot.slane %v9285_v8, 1  ;;  %vm10689_vm8 = vmmov %vm10679_vm0 }
 0x1a2   : > { %4831 = vrot.lane.b32.xlu0 %v9281_v35, %s7757_s11  ;;  %v9291_v32 = vld [vmem:[#allocation2 + $0x10] sm:$0xf]  ;;  %v9293_v61 = vcombine.low %v3571_v63, %v3572_v33  ;;  %v9297_v6 = vld [vmem:[#allocation2 + $0x14] ss:$0 sps:$4 sm:$0x11]   ;;  %v7068_v0 = vcombine.low %v3617_v20, %v3572_v33  ;;  %7314 = vmatmul.mubr.msk.bf16.gmra.mxu0 %vm10684_vm11, %v2780_v30  ;;  %v9302_v62 = vcombine.low %v3631_v45, %v3632_v19  ;;  %v5183_v40 = vrot.slane %v7162_v59, 1  ;;  %vm10690_vm11 = vmmov %vm10679_vm0 }
 0x1a3   : > { %v7067_v53 = vcombine.low %v3616_v21, %v9291_v32  ;;  %v4676_v26 = vsel %vm1412_vm12, %v4674_v50, %v4675_v9  ;;  %v4163_v44 = vrot.slane %v9297_v6, 1  ;;  %v4414_v46 = vshll.u32 %v7083_v2, 16  ;;  %v7563_v27 = vld [vmem:[#allocation2 + $0x20] ss:$0 sps:$4 sm:$0x11]  }
 0x1a4   : > { %v4412_v48 = vshrl.u32 %v7083_v2, 16  ;;  %v4419_v11 = vshll.u32 %v7555_v52, 16  ;;  %v3914_v39 = vshll.u32 %v9293_v61, 16  ;;  %v5185_v12 = vsel %vm1412_vm12, %v5183_v40, %v5184_v56  ;;  %v9312_v43 = vld [vmem:[#allocation2 + $0x14] ss:$0 sps:$4 sm:$0x11]  }
 0x1a5   : > { %v4162_v14 = vrot.slane %v7067_v53, 1  ;;  %4721 = vrot.lane.b32.xlu1 %v4676_v26, %s7758_s13  ;;  %v7291_v60 = vpop.f32.mrf.mxu0  ;;  %v4416_v25 = vrot.slane %v4414_v46, 1  ;;  %v4165_v57 = vrot.slane %v7068_v0, 1  ;;  %v4166_v13 = vrot.slane %v7563_v27, 1  ;;  %v3476_v53 = vld [vmem:[#allocation2 + $0x30] sm:$0xf] }
 0x1a6   : > { %4319 = vrot.lane.b32.xlu0 %v9302_v62, %s7751_s12  ;;  %v2904_v37 = vadd.f32 %v7291_v60, %v9238_v15  ;;  %v3916_v4 = vrot.slane %v3914_v39, 1  ;;  %v3919_v23 = vshll.u32 %v7563_v27, 16  ;;  %v7114_v55 = vcombine.low %v3679_v10, %v3632_v19  ;;  %v3469_v60 = vld [vmem:[#allocation2 + $0x24] sm:$0xf]  ;;  %v3569_v27 = vld [vmem:[#allocation2 + $0xc] sm:$0xf] }
 0x1a7   : > { %v2895_v42 = vpop.f32.mrf.mxu0  ;;  %v4164_v49 = vsel %vm1412_vm12, %v4162_v14, %v4163_v44  ;;  %v4417_v16 = vor.u32 %v4416_v25, %v4412_v48  ;;  %v4421_v34 = vrot.slane %v4419_v11, 1  ;;  %v3912_v31 = vshrl.u32 %v9293_v61, 16 }
 0x1a8   : > { %v3012_v5 = vmax.f32 %v2904_v37, 0.0  ;;  %v2896_v3 = vadd.f32 %v9238_v15, %v2895_v42  ;;  %v4672_v22 = vrot.slane %v9312_v43, 1  ;;  %v4167_v63 = vsel %vm1412_vm12, %v4165_v57, %v4166_v13  ;;  %v3480_v57 = vld [vmem:[#allocation2 + $0x38] sm:$0x1] }
 0x1a9   : > { %4209 = vrot.lane.b32.xlu1 %v4164_v49, %s7755_s16  ;;  %v7292_v51 = vpop.f32.mrf.mxu0  ;;  %v3917_v2 = vor.u32 %v3916_v4, %v3912_v31  ;;  %v3921_v52 = vrot.slane %v3919_v23, 1  ;;  %v4671_v36 = vrot.slane %v7114_v55, 1  ;;  %v4914_v21 = vshll.u32 %v9281_v35, 16 }
 0x1aa   : > { %5231 = vrot.lane.b32.xlu0 %v5185_v12, %s7759_s14  ;;  %v7212_v29 = vpack.c.bf16 %v3012_v5, %v3012_v5  ;;  %v3010_v28 = vmax.f32 %v2896_v3, 0.0  ;;  %v2907_v18 = vadd.f32 %v7292_v51, %v9238_v15  ;;  %v4422_v47 = vsel %vm1139_vm13, %v4417_v16, %v4421_v34  ;;  %v3473_v16 = vld [vmem:[#allocation2 + $0x2c] sm:$0x1] }
 0x1ab   : > { %v2898_v7 = vpop.f32.mrf.mxu0  ;;  %v4912_v33 = vshrl.u32 %v9281_v35, 16  ;;  %v4916_v24 = vrot.slane %v4914_v21, 1  ;;  %v4919_v38 = vshll.u32 %v9285_v8, 16  ;;  %v3922_v40 = vsel %vm1139_vm13, %v3917_v2, %v3921_v52 }
 0x1ac   : > { %v3186_v59 = vshrl.u32 %v7212_v29, 16  ;;  %v7210_v20 = vpack.c.bf16 %v3010_v28, %v3010_v28  ;;  %v3013_v17 = vmax.f32 %v2907_v18, 0.0  ;;  %v2899_v45 = vadd.f32 %v9238_v15, %v2898_v7 }
 0x1ad   : > { %4593 = vrot.lane.b32.xlu1 %v4422_v47, %s7754_s15  ;;  %v3189_v9 = vshll.u32 %v7212_v29, 16  ;;  %v4673_v56 = vsel %vm1412_vm12, %v4671_v36, %v4672_v22  ;;  %v4917_v10 = vor.u32 %v4916_v24, %v4912_v33  ;;  %v4921_v8 = vrot.slane %v4919_v38, 1 }
 0x1ae   : > { %4211 = vrot.lane.b32.xlu0 %v4167_v63, %s7755_s16  ;;  %v3188_v50 = vrot.slane %v3186_v59, 7  ;;  %v3169_v19 = vshrl.u32 %v7210_v20, 16  ;;  %v7213_v30 = vpack.c.bf16 %v3013_v17, %v3013_v17  ;;  %v3172_v0 = vshll.u32 %v7210_v20, 16 }
 0x1af   : > { %v3011_v26 = vmax.f32 %v2899_v45, 0.0  ;;  %v9336_v25 = vcombine.low %v3569_v27, %v9291_v32  ;;  %v4922_v55 = vsel %vm1139_vm13, %v4917_v10, %v4921_v8  ;;  %v4402_v29 = vshll.u32 %v9302_v62, 16 }
 0x1b0   : > { %v3191_v14 = vor.u32 %v3189_v9, %v3188_v50  ;;  %v3171_v44 = vrot.slane %v3169_v19, 7  ;;  %v3194_v46 = vshrl.u32 %v7213_v30, 16  ;;  %v3197_v37 = vshll.u32 %v7213_v30, 16 }
 0x1b1   : > { %v7211_v35 = vpack.c.bf16 %v3011_v26, %v3011_v26  ;;  %4083 = vrot.lane.b32.xlu1 %v3922_v40, %s7749_s10  ;;  %v3192_v12 = vrot.slane %v3188_v50, 4  ;;  %v3902_v22 = vshll.u32 %v9336_v25, 16  ;;  %v3900_v63 = vshrl.u32 %v9336_v25, 16 }
 0x1b2   : > { %4719 = vrot.lane.b32.xlu0 %v4673_v56, %s7758_s13  ;;  %v3477_v48 = vsel %vm9248_vm6, %v3191_v14, %v3476_v53  ;;  %v3174_v11 = vor.u32 %v3172_v0, %v3171_v44  ;;  %v3196_v39 = vrot.slane %v3194_v46, 7  ;;  %v3175_v51 = vrot.slane %v3171_v44, 4 }
 0x1b3   : > { %3478 = vst [vmem:[#allocation2 + $0x30] sm:$0xf] %v3477_v48  ;;  %v3177_v42 = vshrl.u32 %v7211_v35, 16  ;;  %v3180_v3 = vshll.u32 %v7211_v35, 16  ;;  %v3904_v7 = vrot.slane %v3902_v22, 1  ;;  %v3907_v52 = vshll.u32 %v9297_v6, 16 }
 0x1b4   : > { %v3470_v13 = vsel %vm9248_vm6, %v3174_v11, %v3469_v60  ;;  %v3199_v4 = vor.u32 %v3197_v37, %v3196_v39  ;;  %v3201_v23 = vrot.slane %v3196_v39, 4  ;;  %v4400_v36 = vshrl.u32 %v9302_v62, 16 }
 0x1b5   : > { %3471 = vst [vmem:[#allocation2 + $0x24] sm:$0xf] %v3470_v13  ;;  %v3179_v5 = vrot.slane %v3177_v42, 7  ;;  %v4404_v21 = vrot.slane %v4402_v29, 1  ;;  %v4407_v59 = vshll.u32 %v9312_v43, 16  ;;  %v3905_v9 = vor.u32 %v3904_v7, %v3900_v63 }
 0x1b6   : > { %5103 = vrot.lane.b32.xlu0 %v4922_v55, %s7760_s17  ;;  %v3200_v49 = vsel %vm7898_vm10, %v3192_v12, %v3199_v4  ;;  %v3481_v32 = vsel %vm7847_vm3, %v3201_v23, %v3480_v57  ;;  %v3909_v53 = vrot.slane %v3907_v52, 1 }
 0x1b7   : > { %3479 = vst.msk [vmem:[#allocation2 + $0x34] sm:$0xf] %vm10685_vm9, %v3200_v49  ;;  %3482 = vst [vmem:[#allocation2 + $0x38] sm:$0x1] %v3481_v32  ;;  %v3182_v34 = vor.u32 %v3180_v3, %v3179_v5  ;;  %v3184_v31 = vrot.slane %v3179_v5, 4  ;;  %v4405_v6 = vor.u32 %v4404_v21, %v4400_v36  ;;  %v4409_v44 = vrot.slane %v4407_v59, 1 }
 0x1b8   : > { %v3910_v48 = vsel %vm1139_vm13, %v3905_v9, %v3909_v53  ;;  %vm10691_vm9 = vmmov %vm10679_vm0 }
 0x1b9   : > { %v3183_v28 = vsel %vm7898_vm10, %v3175_v51, %v3182_v34  ;;  %v3474_v18 = vsel %vm7847_vm3, %v3184_v31, %v3473_v16  ;;  %v4410_v37 = vsel %vm1139_vm13, %v4405_v6, %v4409_v44 }
 0x1ba   : > { %3472 = vst.msk [vmem:[#allocation2 + $0x28] sm:$0xf] %vm10679_vm0, %v3183_v28  ;;  %3475 = vst [vmem:[#allocation2 + $0x2c] sm:$0x1] %v3474_v18  ;;  %v3637_v2 = vld [vmem:[#allocation2 + $0x30] sm:$0xf] }
 0x1bb   : > { %v3699_v20 = vld [vmem:[#allocation2 + $0x30] sm:$0xf]  ;;  %vm5599_vm0 = vcmask 1043456  }
 0x1bc   : > { %v3682_v17 = vld [vmem:[#allocation2 + $0x30] sm:$0xe]  ;;  %v3618_v56 = vld [vmem:[#allocation2 + $0x24] sm:$0xe] }
 0x1bd   : > { %v3745_v47 = vld [vmem:[#allocation2 + $0x30] sm:$0xe]  ;;  %v3697_v46 = vld [vmem:[#allocation2 + $0x24] sm:$0xf] }
 0x1be   : > { %v3638_v45 = vld [vmem:[#allocation2 + $0x34] sm:$0xf]  ;;  %v3619_v24 = vld [vmem:[#allocation2 + $0x30] sm:$0xe]  ;;  %v3635_v10 = vld [vmem:[#allocation2 + $0x24] sm:$0xf] }
 0x1bf   : > { %v3700_v33 = vld [vmem:[#allocation2 + $0x34] sm:$0xf]  ;;  %v9358_v38 = vcombine.low %v3637_v2, %v3638_v45  ;;  %v7570_v19 = vld [vmem:[#allocation2 + $0x38] ss:$0 sps:$4 sm:$0x11]   ;;  %v7117_v30 = vcombine.low %v3682_v17, %v3638_v45 }
 0x1c0   : > { %v9360_v50 = vcombine.low %v3699_v20, %v3700_v33  ;;  %v9362_v0 = vld [vmem:[#allocation2 + $0x38] ss:$0 sps:$4 sm:$0x11]   ;;  %v7164_v62 = vcombine.low %v3745_v47, %v3700_v33  ;;  %v3576_v26 = vld [vmem:[#allocation2 + $0x34] sm:$0xf]  ;;  %v4681_v11 = vrot.slane %v7570_v19, 1 }
 0x1c1   : > { %4325 = vrot.lane.b32.xlu1 %v9358_v38, %s7751_s12  ;;  %v3698_v43 = vld [vmem:[#allocation2 + $0x28] sm:$0xf]  ;;  %v7070_v14 = vcombine.low %v3619_v24, %v3576_v26  ;;  %v4680_v60 = vrot.slane %v7117_v30, 1  ;;  %v3575_v8 = vld [vmem:[#allocation2 + $0x30] sm:$0xf]  ;;  %v5190_v57 = vrot.slane %v9362_v0, 1 }
 0x1c2   : > { %4835 = vrot.lane.b32.xlu0 %v9360_v50, %s7757_s11  ;;  %v9368_v40 = vld [vmem:[#allocation2 + $0x28] sm:$0xf]  ;;  %v9371_v27 = vld [vmem:[#allocation2 + $0x2c] ss:$0 sps:$4 sm:$0x11]   ;;  %v5189_v12 = vrot.slane %v7164_v62, 1  ;;  %v9378_v23 = vcombine.low %v3697_v46, %v3698_v43  ;;  %v9383_v3 = vcombine.low %v3575_v8, %v3576_v26 }
 0x1c3   : > { %v3574_v35 = vld [vmem:[#allocation2 + $0x28] sm:$0xf]  ;;  %v7576_v42 = vld [vmem:[#allocation2 + $0x38] ss:$0 sps:$4 sm:$0x11]   ;;  %v4438_v13 = vshll.u32 %v9358_v38, 16  ;;  %v9381_v55 = vcombine.low %v3635_v10, %v9368_v40  ;;  %v4682_v29 = vsel %vm1412_vm12, %v4680_v60, %v4681_v11 }
 0x1c4   : > { %v7069_v39 = vcombine.low %v3618_v56, %v3574_v35  ;;  %v3573_v5 = vld [vmem:[#allocation2 + $0x24] sm:$0xf]  ;;  %v4171_v49 = vrot.slane %v7070_v14, 1  ;;  %v4169_v51 = vrot.slane %v9371_v27, 1  ;;  %v4443_v34 = vshll.u32 %v7570_v19, 16 }
 0x1c5   : > { %4081 = vrot.lane.b32.xlu1 %v3910_v48, %s7749_s10  ;;  %v7295_v4 = vpop.f32.mrf.mxu0  ;;  %v3744_v31 = vld [vmem:[#allocation2 + $0x24] sm:$0xe]  ;;  %v9388_v28 = vcombine.low %v3573_v5, %v3574_v35  ;;  %v4440_v18 = vrot.slane %v4438_v13, 1  ;;  %v9390_v63 = vld [vmem:[#allocation2 + $0x2c] ss:$0 sps:$4 sm:$0x11]   ;;  %v5191_v36 = vsel %vm1412_vm12, %v5189_v12, %v5190_v57 }
 0x1c6   : > { %4591 = vrot.lane.b32.xlu0 %v4410_v37, %s7754_s15  ;;  %v2920_v32 = vadd.f32 %v7295_v4, %v9238_v15  ;;  %v4168_v16 = vrot.slane %v7069_v39, 1  ;;  %v7163_v7 = vcombine.low %v3744_v31, %v3698_v43  ;;  %v4172_v21 = vrot.slane %v7576_v42, 1  ;;  %v3681_v44 = vld [vmem:[#allocation2 + $0x24] sm:$0xe]  ;;  %v3490_v11 = vld [vmem:[#allocation2 + $0x48] sm:$0xf] }
 0x1c7   : > { %v2911_v22 = vpop.f32.mrf.mxu0  ;;  %v4436_v20 = vshrl.u32 %v9358_v38, 16  ;;  %v3936_v17 = vshrl.u32 %v9383_v3, 16  ;;  %v3938_v47 = vshll.u32 %v9383_v3, 16  ;;  %v3943_v45 = vshll.u32 %v7576_v42, 16 }
 0x1c8   : > { %v3016_v2 = vmax.f32 %v2920_v32, 0.0  ;;  %v2912_v52 = vadd.f32 %v9238_v15, %v2911_v22  ;;  %v4445_v19 = vrot.slane %v4443_v34, 1  ;;  %v4170_v53 = vsel %vm1412_vm12, %v4168_v16, %v4169_v51  ;;  %v9411_v13 = vld [vmem:[#allocation2 + $0x2c] ss:$0 sps:$4 sm:$0x11]  }
 0x1c9   : > { %4833 = vrot.lane.b32.xlu1 %v9378_v23, %s7757_s11  ;;  %v7296_v59 = vpop.f32.mrf.mxu0  ;;  %v4441_v6 = vor.u32 %v4440_v18, %v4436_v20  ;;  %v5186_v62 = vrot.slane %v7163_v7, 1  ;;  %v5187_v26 = vrot.slane %v9390_v63, 1  ;;  %v4173_v14 = vsel %vm1412_vm12, %v4171_v49, %v4172_v21  ;;  %v3483_v51 = vld [vmem:[#allocation2 + $0x3c] sm:$0xf] }
 0x1ca   : > { %4323 = vrot.lane.b32.xlu0 %v9381_v55, %s7751_s12  ;;  %v7216_v33 = vpack.c.bf16 %v3016_v2, %v3016_v2  ;;  %v3014_v24 = vmax.f32 %v2912_v52, 0.0  ;;  %v2923_v9 = vadd.f32 %v7296_v59, %v9238_v15  ;;  %v3940_v10 = vrot.slane %v3938_v47, 1  ;;  %v3494_v52 = vld [vmem:[#allocation2 + $0x50] sm:$0x1] }
 0x1cb   : > { %v2914_v30 = vpop.f32.mrf.mxu0  ;;  %v3945_v60 = vrot.slane %v3943_v45, 1  ;;  %v7116_v35 = vcombine.low %v3681_v44, %v9368_v40  ;;  %v4446_v57 = vsel %vm1139_vm13, %v4441_v6, %v4445_v19  ;;  %v5188_v42 = vsel %vm1412_vm12, %v5186_v62, %v5187_v26 }
 0x1cc   : > { %v3220_v43 = vshrl.u32 %v7216_v33, 16  ;;  %v7214_v56 = vpack.c.bf16 %v3014_v24, %v3014_v24  ;;  %v3017_v38 = vmax.f32 %v2923_v9, 0.0  ;;  %v2915_v46 = vadd.f32 %v9238_v15, %v2914_v30 }
 0x1cd   : > { %4725 = vrot.lane.b32.xlu1 %v4682_v29, %s7758_s13  ;;  %v3223_v48 = vshll.u32 %v7216_v33, 16  ;;  %v4938_v4 = vshll.u32 %v9360_v50, 16  ;;  %v3941_v31 = vor.u32 %v3940_v10, %v3936_v17  ;;  %v4677_v22 = vrot.slane %v7116_v35, 1 }
 0x1ce   : > { %5235 = vrot.lane.b32.xlu0 %v5191_v36, %s7759_s14  ;;  %v3222_v8 = vrot.slane %v3220_v43, 7  ;;  %v3203_v39 = vshrl.u32 %v7214_v56, 16  ;;  %v7217_v37 = vpack.c.bf16 %v3017_v38, %v3017_v38  ;;  %v3015_v12 = vmax.f32 %v2915_v46, 0.0 }
 0x1cf   : > { %v3206_v32 = vshll.u32 %v7214_v56, 16  ;;  %v4940_v2 = vrot.slane %v4938_v4, 1  ;;  %v4678_v21 = vrot.slane %v9411_v13, 1  ;;  %v4936_v59 = vshrl.u32 %v9360_v50, 16 }
 0x1d0   : > { %v3225_v5 = vor.u32 %v3223_v48, %v3222_v8  ;;  %v3205_v49 = vrot.slane %v3203_v39, 7  ;;  %v3228_v16 = vshrl.u32 %v7217_v37, 16  ;;  %v3231_v40 = vshll.u32 %v7217_v37, 16 }
 0x1d1   : > { %v7215_v34 = vpack.c.bf16 %v3015_v12, %v3015_v12  ;;  %4213 = vrot.lane.b32.xlu1 %v4170_v53, %s7755_s16  ;;  %v4943_v20 = vshll.u32 %v9362_v0, 16  ;;  %v3226_v47 = vrot.slane %v3222_v8, 4  ;;  %v3946_v19 = vsel %vm1139_vm13, %v3941_v31, %v3945_v60  ;;  %v3487_v53 = vld [vmem:[#allocation2 + $0x44] sm:$0x1] }
 0x1d2   : > { %4215 = vrot.lane.b32.xlu0 %v4173_v14, %s7755_s16  ;;  %v3491_v29 = vsel %vm9248_vm6, %v3225_v5, %v3490_v11  ;;  %v3208_v18 = vor.u32 %v3206_v32, %v3205_v49  ;;  %v3230_v7 = vrot.slane %v3228_v16, 7  ;;  %v3209_v30 = vrot.slane %v3205_v49, 4 }
 0x1d3   : > { %3492 = vst [vmem:[#allocation2 + $0x48] sm:$0xf] %v3491_v29  ;;  %v3211_v36 = vshrl.u32 %v7215_v34, 16  ;;  %v3214_v9 = vshll.u32 %v7215_v34, 16  ;;  %v4941_v6 = vor.u32 %v4940_v2, %v4936_v59  ;;  %v4926_v43 = vshll.u32 %v9378_v23, 16 }
 0x1d4   : > { %v3484_v17 = vsel %vm9248_vm6, %v3208_v18, %v3483_v51  ;;  %v3233_v45 = vor.u32 %v3231_v40, %v3230_v7  ;;  %v3235_v33 = vrot.slane %v3230_v7, 4  ;;  %v4931_v56 = vshll.u32 %v9390_v63, 16 }
 0x1d5   : > { %3485 = vst [vmem:[#allocation2 + $0x3c] sm:$0xf] %v3484_v17  ;;  %v3213_v24 = vrot.slane %v3211_v36, 7  ;;  %4597 = vrot.lane.b32.xlu1 %v4446_v57, %s7754_s15  ;;  %v4679_v38 = vsel %vm1412_vm12, %v4677_v22, %v4678_v21  ;;  %v4945_v14 = vrot.slane %v4943_v20, 1  ;;  %v4426_v44 = vshll.u32 %v9381_v55, 16 }
 0x1d6   : > { %5233 = vrot.lane.b32.xlu0 %v5188_v42, %s7759_s14  ;;  %v3234_v50 = vsel %vm7898_vm10, %v3226_v47, %v3233_v45  ;;  %v3495_v0 = vsel %vm7847_vm3, %v3235_v33, %v3494_v52  ;;  %v3926_v46 = vshll.u32 %v9388_v28, 16  ;;  %v4924_v35 = vshrl.u32 %v9378_v23, 16 }
 0x1d7   : > { %3493 = vst.msk [vmem:[#allocation2 + $0x4c] sm:$0xf] %vm10686_vm5, %v3234_v50  ;;  %3496 = vst [vmem:[#allocation2 + $0x50] sm:$0x1] %v3495_v0  ;;  %v3216_v62 = vor.u32 %v3214_v9, %v3213_v24  ;;  %v3218_v26 = vrot.slane %v3213_v24, 4  ;;  %v4946_v63 = vsel %vm1139_vm13, %v4941_v6, %v4945_v14  ;;  %v4928_v8 = vrot.slane %v4926_v43, 1 }
 0x1d8   : > { %v4933_v48 = vrot.slane %v4931_v56, 1  ;;  %v4424_v11 = vshrl.u32 %v9381_v55, 16  ;;  %v4431_v39 = vshll.u32 %v9411_v13, 16  ;;  %v4428_v37 = vrot.slane %v4426_v44, 1 }
 0x1d9   : > { %v3217_v10 = vsel %vm7898_vm10, %v3209_v30, %v3216_v62  ;;  %v3488_v60 = vsel %vm7847_vm3, %v3218_v26, %v3487_v53  ;;  %4087 = vrot.lane.b32.xlu1 %v3946_v19, %s7749_s10  ;;  %v3924_v12 = vshrl.u32 %v9388_v28, 16  ;;  %v3928_v57 = vrot.slane %v3926_v46, 1 }
 0x1da   : > { %4723 = vrot.lane.b32.xlu0 %v4679_v38, %s7758_s13  ;;  %3486 = vst.msk [vmem:[#allocation2 + $0x40] sm:$0xf] %vm10687_vm15, %v3217_v10  ;;  %3489 = vst [vmem:[#allocation2 + $0x44] sm:$0x1] %v3488_v60  ;;  %v3931_v42 = vshll.u32 %v9371_v27, 16  ;;  %v4929_v55 = vor.u32 %v4928_v8, %v4924_v35  ;;  %v4429_v31 = vor.u32 %v4428_v37, %v4424_v11  ;;  %v4433_v22 = vrot.slane %v4431_v39, 1 }
 0x1db   : > { %v3641_v4 = vld [vmem:[#allocation2 + $0x48] sm:$0xf]  ;;  %v3929_v29 = vor.u32 %v3928_v57, %v3924_v12  ;;  %vm5391_vm5 = vcmask 326656   ;;  %vm5424_vm15 = vcmask 392192  }
 0x1dc   : > { %v3703_v5 = vld [vmem:[#allocation2 + $0x48] sm:$0xf]  ;;  %v3620_v7 = vld [vmem:[#allocation2 + $0x3c] sm:$0xe]  ;;  %v3933_v2 = vrot.slane %v3931_v42, 1  ;;  %v4934_v9 = vsel %vm1139_vm13, %v4929_v55, %v4933_v48  ;;  %v4434_v0 = vsel %vm1139_vm13, %v4429_v31, %v4433_v22 }
 0x1dd   : > { %v3747_v49 = vld [vmem:[#allocation2 + $0x48] sm:$0xe]  ;;  %v3639_v59 = vld [vmem:[#allocation2 + $0x3c] sm:$0xf] }
 0x1de   : > { %5107 = vrot.lane.b32.xlu0 %v4946_v63, %s7760_s17  ;;  %v3642_v32 = vld [vmem:[#allocation2 + $0x4c] sm:$0xf]  ;;  %v3684_v13 = vld [vmem:[#allocation2 + $0x48] sm:$0xe]  ;;  %v3701_v20 = vld [vmem:[#allocation2 + $0x3c] sm:$0xf]  ;;  %v3934_v53 = vsel %vm1139_vm13, %v3929_v29, %v3933_v2 }
 0x1df   : > { %v3704_v16 = vld [vmem:[#allocation2 + $0x4c] sm:$0xf]  ;;  %v9450_v23 = vcombine.low %v3641_v4, %v3642_v32  ;;  %v3621_v34 = vld [vmem:[#allocation2 + $0x48] sm:$0xe]  ;;  %v7119_v17 = vcombine.low %v3684_v13, %v3642_v32  ;;  %v3746_v24 = vld [vmem:[#allocation2 + $0x3c] sm:$0xe] }
 0x1e0   : > { %v9452_v51 = vcombine.low %v3703_v5, %v3704_v16  ;;  %v7166_v40 = vcombine.low %v3747_v49, %v3704_v16  ;;  %v9454_v18 = vld [vmem:[#allocation2 + $0x50] ss:$0 sps:$4 sm:$0x11]   ;;  %v3580_v27 = vld [vmem:[#allocation2 + $0x4c] sm:$0xf] }
 0x1e1   : > { %4329 = vrot.lane.b32.xlu1 %v9450_v23, %s7751_s12  ;;  %v9460_v52 = vld [vmem:[#allocation2 + $0x40] sm:$0xf]  ;;  %v7585_v36 = vld [vmem:[#allocation2 + $0x50] ss:$0 sps:$4 sm:$0x11]   ;;  %v7072_v45 = vcombine.low %v3621_v34, %v3580_v27  ;;  %v5196_v6 = vrot.slane %v9454_v18, 1 }
 0x1e2   : > { %4839 = vrot.lane.b32.xlu0 %v9452_v51, %s7757_s11  ;;  %v3579_v21 = vld [vmem:[#allocation2 + $0x48] sm:$0xf]  ;;  %v3702_v47 = vld [vmem:[#allocation2 + $0x40] sm:$0xf]  ;;  %v5195_v19 = vrot.slane %v7166_v40, 1  ;;  %v9475_v56 = vcombine.low %v3639_v59, %v9460_v52  ;;  %v4462_v46 = vshll.u32 %v9450_v23, 16 }
 0x1e3   : > { %v3578_v33 = vld [vmem:[#allocation2 + $0x40] sm:$0xf]  ;;  %v9463_v30 = vld [vmem:[#allocation2 + $0x50] ss:$0 sps:$4 sm:$0x11]   ;;  %v9468_v62 = vcombine.low %v3579_v21, %v3580_v27  ;;  %v9477_v38 = vcombine.low %v3701_v20, %v3702_v47  ;;  %v7165_v44 = vcombine.low %v3746_v24, %v3702_v47  ;;  %v4686_v60 = vrot.slane %v7119_v17, 1 }
 0x1e4   : > { %v7071_v50 = vcombine.low %v3620_v7, %v3578_v33  ;;  %v9470_v26 = vld [vmem:[#allocation2 + $0x44] ss:$0 sps:$4 sm:$0x11]   ;;  %v4687_v63 = vrot.slane %v7585_v36, 1  ;;  %v4177_v35 = vrot.slane %v7072_v45, 1  ;;  %v4178_v48 = vrot.slane %v9463_v30, 1 }
 0x1e5   : > { %5105 = vrot.lane.b32.xlu1 %v4934_v9, %s7760_s17  ;;  %v7299_v43 = vpop.f32.mrf.mxu0  ;;  %v9479_v14 = vld [vmem:[#allocation2 + $0x44] ss:$0 sps:$4 sm:$0x11]   ;;  %v4175_v39 = vrot.slane %v9470_v26, 1  ;;  %v4464_v37 = vrot.slane %v4462_v46, 1  ;;  %v5197_v42 = vsel %vm1412_vm12, %v5195_v19, %v5196_v6  ;;  %v4467_v5 = vshll.u32 %v7585_v36, 16 }
 0x1e6   : > { %4595 = vrot.lane.b32.xlu0 %v4434_v0, %s7754_s15  ;;  %v2936_v10 = vadd.f32 %v7299_v43, %v9238_v15  ;;  %v4174_v11 = vrot.slane %v7071_v50, 1  ;;  %v3577_v4 = vld [vmem:[#allocation2 + $0x3c] sm:$0xf]  ;;  %v5192_v16 = vrot.slane %v7165_v44, 1  ;;  %v5193_v55 = vrot.slane %v9479_v14, 1 }
 0x1e7   : > { %v2927_v8 = vpop.f32.mrf.mxu0  ;;  %v9490_v32 = vcombine.low %v3577_v4, %v3578_v33  ;;  %v4460_v40 = vshrl.u32 %v9450_v23, 16  ;;  %v4688_v22 = vsel %vm1412_vm12, %v4686_v60, %v4687_v63  ;;  %v4179_v27 = vsel %vm1412_vm12, %v4177_v35, %v4178_v48  ;;  %v9498_v36 = vld [vmem:[#allocation2 + $0x44] ss:$0 sps:$4 sm:$0x11]   ;;  %v3683_v17 = vld [vmem:[#allocation2 + $0x3c] sm:$0xe] }
 0x1e8   : > { %v3020_v12 = vmax.f32 %v2936_v10, 0.0  ;;  %v2928_v57 = vadd.f32 %v9238_v15, %v2927_v8  ;;  %v4176_v7 = vsel %vm1412_vm12, %v4174_v11, %v4175_v39  ;;  %v3960_v21 = vshrl.u32 %v9468_v62, 16  ;;  %v3504_v6 = vld [vmem:[#allocation2 + $0x60] sm:$0xf]  ;;  %v3497_v8 = vld [vmem:[#allocation2 + $0x54] sm:$0xf] }
 0x1e9   : > { %4085 = vrot.lane.b32.xlu1 %v3934_v53, %s7749_s10  ;;  %v7300_v49 = vpop.f32.mrf.mxu0  ;;  %v4465_v2 = vor.u32 %v4464_v37, %v4460_v40  ;;  %v4469_v23 = vrot.slane %v4467_v5, 1  ;;  %v5194_v33 = vsel %vm1412_vm12, %v5192_v16, %v5193_v55  ;;  %v7118_v24 = vcombine.low %v3683_v17, %v9460_v52  ;;  %v3508_v5 = vld [vmem:[#allocation2 + $0x68] sm:$0x1] }
 0x1ea   : > { %4327 = vrot.lane.b32.xlu0 %v9475_v56, %s7751_s12  ;;  %v7220_v13 = vpack.c.bf16 %v3020_v12, %v3020_v12  ;;  %v3018_v34 = vmax.f32 %v2928_v57, 0.0  ;;  %v2939_v31 = vadd.f32 %v7300_v49, %v9238_v15  ;;  %v3962_v9 = vshll.u32 %v9468_v62, 16 }
 0x1eb   : > { %v2930_v29 = vpop.f32.mrf.mxu0  ;;  %v4470_v44 = vsel %vm1139_vm13, %v4465_v2, %v4469_v23  ;;  %v4962_v46 = vshll.u32 %v9452_v51, 16  ;;  %v4683_v11 = vrot.slane %v7118_v24, 1  ;;  %v3967_v16 = vshll.u32 %v9463_v30, 16 }
 0x1ec   : > { %v3254_v59 = vshrl.u32 %v7220_v13, 16  ;;  %v7218_v20 = vpack.c.bf16 %v3018_v34, %v3018_v34  ;;  %v3021_v47 = vmax.f32 %v2939_v31, 0.0  ;;  %v2931_v45 = vadd.f32 %v9238_v15, %v2930_v29 }
 0x1ed   : > { %4837 = vrot.lane.b32.xlu1 %v9477_v38, %s7757_s11  ;;  %v3257_v50 = vshll.u32 %v7220_v13, 16  ;;  %v4684_v15 = vrot.slane %v9498_v36, 1  ;;  %v3964_v39 = vrot.slane %v3962_v9, 1  ;;  %v4960_v55 = vshrl.u32 %v9452_v51, 16 }
 0x1ee   : > { %5239 = vrot.lane.b32.xlu0 %v5197_v42, %s7759_s14  ;;  %v3256_v19 = vrot.slane %v3254_v59, 7  ;;  %v3237_v0 = vshrl.u32 %v7218_v20, 16  ;;  %v7221_v53 = vpack.c.bf16 %v3021_v47, %v3021_v47  ;;  %v3019_v43 = vmax.f32 %v2931_v45, 0.0  ;;  %v3501_v59 = vld [vmem:[#allocation2 + $0x5c] sm:$0x1] }
 0x1ef   : > { %v3240_v63 = vshll.u32 %v7218_v20, 16  ;;  %v4964_v42 = vrot.slane %v4962_v46, 1  ;;  %v4967_v31 = vshll.u32 %v9454_v18, 16  ;;  %v3965_v2 = vor.u32 %v3964_v39, %v3960_v21 }
 0x1f0   : > { %v3259_v10 = vor.u32 %v3257_v50, %v3256_v19  ;;  %v3239_v60 = vrot.slane %v3237_v0, 7  ;;  %v3262_v35 = vshrl.u32 %v7221_v53, 16  ;;  %v3265_v52 = vshll.u32 %v7221_v53, 16 }
 0x1f1   : > { %v7219_v48 = vpack.c.bf16 %v3019_v43, %v3019_v43  ;;  %4729 = vrot.lane.b32.xlu1 %v4688_v22, %s7758_s13  ;;  %v3260_v4 = vrot.slane %v3256_v19, 4  ;;  %v4965_v20 = vor.u32 %v4964_v42, %v4960_v55  ;;  %v4950_v47 = vshll.u32 %v9477_v38, 16 }
 0x1f2   : > { %4219 = vrot.lane.b32.xlu0 %v4179_v27, %s7755_s16  ;;  %v3505_v37 = vsel %vm9248_vm6, %v3259_v10, %v3504_v6  ;;  %v3242_v12 = vor.u32 %v3240_v63, %v3239_v60  ;;  %v3264_v57 = vrot.slane %v3262_v35, 7  ;;  %v3243_v22 = vrot.slane %v3239_v60, 4 }
 0x1f3   : > { %3506 = vst [vmem:[#allocation2 + $0x60] sm:$0xf] %v3505_v37  ;;  %v3245_v49 = vshrl.u32 %v7219_v48, 16  ;;  %v3248_v27 = vshll.u32 %v7219_v48, 16  ;;  %v4450_v17 = vshll.u32 %v9475_v56, 16  ;;  %v4685_v21 = vsel %vm1412_vm12, %v4683_v11, %v4684_v15 }
 0x1f4   : > { %v3498_v40 = vsel %vm9248_vm6, %v3242_v12, %v3497_v8  ;;  %v3267_v13 = vor.u32 %v3265_v52, %v3264_v57  ;;  %v3269_v34 = vrot.slane %v3264_v57, 4  ;;  %v3969_v45 = vrot.slane %v3967_v16, 1 }
 0x1f5   : > { %3499 = vst [vmem:[#allocation2 + $0x54] sm:$0xf] %v3498_v40  ;;  %v3247_v29 = vrot.slane %v3245_v49, 7  ;;  %4217 = vrot.lane.b32.xlu1 %v4176_v7, %s7755_s16  ;;  %v4955_v7 = vshll.u32 %v9479_v14, 16  ;;  %v3950_v24 = vshll.u32 %v9490_v32, 16  ;;  %v4948_v0 = vshrl.u32 %v9477_v38, 16 }
 0x1f6   : > { %5237 = vrot.lane.b32.xlu0 %v5194_v33, %s7759_s14  ;;  %v3268_v30 = vsel %vm7898_vm10, %v3260_v4, %v3267_v13  ;;  %v3509_v51 = vsel %vm7847_vm3, %v3269_v34, %v3508_v5  ;;  %v4969_v33 = vrot.slane %v4967_v31, 1  ;;  %v3970_v14 = vsel %vm1139_vm13, %v3965_v2, %v3969_v45 }
 0x1f7   : > { %3507 = vst.msk [vmem:[#allocation2 + $0x64] sm:$0xf] %vm10688_vm2, %v3268_v30  ;;  %3510 = vst [vmem:[#allocation2 + $0x68] sm:$0x1] %v3509_v51  ;;  %v3250_v18 = vor.u32 %v3248_v27, %v3247_v29  ;;  %v3252_v23 = vrot.slane %v3247_v29, 4  ;;  %v4952_v53 = vrot.slane %v4950_v47, 1 }
 0x1f8   : > { %v4970_v50 = vsel %vm1139_vm13, %v4965_v20, %v4969_v33  ;;  %v4957_v6 = vrot.slane %v4955_v7, 1  ;;  %v4448_v43 = vshrl.u32 %v9475_v56, 16  ;;  %v4452_v15 = vrot.slane %v4450_v17, 1  ;;  %v9576_v33 = vld [vmem:[%s10628_s2] ss:$0 sm:$0xff] }
 0x1f9   : > { %v3251_v9 = vsel %vm7898_vm10, %v3243_v22, %v3250_v18  ;;  %v3502_v19 = vsel %vm7847_vm3, %v3252_v23, %v3501_v59  ;;  %4601 = vrot.lane.b32.xlu1 %v4470_v44, %s7754_s15  ;;  %v4455_v46 = vshll.u32 %v9498_v36, 16  ;;  %v3948_v44 = vshrl.u32 %v9490_v32, 16 }
 0x1fa   : > { %4727 = vrot.lane.b32.xlu0 %v4685_v21, %s7758_s13  ;;  %3500 = vst.msk [vmem:[#allocation2 + $0x58] sm:$0xf] %vm10689_vm8, %v3251_v9  ;;  %3503 = vst [vmem:[#allocation2 + $0x5c] sm:$0x1] %v3502_v19  ;;  %v3952_v10 = vrot.slane %v3950_v24, 1  ;;  %v3955_v60 = vshll.u32 %v9470_v26, 16  ;;  %v4953_v37 = vor.u32 %v4952_v53, %v4948_v0  ;;  %v4453_v12 = vor.u32 %v4452_v15, %v4448_v43  ;;  %v9583_v53 = vpop.permute.xlu0 %4079 }
 0x1fb   : > { %v3645_v63 = vld [vmem:[#allocation2 + $0x60] sm:$0xf]  ;;  %v4457_v57 = vrot.slane %v4455_v46, 1  ;;  %vm5457_vm2 = vcmask 457728   ;;  %vm5490_vm8 = vcmask 523264  }
 0x1fc   : > { %v3707_v35 = vld [vmem:[#allocation2 + $0x60] sm:$0xf]  ;;  %v3953_v26 = vor.u32 %v3952_v10, %v3948_v44  ;;  %v3622_v5 = vld [vmem:[#allocation2 + $0x54] sm:$0xe]  ;;  %v3957_v49 = vrot.slane %v3955_v60, 1  ;;  %v4958_v30 = vsel %vm1139_vm13, %v4953_v37, %v4957_v6 }
 0x1fd   : > { %4091 = vrot.lane.b32.xlu1 %v3970_v14, %s7749_s10  ;;  %v3749_v8 = vld [vmem:[#allocation2 + $0x60] sm:$0xe]  ;;  %v4458_v51 = vsel %vm1139_vm13, %v4453_v12, %v4457_v57  ;;  %v3643_v23 = vld [vmem:[#allocation2 + $0x54] sm:$0xf] }
 0x1fe   : > { %5111 = vrot.lane.b32.xlu0 %v4970_v50, %s7760_s17  ;;  %v3646_v38 = vld [vmem:[#allocation2 + $0x64] sm:$0xf]  ;;  %v3686_v36 = vld [vmem:[#allocation2 + $0x60] sm:$0xe]  ;;  %v3958_v59 = vsel %vm1139_vm13, %v3953_v26, %v3957_v49  ;;  %v3705_v19 = vld [vmem:[#allocation2 + $0x54] sm:$0xf] }
 0x1ff   : > { %v3708_v52 = vld [vmem:[#allocation2 + $0x64] sm:$0xf]  ;;  %v9548_v48 = vcombine.low %v3645_v63, %v3646_v38  ;;  %v3623_v39 = vld [vmem:[#allocation2 + $0x60] sm:$0xe]  ;;  %v7121_v40 = vcombine.low %v3686_v36, %v3646_v38  ;;  %v3748_v46 = vld [vmem:[#allocation2 + $0x54] sm:$0xe] }
 0x200   : > { %v9550_v56 = vcombine.low %v3707_v35, %v3708_v52  ;;  %v7168_v11 = vcombine.low %v3749_v8, %v3708_v52  ;;  %v9552_v42 = vld [vmem:[#allocation2 + $0x68] ss:$0 sps:$4 sm:$0x11]   ;;  %v3584_v4 = vld [vmem:[#allocation2 + $0x64] sm:$0xf] }
 0x201   : > { %4333 = vrot.lane.b32.xlu1 %v9548_v48, %s7751_s12  ;;  %v9558_v16 = vld [vmem:[#allocation2 + $0x58] sm:$0xf]  ;;  %v7600_v55 = vld [vmem:[#allocation2 + $0x68] ss:$0 sps:$4 sm:$0x11]   ;;  %v7074_v31 = vcombine.low %v3623_v39, %v3584_v4  ;;  %v5202_v20 = vrot.slane %v9552_v42, 1 }
 0x202   : > { %4843 = vrot.lane.b32.xlu0 %v9550_v56, %s7757_s11  ;;  %v3706_v13 = vld [vmem:[#allocation2 + $0x58] sm:$0xf]  ;;  %v3583_v34 = vld [vmem:[#allocation2 + $0x60] sm:$0xf]  ;;  %v5201_v29 = vrot.slane %v7168_v11, 1  ;;  %v4692_v7 = vrot.slane %v7121_v40, 1  ;;  %v9580_v9 = vcombine.low %v3643_v23, %v9558_v16 }
 0x203   : > { %v3582_v22 = vld [vmem:[#allocation2 + $0x58] sm:$0xf]  ;;  %v9560_v27 = vld [vmem:[#allocation2 + $0x68] ss:$0 sps:$4 sm:$0x11]   ;;  %v4693_v17 = vrot.slane %v7600_v55, 1  ;;  %v9570_v21 = vcombine.low %v3583_v34, %v3584_v4  ;;  %v9585_v6 = vcombine.low %v3705_v19, %v3706_v13  ;;  %v7167_v8 = vcombine.low %v3748_v46, %v3706_v13 }
 0x204   : > { %v7073_v2 = vcombine.low %v3622_v5, %v3582_v22  ;;  %v9566_v47 = vld [vmem:[#allocation2 + $0x5c] ss:$0 sps:$4 sm:$0x11]   ;;  %v4486_v45 = vshll.u32 %v9548_v48, 16  ;;  %v4183_v14 = vrot.slane %v7074_v31, 1  ;;  %v4184_v50 = vrot.slane %v9560_v27, 1 }
 0x205   : > { %5109 = vrot.lane.b32.xlu1 %v4958_v30, %s7760_s17  ;;  %v7303_v18 = vpop.f32.mrf.mxu0  ;;  %v4181_v15 = vrot.slane %v9566_v47, 1  ;;  %v4491_v44 = vshll.u32 %v7600_v55, 16  ;;  %v5203_v63 = vsel %vm1412_vm12, %v5201_v29, %v5202_v20  ;;  %v3581_v35 = vld [vmem:[#allocation2 + $0x54] sm:$0xf]  ;;  %v4694_v52 = vsel %vm1412_vm12, %v4692_v7, %v4693_v17 }
 0x206   : > { %4599 = vrot.lane.b32.xlu0 %v4458_v51, %s7754_s15  ;;  %v2952_v24 = vadd.f32 %v9576_v33, %v7303_v18  ;;  %v4180_v43 = vrot.slane %v7073_v2, 1  ;;  %v9594_v11 = vcombine.low %v3581_v35, %v3582_v22  ;;  %v9596_v36 = vld [vmem:[#allocation2 + $0x5c] ss:$0 sps:$4 sm:$0x11]   ;;  %v4484_v39 = vshrl.u32 %v9548_v48, 16  ;;  %v9612_v51 = vpop.permute.xlu0 %4207 }
 0x207   : > { %v2943_v0 = vpop.f32.mrf.mxu0  ;;  %v4488_v37 = vrot.slane %v4486_v45, 1  ;;  %v4185_v4 = vsel %vm1412_vm12, %v4183_v14, %v4184_v50  ;;  %v9602_v55 = vrot.slane %v4491_v44, 1  ;;  %v9604_v40 = vld [vmem:[#allocation2 + $0x5c] ss:$0 sps:$4 sm:$0x11]   ;;  %v3984_v13 = vshrl.u32 %v9570_v21, 16 }
 0x208   : > { %v3024_v10 = vmax.f32 %v2952_v24, 0.0  ;;  %v2944_v60 = vadd.f32 %v9576_v33, %v2943_v0  ;;  %v4182_v49 = vsel %vm1412_vm12, %v4180_v43, %v4181_v15  ;;  %v3986_v34 = vshll.u32 %v9570_v21, 16  ;;  %v3685_v2 = vld [vmem:[#allocation2 + $0x54] sm:$0xe]  ;;  %v3518_v24 = vld [vmem:[#allocation2 + $0x78] sm:$0xf] }
 0x209   : > { %4089 = vrot.lane.b32.xlu1 %v3958_v59, %s7749_s10  ;;  %v7304_v38 = vpop.f32.mrf.mxu0  ;;  %v5198_v29 = vrot.slane %v7167_v8, 1  ;;  %v5199_v59 = vrot.slane %v9596_v36, 1  ;;  %v4489_v20 = vor.u32 %v4488_v37, %v4484_v39  ;;  %v7120_v18 = vcombine.low %v3685_v2, %v9558_v16 }
 0x20a   : > { %4331 = vrot.lane.b32.xlu0 %v9580_v9, %s7751_s12  ;;  %v7224_v12 = vpack.c.bf16 %v3024_v10, %v3024_v10  ;;  %v3022_v57 = vmax.f32 %v2944_v60, 0.0  ;;  %v2955_v26 = vadd.f32 %v9576_v33, %v7304_v38  ;;  %v4690_v14 = vrot.slane %v9604_v40, 1  ;;  %v3511_v10 = vld [vmem:[#allocation2 + $0x6c] sm:$0xf] }
 0x20b   : > { %v2946_v5 = vpop.f32.mrf.mxu0  ;;  %v3988_v50 = vrot.slane %v3986_v34, 1  ;;  %v4986_v0 = vshll.u32 %v9550_v56, 16  ;;  %v5200_v16 = vsel %vm1412_vm12, %v5198_v29, %v5199_v59  ;;  %v4689_v35 = vrot.slane %v7120_v18, 1  ;;  %v3515_v59 = vld [vmem:[#allocation2 + $0x74] sm:$0x1] }
 0x20c   : > { %v3288_v31 = vshrl.u32 %v7224_v12, 16  ;;  %v7222_v48 = vpack.c.bf16 %v3022_v57, %v3022_v57  ;;  %v3025_v22 = vmax.f32 %v2955_v26, 0.0  ;;  %v2947_v30 = vadd.f32 %v9576_v33, %v2946_v5 }
 0x20d   : > { %4841 = vrot.lane.b32.xlu1 %v9585_v6, %s7757_s11  ;;  %v3291_v7 = vshll.u32 %v7224_v12, 16  ;;  %v4988_v37 = vrot.slane %v4986_v0, 1  ;;  %v3522_v12 = vld [vmem:[#allocation2 + $0x80] sm:$0x1]  ;;  %v3989_v5 = vor.u32 %v3988_v50, %v3984_v13  ;;  %v3991_v34 = vshll.u32 %v9560_v27, 16 }
 0x20e   : > { %5243 = vrot.lane.b32.xlu0 %v5203_v63, %s7759_s14  ;;  %v3290_v23 = vrot.slane %v3288_v31, 7  ;;  %v3271_v17 = vshrl.u32 %v7222_v48, 16  ;;  %v7225_v45 = vpack.c.bf16 %v3025_v22, %v3025_v22  ;;  %v3023_v19 = vmax.f32 %v2947_v30, 0.0 }
 0x20f   : > { %v3274_v46 = vshll.u32 %v7222_v48, 16  ;;  %v4991_v13 = vshll.u32 %v9552_v42, 16  ;;  %v4979_v42 = vshll.u32 %v9596_v36, 16  ;;  %v4494_v50 = vsel %vm1139_vm13, %v4489_v20, %v9602_v55 }
 0x210   : > { %v3293_v43 = vor.u32 %v3291_v7, %v3290_v23  ;;  %v3273_v15 = vrot.slane %v3271_v17, 7  ;;  %v3296_v44 = vshrl.u32 %v7225_v45, 16  ;;  %v3299_v60 = vshll.u32 %v7225_v45, 16 }
 0x211   : > { %v7223_v63 = vpack.c.bf16 %v3023_v19, %v3023_v19  ;;  %4733 = vrot.lane.b32.xlu1 %v4694_v52, %s7758_s13  ;;  %v4984_v52 = vshrl.u32 %v9550_v56, 16  ;;  %v4974_v7 = vshll.u32 %v9585_v6, 16  ;;  %v5264_v19 = vsel %vm2550_vm1, %v9132_v58, %v9583_v53  ;;  %v7624_v58 = vld [vmem:[%s10629_s3 + $0x20] ss:$0 sps:$4 sm:$0xff]  }
 0x212   : > { %4223 = vrot.lane.b32.xlu0 %v4185_v4, %s7755_s16  ;;  %v3519_v8 = vsel %vm9248_vm6, %v3293_v43, %v3518_v24  ;;  %v3276_v38 = vor.u32 %v3274_v46, %v3273_v15  ;;  %v3298_v39 = vrot.slane %v3296_v44, 7  ;;  %v3294_v4 = vrot.slane %v3290_v23, 4  ;;  %7360 = vmatprep.subr.msk.bf16.mxu1 %vm5599_vm0, %v7624_v58 }
 0x213   : > { %3520 = vst [vmem:[#allocation2 + $0x78] sm:$0xf] %v3519_v8  ;;  %v3279_v57 = vshrl.u32 %v7223_v63, 16  ;;  %v3277_v29 = vrot.slane %v3273_v15, 4  ;;  %v3282_v30 = vshll.u32 %v7223_v63, 16  ;;  %v9636_v18 = vpop.permute.xlu1 %4321  ;;  %v4989_v23 = vor.u32 %v4988_v37, %v4984_v52 }
 0x214   : > { %v9623_v26 = vpop.permute.xlu0 %4831  ;;  %v3512_v31 = vsel %vm9248_vm6, %v3276_v38, %v3511_v10  ;;  %v3301_v48 = vor.u32 %v3299_v60, %v3298_v39  ;;  %v3303_v22 = vrot.slane %v3298_v39, 4  ;;  %v4474_v24 = vshll.u32 %v9580_v9, 16 }
 0x215   : > { %3513 = vst [vmem:[#allocation2 + $0x6c] sm:$0xf] %v3512_v31  ;;  %v3281_v2 = vrot.slane %v3279_v57, 7  ;;  %4221 = vrot.lane.b32.xlu1 %v4182_v49, %s7755_s16  ;;  %v4691_v0 = vsel %vm1412_vm12, %v4689_v35, %v4690_v14  ;;  %v3993_v43 = vrot.slane %v3991_v34, 1  ;;  %v4993_v36 = vrot.slane %v4991_v13, 1  ;;  %v7632_v13 = vld [vmem:[%s10629_s3 + $0x10] sm:$0xff]  }
 0x216   : > { %5241 = vrot.lane.b32.xlu0 %v5200_v16, %s7759_s14  ;;  %v3302_v27 = vsel %vm7898_vm10, %v3294_v4, %v3301_v48  ;;  %v3523_v56 = vsel %vm7847_vm3, %v3303_v22, %v3522_v12  ;;  %v4479_v44 = vshll.u32 %v9604_v40, 16  ;;  %v4972_v55 = vshrl.u32 %v9585_v6, 16  ;;  %v7628_v16 = vld [vmem:[%s10629_s3 + $0x18] sm:$0xff]  }
 0x217   : > { %3521 = vst.msk [vmem:[#allocation2 + $0x7c] sm:$0xf] %vm10690_vm11, %v3302_v27  ;;  %3524 = vst [vmem:[#allocation2 + $0x80] sm:$0x1] %v3523_v56  ;;  %v3284_v49 = vor.u32 %v3282_v30, %v3281_v2  ;;  %v3286_v17 = vrot.slane %v3281_v2, 4  ;;  %v3994_v53 = vsel %vm1139_vm13, %v3989_v5, %v3993_v43  ;;  %v4976_v20 = vrot.slane %v4974_v7, 1  ;;  %v9669_v35 = vpop.permute.xlu1 %4721 }
 0x218   : > { %v9640_v45 = vpop.permute.xlu0 %4319  ;;  %v3974_v14 = vshll.u32 %v9594_v11, 16  ;;  %v4994_v10 = vsel %vm1139_vm13, %v4989_v23, %v4993_v36  ;;  %v4981_v60 = vrot.slane %v4979_v42, 1  ;;  %v4472_v63 = vshrl.u32 %v9580_v9, 16  ;;  %v7634_v36 = vld [vmem:[%s10629_s3 + $0x8] sm:$0xff]  }
 0x219   : > { %v3285_v15 = vsel %vm7898_vm10, %v3277_v29, %v3284_v49  ;;  %v3516_v46 = vsel %vm7847_vm3, %v3286_v17, %v3515_v59  ;;  %4605 = vrot.lane.b32.xlu1 %v4494_v50, %s7754_s15  ;;  %v4476_v40 = vrot.slane %v4474_v24, 1  ;;  %v3972_v39 = vshrl.u32 %v9594_v11, 16 }
 0x21a   : > { %4731 = vrot.lane.b32.xlu0 %v4691_v0, %s7758_s13  ;;  %3514 = vst.msk [vmem:[#allocation2 + $0x70] sm:$0xf] %vm10691_vm9, %v3285_v15  ;;  %3517 = vst [vmem:[#allocation2 + $0x74] sm:$0x1] %v3516_v46  ;;  %v3649_v8 = vld [vmem:[#allocation2 + $0x78] sm:$0xf]  ;;  %v5296_v52 = vsel %vm2616_vm7, %v5264_v19, %v9612_v51  ;;  %v4977_v48 = vor.u32 %v4976_v20, %v4972_v55 }
 0x21b   : > { %v3711_v38 = vld [vmem:[#allocation2 + $0x78] sm:$0xf]  ;;  %v3976_v6 = vrot.slane %v3974_v14, 1  ;;  %v3979_v37 = vshll.u32 %v9566_v47, 16  ;;  %v4481_v9 = vrot.slane %v4479_v44, 1  ;;  %v5601_v34 = vsel %vm5599_vm0, %v7624_v58, 0  ;;  %v9699_v0 = vpop.permute.xlu1 %4209  ;;  %vm10692_vm0 = vmmov %vm10691_vm9 }
 0x21c   : > { %v9673_v12 = vpop.permute.xlu0 %5231  ;;  %v3751_v57 = vld [vmem:[#allocation2 + $0x78] sm:$0xe]  ;;  %7318 = vmatpush3.bf16.msra.mxu1 %v5601_v34  ;;  %v4477_v27 = vor.u32 %v4476_v40, %v4472_v63  ;;  %v3750_v23 = vld [vmem:[#allocation2 + $0x6c] sm:$0xe]  ;;  %v9697_v50 = vsel %vm2682_vm14, %v5296_v52, %v9640_v45  ;;  %v4982_v58 = vsel %vm1139_vm13, %v4977_v48, %v4981_v60  ;;  %vm5566_vm11 = vcmask 588800  }
 0x21d   : > { %4095 = vrot.lane.b32.xlu1 %v3994_v53, %s7749_s10  ;;  %v3688_v5 = vld [vmem:[#allocation2 + $0x78] sm:$0xe]  ;;  %v3977_v56 = vor.u32 %v3976_v6, %v3972_v39  ;;  %v3981_v51 = vrot.slane %v3979_v37, 1  ;;  %v3624_v7 = vld [vmem:[#allocation2 + $0x6c] sm:$0xe]  ;;  %7319 = vmatprep.subr.bf16.mxu1 %v7628_v16 }
 0x21e   : > { %5115 = vrot.lane.b32.xlu0 %v4994_v10, %s7760_s17  ;;  %v3650_v4 = vld [vmem:[#allocation2 + $0x7c] sm:$0xf]  ;;  %v9683_v29 = vld [vmem:[#allocation2 + $0x80] ss:$0 sps:$4 sm:$0x11]   ;;  %v4482_v45 = vsel %vm1139_vm13, %v4477_v27, %v4481_v9 }
 0x21f   : > { %v3712_v31 = vld [vmem:[#allocation2 + $0x7c] sm:$0xf]  ;;  %v9679_v22 = vcombine.low %v3649_v8, %v3650_v4  ;;  %v7123_v30 = vcombine.low %v3688_v5, %v3650_v4  ;;  %v9688_v59 = vld [vmem:[#allocation2 + $0x80] ss:$0 sps:$4 sm:$0x11]   ;;  %v5208_v19 = vrot.slane %v9683_v29, 1  ;;  %v3982_v10 = vsel %vm1139_vm13, %v3977_v56, %v3981_v51  ;;  %v9730_v27 = vpop.permute.xlu1 %4593 }
 0x220   : > { %v9681_v47 = vcombine.low %v3711_v38, %v3712_v31  ;;  %v7170_v2 = vcombine.low %v3751_v57, %v3712_v31  ;;  %v3647_v49 = vld [vmem:[#allocation2 + $0x6c] sm:$0xf]  ;;  %v9704_v44 = vpop.permute.xlu0 %4211  ;;  %7320 = vmatpush3.bf16.msra.mxu1 %v7628_v16  ;;  %v4699_v40 = vrot.slane %v9688_v59, 1 }
 0x221   : > { %4337 = vrot.lane.b32.xlu1 %v9679_v22, %s7751_s12  ;;  %v3648_v17 = vld [vmem:[#allocation2 + $0x70] sm:$0xf]  ;;  %v3709_v43 = vld [vmem:[#allocation2 + $0x6c] sm:$0xf]  ;;  %v4698_v53 = vrot.slane %v7123_v30, 1  ;;  %7321 = vmatprep.subr.bf16.mxu1 %v7632_v13  ;;  %v4510_v37 = vshll.u32 %v9679_v22, 16 }
 0x222   : > { %4847 = vrot.lane.b32.xlu0 %v9681_v47, %s7757_s11  ;;  %v3710_v42 = vld [vmem:[#allocation2 + $0x70] sm:$0xf]  ;;  %v5207_v24 = vrot.slane %v7170_v2, 1  ;;  %v3585_v46 = vld [vmem:[#allocation2 + $0x6c] sm:$0xf]  ;;  %v9711_v63 = vcombine.low %v3647_v49, %v3648_v17  ;;  %v5010_v30 = vshll.u32 %v9681_v47, 16 }
 0x223   : > { %v3586_v15 = vld [vmem:[#allocation2 + $0x70] sm:$0xf]  ;;  %v9707_v55 = vld [vmem:[#allocation2 + $0x74] ss:$0 sps:$4 sm:$0x11]   ;;  %v7169_v20 = vcombine.low %v3750_v23, %v3710_v42  ;;  %v9718_v38 = vcombine.low %v3709_v43, %v3710_v42  ;;  %v4512_v2 = vrot.slane %v4510_v37, 1  ;;  %v4700_v23 = vsel %vm1412_vm12, %v4698_v53, %v4699_v40 }
 0x224   : > { %v7075_v14 = vcombine.low %v3624_v7, %v3586_v15  ;;  %v9714_v8 = vld [vmem:[#allocation2 + $0x74] ss:$0 sps:$4 sm:$0x11]   ;;  %v5209_v16 = vsel %vm1412_vm12, %v5207_v24, %v5208_v19  ;;  %v9721_v39 = vcombine.low %v3585_v46, %v3586_v15  ;;  %v3687_v6 = vld [vmem:[#allocation2 + $0x6c] sm:$0xe]  ;;  %v5205_v5 = vrot.slane %v9707_v55, 1  ;;  %7322 = vmatpush3.bf16.msra.mxu1 %v7632_v13 }
 0x225   : > { %5113 = vrot.lane.b32.xlu1 %v4982_v58, %s7760_s17  ;;  %v7307_v60 = vpop.f32.mrf.mxu0  ;;  %v5204_v57 = vrot.slane %v7169_v20, 1  ;;  %v9726_v34 = vld [vmem:[#allocation2 + $0x74] ss:$0 sps:$4 sm:$0x11]   ;;  %v7122_v52 = vcombine.low %v3687_v6, %v3648_v17  ;;  %v4187_v48 = vrot.slane %v9714_v8, 1  ;;  %7323 = vmatprep.subr.bf16.mxu1 %v7634_v36  ;;  %v7636_v49 = vld [vmem:[%s10629_s3] sm:$0xff]   ;;  %v9737_v17 = vpop.permute.xlu0 %4719 }
 0x226   : > { %4603 = vrot.lane.b32.xlu0 %v4482_v45, %s7754_s15  ;;  %v2968_v9 = vadd.f32 %v9576_v33, %v7307_v60  ;;  %v4186_v31 = vrot.slane %v7075_v14, 1  ;;  %v4696_v13 = vrot.slane %v9726_v34, 1  ;;  %v4508_v24 = vshrl.u32 %v9679_v22, 16  ;;  %v9747_v20 = vld [vmem:[#allocation2 + $0x7c] sm:$0xf] }
 0x227   : > { %v2959_v4 = vpop.f32.mrf.mxu0  ;;  %v4695_v7 = vrot.slane %v7122_v52, 1  ;;  %v4515_v19 = vshll.u32 %v9688_v59, 16  ;;  %v5012_v43 = vrot.slane %v5010_v30, 1  ;;  %v5206_v53 = vsel %vm1412_vm12, %v5204_v57, %v5205_v5  ;;  %v9754_v60 = vld [vmem:[#allocation2 + $0x80] ss:$0 sps:$4 sm:$0x11]  }
 0x228   : > { %v3028_v56 = vmax.f32 %v2968_v9, 0.0  ;;  %v2960_v51 = vadd.f32 %v9576_v33, %v2959_v4  ;;  %v9750_v45 = vsel %vm1412_vm12, %v4186_v31, %v4187_v48  ;;  %v5008_v40 = vshrl.u32 %v9681_v47, 16  ;;  %7324 = vmatpush3.bf16.msra.mxu1 %v7634_v36  ;;  %v3587_v57 = vld [vmem:[#allocation2 + $0x78] sm:$0xf]  ;;  %v3532_v30 = vld [vmem:[#allocation2 + $0x90] sm:$0xf] }
 0x229   : > { %4093 = vrot.lane.b32.xlu1 %v3982_v10, %s7749_s10  ;;  %v7308_v42 = vpop.f32.mrf.mxu0  ;;  %v4513_v10 = vor.u32 %v4512_v2, %v4508_v24  ;;  %v5015_v22 = vshll.u32 %v9683_v29, 16  ;;  %v4697_v9 = vsel %vm1412_vm12, %v4695_v7, %v4696_v13  ;;  %7325 = vmatprep.subr.bf16.mxu1 %v7636_v49  ;;  %v4517_v47 = vrot.slane %v4515_v19, 1  ;;  %v9764_v2 = vpop.permute.xlu1 %4083 }
 0x22a   : > { %4335 = vrot.lane.b32.xlu0 %v9711_v63, %s7751_s12  ;;  %v7228_v15 = vpack.c.bf16 %v3028_v56, %v3028_v56  ;;  %v3026_v46 = vmax.f32 %v2960_v51, 0.0  ;;  %v2971_v58 = vadd.f32 %v9576_v33, %v7308_v42  ;;  %v5013_v52 = vor.u32 %v5012_v43, %v5008_v40  ;;  %v9766_v56 = vpop.permute.xlu0 %5103 }
 0x22b   : > { %v2962_v14 = vpop.f32.mrf.mxu0  ;;  %v9762_v29 = vcombine.low %v3587_v57, %v9747_v20  ;;  %v5017_v7 = vrot.slane %v5015_v22, 1  ;;  %v4015_v42 = vshll.u32 %v9754_v60, 16  ;;  %v3536_v57 = vld [vmem:[#allocation2 + $0x98] sm:$0x1] }
 0x22c   : > { %v3322_v59 = vshrl.u32 %v7228_v15, 16  ;;  %v7226_v6 = vpack.c.bf16 %v3026_v46, %v3026_v46  ;;  %v3029_v37 = vmax.f32 %v2971_v58, 0.0  ;;  %v2963_v5 = vadd.f32 %v9576_v33, %v2962_v14  ;;  %7326 = vmatpush3.bf16.msra.mxu1 %v7636_v49 }
 0x22d   : > { %4845 = vrot.lane.b32.xlu1 %v9718_v38, %s7757_s11  ;;  %v3325_v4 = vshll.u32 %v7228_v15, 16  ;;  %v3525_v15 = vld [vmem:[#allocation2 + $0x84] sm:$0xf]  ;;  %v4518_v58 = vsel %vm1139_vm13, %v4513_v10, %v4517_v47  ;;  %v5018_v14 = vsel %vm1139_vm13, %v5013_v52, %v5017_v7  ;;  %v4008_v40 = vshrl.u32 %v9762_v29, 16 }
 0x22e   : > { %5247 = vrot.lane.b32.xlu0 %v5209_v16, %s7759_s14  ;;  %v3324_v36 = vrot.slane %v3322_v59, 7  ;;  %v3305_v31 = vshrl.u32 %v7226_v6, 16  ;;  %v7229_v48 = vpack.c.bf16 %v3029_v37, %v3029_v37  ;;  %v3027_v51 = vmax.f32 %v2963_v5, 0.0 }
 0x22f   : > { %v4010_v16 = vshll.u32 %v9762_v29, 16  ;;  %v3308_v19 = vshll.u32 %v7226_v6, 16  ;;  %v4017_v47 = vrot.slane %v4015_v42, 1  ;;  %v4496_v7 = vshrl.u32 %v9711_v63, 16 }
 0x230   : > { %v3327_v13 = vor.u32 %v3325_v4, %v3324_v36  ;;  %v3307_v24 = vrot.slane %v3305_v31, 7  ;;  %v3330_v43 = vshrl.u32 %v7229_v48, 16  ;;  %v7227_v46 = vpack.c.bf16 %v3027_v51, %v3027_v51 }
 0x231   : > { %4737 = vrot.lane.b32.xlu1 %v4700_v23, %s7758_s13  ;;  %v3333_v6 = vshll.u32 %v7229_v48, 16  ;;  %v3328_v37 = vrot.slane %v3324_v36, 4  ;;  %v4012_v10 = vrot.slane %v4010_v16, 1 }
 0x232   : > { %5245 = vrot.lane.b32.xlu0 %v5206_v53, %s7759_s14  ;;  %v3533_v49 = vsel %vm9248_vm6, %v3327_v13, %v3532_v30  ;;  %v3310_v22 = vor.u32 %v3308_v19, %v3307_v24  ;;  %v3332_v59 = vrot.slane %v3330_v43, 7  ;;  %v3313_v23 = vshrl.u32 %v7227_v46, 16  ;;  %v3529_v13 = vld [vmem:[#allocation2 + $0x8c] sm:$0x1] }
 0x233   : > { %3534 = vst [vmem:[#allocation2 + $0x90] sm:$0xf] %v3533_v49  ;;  %v9777_v5 = vpop.permute.xlu1 %4325  ;;  %v4498_v30 = vshll.u32 %v9711_v63, 16  ;;  %v3311_v51 = vrot.slane %v3307_v24, 4  ;;  %v3316_v36 = vshll.u32 %v7227_v46, 16  ;;  %v4998_v24 = vshll.u32 %v9718_v38, 16 }
 0x234   : > { %v9779_v53 = vpop.permute.xlu0 %4835  ;;  %v3526_v52 = vsel %vm9248_vm6, %v3310_v22, %v3525_v15  ;;  %v3335_v4 = vor.u32 %v3333_v6, %v3332_v59  ;;  %v3337_v31 = vrot.slane %v3332_v59, 4  ;;  %v3315_v48 = vrot.slane %v3313_v23, 7 }
 0x235   : > { %3527 = vst [vmem:[#allocation2 + $0x84] sm:$0xf] %v3526_v52  ;;  %4225 = vrot.lane.b32.xlu1 %v9750_v45, %s7755_s16  ;;  %v4500_v19 = vrot.slane %v4498_v30, 1  ;;  %v4503_v63 = vshll.u32 %v9726_v34, 16  ;;  %v5000_v6 = vrot.slane %v4998_v24, 1  ;;  %v4003_v30 = vshll.u32 %v9714_v8, 16 }
 0x236   : > { %4735 = vrot.lane.b32.xlu0 %v4697_v9, %s7758_s13  ;;  %v3336_v16 = vsel %vm7898_vm10, %v3328_v37, %v3335_v4  ;;  %v3537_v42 = vsel %vm7847_vm3, %v3337_v31, %v3536_v57  ;;  %v3318_v43 = vor.u32 %v3316_v36, %v3315_v48  ;;  %v3320_v15 = vrot.slane %v3315_v48, 4 }
 0x237   : > { %3535 = vst.msk [vmem:[#allocation2 + $0x94] sm:$0xf] %vm10691_vm9, %v3336_v16  ;;  %3538 = vst [vmem:[#allocation2 + $0x98] sm:$0x1] %v3537_v42  ;;  %v4082_v45 = vpop.permute.xlu1 %4081  ;;  %v4013_v9 = vor.u32 %v4012_v10, %v4008_v40  ;;  %v4501_v59 = vor.u32 %v4500_v19, %v4496_v7  ;;  %v4996_v40 = vshrl.u32 %v9718_v38, 16  ;;  %v4190_v7 = vrot.slane %v9754_v60, 1 }
 0x238   : > { %v4592_v46 = vpop.permute.xlu0 %4591  ;;  %v5266_v49 = vsel %vm2550_vm1, %v9336_v25, %v4082_v45  ;;  %v3319_v37 = vsel %vm7898_vm10, %v3311_v51, %v3318_v43  ;;  %v3530_v57 = vsel %vm7847_vm3, %v3320_v15, %v3529_v13  ;;  %v3625_v51 = vld [vmem:[#allocation2 + $0x78] sm:$0xe]  ;;  %vm10693_vm9 = vmmov %vm10692_vm0 }
 0x239   : > { %v5360_v22 = vsel %vm2748_vm4, %v9697_v50, %v4592_v46  ;;  %v5298_v23 = vsel %vm2616_vm7, %v5266_v49, %v9699_v0  ;;  %4609 = vrot.lane.b32.xlu1 %v4518_v58, %s7754_s15  ;;  %3528 = vst.msk [vmem:[#allocation2 + $0x88] sm:$0xf] %vm10692_vm0, %v3319_v37  ;;  %3531 = vst [vmem:[#allocation2 + $0x8c] sm:$0x1] %v3530_v57  ;;  %v5003_v0 = vshll.u32 %v9707_v55, 16  ;;  %v4005_v46 = vrot.slane %v4003_v30, 1 }
 0x23a   : > { %v5393_v34 = vsel %vm5391_vm5, %v5360_v22, %v9737_v17  ;;  %v5330_v25 = vsel %vm2682_vm14, %v5298_v23, %v9636_v18  ;;  %5119 = vrot.lane.b32.xlu0 %v5018_v14, %s7760_s17  ;;  %v4505_v17 = vrot.slane %v4503_v63, 1  ;;  %v4018_v4 = vsel %vm1139_vm13, %v4013_v9, %v4017_v47  ;;  %v3653_v24 = vld [vmem:[#allocation2 + $0x90] sm:$0xf] }
 0x23b   : > { %v5426_v50 = vsel %vm5424_vm15, %v5393_v34, %v9623_v26  ;;  %v4834_v10 = vpop.permute.xlu1 %4833  ;;  %v5001_v31 = vor.u32 %v5000_v6, %v4996_v40  ;;  %v3998_v14 = vshll.u32 %v9721_v39, 16  ;;  %v5268_v26 = vsel %vm2550_vm1, %v9293_v61, %v9764_v2  ;;  %v3715_v22 = vld [vmem:[#allocation2 + $0x90] sm:$0xf] }
 0x23c   : > { %v4324_v52 = vpop.permute.xlu0 %4323  ;;  %v5459_v58 = vsel %vm5457_vm2, %v5426_v50, %v9766_v56  ;;  %v5362_v55 = vsel %vm2748_vm4, %v5330_v25, %v9730_v27  ;;  %v4506_v38 = vsel %vm1139_vm13, %v4501_v59, %v4505_v17  ;;  %v5005_v56 = vrot.slane %v5003_v0, 1  ;;  %v3752_v27 = vld [vmem:[#allocation2 + $0x84] sm:$0xe] }
 0x23d   : > { %v5492_v18 = vsel %vm5490_vm8, %v5459_v58, %v9673_v12  ;;  %4099 = vrot.lane.b32.xlu1 %v4018_v4, %s7749_s10  ;;  %v3996_v12 = vshrl.u32 %v9721_v39, 16  ;;  %v4000_v47 = vrot.slane %v3998_v14, 1  ;;  %v3713_v2 = vld [vmem:[#allocation2 + $0x84] sm:$0xf]  ;;  %v7076_v36 = vcombine.low %v3625_v51, %v9747_v20  ;;  %v9874_v14 = vld [vmem:[#allocation2 + $0x90] sm:$0xe] }
 0x23e   : > { %7327 = vmatprep.mubr.msk.bf16.mxu1 %vm5566_vm11, %v5492_v18  ;;  %4607 = vrot.lane.b32.xlu0 %v4506_v38, %s7754_s15  ;;  %v3626_v16 = vld [vmem:[#allocation2 + $0x84] sm:$0xe]  ;;  %v5395_v42 = vsel %vm5391_vm5, %v5362_v55, %v9669_v35  ;;  %v5006_v13 = vsel %vm1139_vm13, %v5001_v31, %v5005_v56  ;;  %v9842_v8 = vld [vmem:[#allocation2 + $0x94] sm:$0xf]  ;;  %v5300_v15 = vsel %vm2616_vm7, %v5268_v26, %v9704_v44 }
 0x23f   : > { %v9833_v48 = vpop.permute.xlu1 %4725  ;;  %v4001_v19 = vor.u32 %v4000_v47, %v3996_v12  ;;  %v9844_v43 = vld [vmem:[#allocation2 + $0x94] sm:$0xf]  ;;  %v3651_v60 = vld [vmem:[#allocation2 + $0x84] sm:$0xf]  ;;  %v9850_v59 = vsel %vm5424_vm15, %v5395_v42, %v4834_v10  ;;  %v9853_v6 = vsel %vm2682_vm14, %v5300_v15, %v4324_v52  ;;  %v4189_v57 = vrot.slane %v7076_v36, 1 }
 0x240   : > { %v9835_v61 = vpop.permute.xlu0 %5235  ;;  %v3714_v20 = vld [vmem:[#allocation2 + $0x88] sm:$0xf]  ;;  %v7625_v9 = vld [vmem:[#allocation2 + $0x8c] ss:$0 sps:$4 sm:$0x11]   ;;  %v9864_v25 = vcombine.low %v3653_v24, %v9842_v8  ;;  %v9872_v31 = vcombine.low %v3715_v22, %v9844_v43 }
 0x241   : > { %5117 = vrot.lane.b32.xlu1 %v5006_v13, %s7760_s17  ;;  %v3590_v45 = vld [vmem:[#allocation2 + $0x88] sm:$0xf]  ;;  %v7171_v63 = vcombine.low %v3752_v27, %v3714_v20  ;;  %v7139_v35 = vcombine.low %v3713_v2, %v3714_v20  ;;  %v9859_v23 = vld [vmem:[#allocation2 + $0x8c] ss:$0 sps:$4 sm:$0x11]   ;;  %v4006_v50 = vsel %vm1139_vm13, %v4001_v19, %v4005_v46  ;;  %v5211_v0 = vrot.slane %v7625_v9, 1 }
 0x242   : > { %v7077_v49 = vcombine.low %v3626_v16, %v3590_v45  ;;  %v9861_v34 = vld [vmem:[#allocation2 + $0x88] sm:$0xf]  ;;  %v3589_v10 = vld [vmem:[#allocation2 + $0x84] sm:$0xf]  ;;  %v4193_v38 = vrot.slane %v9859_v23, 1  ;;  %v5027_v27 = vshll.u32 %v7625_v9, 16  ;;  %v7125_v2 = vcombine.low %v9874_v14, %v9842_v8 }
 0x243   : > { %v9855_v37 = vpop.permute.xlu1 %4213  ;;  %v5210_v40 = vrot.slane %v7171_v63, 1  ;;  %v7092_v52 = vcombine.low %v3651_v60, %v9861_v34  ;;  %v9869_v4 = vcombine.low %v3589_v10, %v3590_v45  ;;  %v5022_v18 = vshll.u32 %v7139_v35, 16  ;;  %v9879_v56 = vld [vmem:[#allocation2 + $0x8c] ss:$0 sps:$4 sm:$0x11]  }
 0x244   : > { %v9857_v44 = vpop.permute.xlu0 %4215  ;;  %v4192_v58 = vrot.slane %v7077_v49, 1  ;;  %v5020_v30 = vshrl.u32 %v7139_v35, 16  ;;  %v4191_v13 = vsel %vm1412_vm12, %v4189_v57, %v4190_v7  ;;  %v4527_v60 = vshll.u32 %v9879_v56, 16 }
 0x245   : > { %4097 = vrot.lane.b32.xlu1 %v4006_v50, %s7749_s10  ;;  %v7311_v17 = vpop.f32.mrf.mxu0  ;;  %v5212_v55 = vsel %vm1412_vm12, %v5210_v40, %v5211_v0  ;;  %v4522_v12 = vshll.u32 %v7092_v52, 16  ;;  %v5024_v51 = vrot.slane %v5022_v18, 1  ;;  %v4520_v19 = vshrl.u32 %v7092_v52, 16  ;;  %v3689_v50 = vld [vmem:[#allocation2 + $0x84] sm:$0xe] }
 0x246   : > { %v2984_v26 = vadd.f32 %v9576_v33, %v7311_v17  ;;  %5249 = vrot.lane.b32.xlu0 %v5212_v55, %s7759_s14  ;;  %v4022_v46 = vshll.u32 %v9869_v4, 16  ;;  %v4194_v22 = vsel %vm1412_vm12, %v4192_v58, %v4193_v38  ;;  %v5029_v57 = vrot.slane %v5027_v27, 1 }
 0x247   : > { %v2975_v47 = vpop.f32.mrf.mxu0  ;;  %v9888_v24 = vpop.permute.xlu1 %4597  ;;  %v5025_v20 = vor.u32 %v5024_v51, %v5020_v30  ;;  %v4524_v45 = vrot.slane %v4522_v12, 1  ;;  %v7124_v0 = vcombine.low %v3689_v50, %v9861_v34  ;;  %v4027_v55 = vshll.u32 %v9859_v23, 16  ;;  %v3546_v34 = vld [vmem:[#allocation2 + $0xa8] sm:$0xf] }
 0x248   : > { %v3032_v36 = vmax.f32 %v2984_v26, 0.0  ;;  %v2976_v16 = vadd.f32 %v9576_v33, %v2975_v47  ;;  %v9885_v42 = vpop.permute.xlu0 %5233  ;;  %v4024_v40 = vrot.slane %v4022_v46, 1  ;;  %v4529_v47 = vrot.slane %v4527_v60, 1 }
 0x249   : > { %4849 = vrot.lane.b32.xlu1 %v7139_v35, %s7757_s11  ;;  %v7312_v15 = vpop.f32.mrf.mxu0  ;;  %v4020_v35 = vshrl.u32 %v9869_v4, 16  ;;  %v5030_v58 = vsel %vm1139_vm13, %v5025_v20, %v5029_v57  ;;  %v4525_v38 = vor.u32 %v4524_v45, %v4520_v19  ;;  %v4701_v46 = vrot.slane %v7124_v0, 1  ;;  %v3539_v20 = vld [vmem:[#allocation2 + $0x9c] sm:$0xf]  ;;  %v3550_v45 = vld [vmem:[#allocation2 + $0xb0] sm:$0x1] }
 0x24a   : > { %v7232_v9 = vpack.c.bf16 %v3032_v36, %v3032_v36  ;;  %v3030_v63 = vmax.f32 %v2976_v16, 0.0  ;;  %v2987_v49 = vadd.f32 %v9576_v33, %v7312_v15  ;;  %4227 = vrot.lane.b32.xlu0 %v4191_v13, %s7755_s16  ;;  %v4702_v19 = vrot.slane %v9879_v56, 1  ;;  %v9915_v0 = vld [vmem:[#allocation2 + $0x98] ss:$0 sps:$4 sm:$0x11]  }
 0x24b   : > { %v2978_v7 = vpop.f32.mrf.mxu0  ;;  %v9904_v13 = vpop.permute.xlu1 %4087  ;;  %v4025_v23 = vor.u32 %v4024_v40, %v4020_v35  ;;  %v4029_v50 = vrot.slane %v4027_v55, 1  ;;  %v4534_v55 = vshll.u32 %v9864_v25, 16 }
 0x24c   : > { %v3356_v10 = vshrl.u32 %v7232_v9, 16  ;;  %v7230_v17 = vpack.c.bf16 %v3030_v63, %v3030_v63  ;;  %v3033_v18 = vmax.f32 %v2987_v49, 0.0  ;;  %v9898_v26 = vpop.permute.xlu0 %4723  ;;  %v2979_v12 = vadd.f32 %v9576_v33, %v2978_v7 }
 0x24d   : > { %4229 = vrot.lane.b32.xlu1 %v4194_v22, %s7755_s16  ;;  %v3359_v51 = vshll.u32 %v7232_v9, 16  ;;  %v4530_v9 = vsel %vm1139_vm13, %v4525_v38, %v4529_v47  ;;  %v4532_v7 = vshrl.u32 %v9864_v25, 16 }
 0x24e   : > { %v3358_v30 = vrot.slane %v3356_v10, 7  ;;  %v3339_v27 = vshrl.u32 %v7230_v17, 16  ;;  %v7233_v36 = vpack.c.bf16 %v3033_v18, %v3033_v18  ;;  %v3342_v16 = vshll.u32 %v7230_v17, 16  ;;  %4339 = vrot.lane.b32.xlu0 %v7092_v52, %s7751_s12 }
 0x24f   : > { %v3031_v15 = vmax.f32 %v2979_v12, 0.0  ;;  %v4030_v18 = vsel %vm1139_vm13, %v4025_v23, %v4029_v50  ;;  %v9922_v12 = vld [vmem:[#allocation2 + $0x98] ss:$0 sps:$4 sm:$0x11]   ;;  %v3753_v50 = vld [vmem:[#allocation2 + $0x90] sm:$0xe] }
 0x250   : > { %v3361_v33 = vor.u32 %v3359_v51, %v3358_v30  ;;  %v3341_v63 = vrot.slane %v3339_v27, 7  ;;  %v3364_v49 = vshrl.u32 %v7233_v36, 16  ;;  %v9907_v22 = vpop.permute.xlu0 %5107  ;;  %v3367_v40 = vshll.u32 %v7233_v36, 16 }
 0x251   : > { %v7231_v60 = vpack.c.bf16 %v3031_v15, %v3031_v15  ;;  %5121 = vrot.lane.b32.xlu1 %v5030_v58, %s7760_s17  ;;  %v3362_v10 = vrot.slane %v3358_v30, 4  ;;  %v4703_v30 = vsel %vm1412_vm12, %v4701_v46, %v4702_v19 }
 0x252   : > { %v3547_v52 = vsel %vm9248_vm6, %v3361_v33, %v3546_v34  ;;  %v3344_v57 = vor.u32 %v3342_v16, %v3341_v63  ;;  %v3366_v35 = vrot.slane %v3364_v49, 7  ;;  %4611 = vrot.lane.b32.xlu0 %v4530_v9, %s7754_s15  ;;  %v4536_v34 = vrot.slane %v4534_v55, 1  ;;  %v3543_v49 = vld [vmem:[#allocation2 + $0xa4] sm:$0x1] }
 0x253   : > { %3548 = vst [vmem:[#allocation2 + $0xa8] sm:$0xf] %v3547_v52  ;;  %v3347_v56 = vshrl.u32 %v7231_v60, 16  ;;  %v9918_v17 = vpop.permute.xlu1 %4329  ;;  %v3350_v36 = vshll.u32 %v7231_v60, 16  ;;  %v5034_v16 = vshll.u32 %v9872_v31, 16  ;;  %v3345_v15 = vrot.slane %v3341_v63, 4 }
 0x254   : > { %v3540_v58 = vsel %vm9248_vm6, %v3344_v57, %v3539_v20  ;;  %v3369_v38 = vor.u32 %v3367_v40, %v3366_v35  ;;  %v3371_v47 = vrot.slane %v3366_v35, 4  ;;  %v9926_v51 = vpop.permute.xlu0 %4839  ;;  %v4539_v20 = vshll.u32 %v9915_v0, 16 }
 0x255   : > { %3541 = vst [vmem:[#allocation2 + $0x9c] sm:$0xf] %v3540_v58  ;;  %v3349_v27 = vrot.slane %v3347_v56, 7  ;;  %4101 = vrot.lane.b32.xlu1 %v4030_v18, %s7749_s10  ;;  %v5036_v9 = vrot.slane %v5034_v16, 1  ;;  %v5039_v63 = vshll.u32 %v9922_v12, 16  ;;  %v5032_v35 = vshrl.u32 %v9872_v31, 16 }
 0x256   : > { %v3370_v23 = vsel %vm7898_vm10, %v3362_v10, %v3369_v38  ;;  %v3551_v33 = vsel %vm7847_vm3, %v3371_v47, %v3550_v45  ;;  %4739 = vrot.lane.b32.xlu0 %v4703_v30, %s7758_s13  ;;  %v4537_v45 = vor.u32 %v4536_v34, %v4532_v7  ;;  %v7172_v40 = vcombine.low %v3753_v50, %v9844_v43  ;;  %v3592_v10 = vld [vmem:[#allocation2 + $0x94] sm:$0xf]  ;;  %v3591_v38 = vld [vmem:[#allocation2 + $0x90] sm:$0xf] }
 0x257   : > { %3549 = vst.msk [vmem:[#allocation2 + $0xac] sm:$0xf] %vm10693_vm9, %v3370_v23  ;;  %3552 = vst [vmem:[#allocation2 + $0xb0] sm:$0x1] %v3551_v33  ;;  %v3352_v46 = vor.u32 %v3350_v36, %v3349_v27  ;;  %v3354_v19 = vrot.slane %v3349_v27, 4  ;;  %v5106_v60 = vpop.permute.xlu1 %5105  ;;  %v4541_v7 = vrot.slane %v4539_v20, 1  ;;  %v5037_v58 = vor.u32 %v5036_v9, %v5032_v35 }
 0x258   : > { %v5461_v52 = vsel %vm5457_vm2, %v9850_v59, %v5106_v60  ;;  %v4596_v57 = vpop.permute.xlu0 %4595  ;;  %v3627_v47 = vld [vmem:[#allocation2 + $0x90] sm:$0xe]  ;;  %v5041_v30 = vrot.slane %v5039_v63, 1  ;;  %v9964_v27 = vcombine.low %v3591_v38, %v3592_v10  ;;  %vm10695_vm9 = vmmov %vm10692_vm0 }
 0x259   : > { %v3353_v56 = vsel %vm7898_vm10, %v3345_v15, %v3352_v46  ;;  %v3544_v18 = vsel %vm7847_vm3, %v3354_v19, %v3543_v49  ;;  %v5364_v55 = vsel %vm2748_vm4, %v9853_v6, %v4596_v57  ;;  %4341 = vrot.lane.b32.xlu1 %v9864_v25, %s7751_s12  ;;  %v5494_v59 = vsel %vm5490_vm8, %v5461_v52, %v9885_v42 }
 0x25a   : > { %3542 = vst.msk [vmem:[#allocation2 + $0xa0] sm:$0xf] %vm10692_vm0, %v3353_v56  ;;  %3545 = vst [vmem:[#allocation2 + $0xa4] sm:$0x1] %v3544_v18  ;;  %v5397_v43 = vsel %vm5391_vm5, %v5364_v55, %v9898_v26  ;;  %7328 = vmatmul.mubr.msk.bf16.vlgmr.msra.gmra.mxu1 %vm5566_vm11, %v5494_v59  ;;  %v4704_v6 = vrot.slane %v7125_v2, 1  ;;  %4851 = vrot.lane.b32.xlu0 %v9872_v31, %s7757_s11  ;;  %v7078_v36 = vcombine.low %v3627_v47, %v3592_v10 }
 0x25b   : > { %v5430_v25 = vsel %vm5424_vm15, %v5397_v43, %v9779_v53  ;;  %v4086_v42 = vpop.permute.xlu1 %4085  ;;  %v7647_v26 = vld [vmem:[#allocation2 + $0x98] ss:$0 sps:$4 sm:$0x11]   ;;  %v4542_v8 = vsel %vm1139_vm13, %v4537_v45, %v4541_v7  ;;  %v4705_v53 = vrot.slane %v9915_v0, 1  ;;  %v5213_v15 = vrot.slane %v7172_v40, 1 }
 0x25c   : > { %v5270_v34 = vsel %vm2550_vm1, %v9388_v28, %v4086_v42  ;;  %v9968_v16 = vpop.permute.xlu0 %4327  ;;  %v5463_v14 = vsel %vm5457_vm2, %v5430_v25, %v9907_v22  ;;  %v5214_v28 = vrot.slane %v9922_v12, 1  ;;  %v5042_v22 = vsel %vm1139_vm13, %v5037_v58, %v5041_v30  ;;  %v3754_v49 = vld [vmem:[#allocation2 + $0x9c] sm:$0xe]  ;;  %v3657_v63 = vld [vmem:[#allocation2 + $0xa8] sm:$0xf] }
 0x25d   : > { %v5302_v31 = vsel %vm2616_vm7, %v5270_v34, %v9855_v37  ;;  %4613 = vrot.lane.b32.xlu1 %v4542_v8, %s7754_s15  ;;  %v5496_v2 = vsel %vm5490_vm8, %v5463_v14, %v9835_v61  ;;  %v4034_v0 = vshll.u32 %v9964_v27, 16  ;;  %v3717_v61 = vld [vmem:[#allocation2 + $0x9c] sm:$0xf]  ;;  %v4195_v20 = vrot.slane %v7078_v36, 1  ;;  %v3719_v50 = vld [vmem:[#allocation2 + $0xa8] sm:$0xf] }
 0x25e   : > { %v5334_v23 = vsel %vm2682_vm14, %v5302_v31, %v9777_v5  ;;  %7331 = vmatprep.mubr.msk.bf16.mxu1 %vm5566_vm11, %v5496_v2  ;;  %5123 = vrot.lane.b32.xlu0 %v5042_v22, %s7760_s17  ;;  %v4196_v12 = vrot.slane %v7647_v26, 1  ;;  %v4039_v46 = vshll.u32 %v7647_v26, 16  ;;  %v9990_v19 = vld [vmem:[#allocation2 + $0xac] sm:$0xf]  ;;  %v4706_v60 = vsel %vm1412_vm12, %v4704_v6, %v4705_v53  ;;  %v3655_v40 = vld [vmem:[#allocation2 + $0x9c] sm:$0xf] }
 0x25f   : > { %v5366_v37 = vsel %vm2748_vm4, %v5334_v23, %v9888_v24  ;;  %v9988_v33 = vpop.permute.xlu1 %4837  ;;  %v4036_v9 = vrot.slane %v4034_v0, 1  ;;  %v9995_v52 = vld [vmem:[#allocation2 + $0xac] sm:$0xf]  ;;  %v10000_v24 = vsel %vm2550_vm1, %v9383_v3, %v9904_v13  ;;  %v5215_v57 = vsel %vm1412_vm12, %v5213_v15, %v5214_v28  ;;  %v3593_v3 = vld [vmem:[#allocation2 + $0x9c] sm:$0xf] }
 0x260   : > { %v9992_v5 = vpop.permute.xlu0 %5239  ;;  %v4032_v35 = vshrl.u32 %v9964_v27, 16  ;;  %v10007_v10 = vsel %vm5391_vm5, %v5366_v37, %v9833_v48  ;;  %v4041_v59 = vrot.slane %v4039_v46, 1  ;;  %v10011_v13 = vld [vmem:[#allocation2 + $0x9c] sm:$0xe]  ;;  %v4197_v6 = vsel %vm1412_vm12, %v4195_v20, %v4196_v12  ;;  %v7684_v42 = vld [vmem:[%s10628_s2] ss:$0 sm:$0xff] }
 0x261   : > { %4741 = vrot.lane.b32.xlu1 %v4706_v60, %s7758_s13  ;;  %v3718_v45 = vld [vmem:[#allocation2 + $0xa0] sm:$0xf]  ;;  %v7645_v18 = vld [vmem:[#allocation2 + $0xa4] ss:$0 sps:$4 sm:$0x11]   ;;  %v10020_v48 = vcombine.low %v3657_v63, %v9990_v19  ;;  %v10023_v25 = vcombine.low %v3719_v50, %v9995_v52 }
 0x262   : > { %v7141_v56 = vcombine.low %v3717_v61, %v3718_v45  ;;  %v7173_v55 = vcombine.low %v3754_v49, %v3718_v45  ;;  %v10009_v43 = vld [vmem:[#allocation2 + $0xa0] sm:$0xf]  ;;  %5251 = vrot.lane.b32.xlu0 %v5215_v57, %s7759_s14  ;;  %v7315_v7 = vpop.f32.mrf.mxu0  ;;  %v4037_v38 = vor.u32 %v4036_v9, %v4032_v35  ;;  %v5217_v34 = vrot.slane %v7645_v18, 1  ;;  %v10031_v14 = vld [vmem:[#allocation2 + $0xa4] ss:$0 sps:$4 sm:$0x11]  }
 0x263   : > { %v10014_v58 = vpop.permute.xlu1 %4729  ;;  %v10017_v47 = vld [vmem:[#allocation2 + $0xa0] sm:$0xf]  ;;  %v3000_v30 = vadd.f32 %v7684_v42, %v7315_v7  ;;  %v7094_v8 = vcombine.low %v3655_v40, %v10009_v43  ;;  %v5051_v2 = vshll.u32 %v7645_v18, 16  ;;  %v7126_v28 = vcombine.low %v10011_v13, %v10009_v43  ;;  %v10093_v13 = vld [vmem:[#allocation2 + $0xb0] ss:$0 sps:$4 sm:$0x11]  }
 0x264   : > { %v10028_v26 = vpop.permute.xlu0 %4219  ;;  %v5216_v36 = vrot.slane %v7173_v55, 1  ;;  %v2991_v53 = vpop.f32.mrf.mxu0  ;;  %v5046_v31 = vshll.u32 %v7141_v56, 16  ;;  %v10035_v15 = vcombine.low %v3593_v3, %v10017_v47  ;;  %v5044_v37 = vshrl.u32 %v7141_v56, 16  ;;  %v10049_v55 = vld [vmem:[#allocation2 + $0xa4] ss:$0 sps:$4 sm:$0x11]  }
 0x265   : > { %4853 = vrot.lane.b32.xlu1 %v7141_v56, %s7757_s11  ;;  %v3036_v23 = vmax.f32 %v3000_v30, 0.0  ;;  %v2992_v22 = vadd.f32 %v7684_v42, %v2991_v53  ;;  %v4042_v12 = vsel %vm1139_vm13, %v4037_v38, %v4041_v59  ;;  %v4051_v60 = vshll.u32 %v10031_v14, 16 }
 0x266   : > { %v5218_v0 = vsel %vm1412_vm12, %v5216_v36, %v5217_v34  ;;  %v7316_v61 = vpop.f32.mrf.mxu0  ;;  %v5048_v20 = vrot.slane %v5046_v31, 1  ;;  %v4046_v46 = vshll.u32 %v10035_v15, 16  ;;  %v5053_v45 = vrot.slane %v5051_v2, 1 }
 0x267   : > { %5253 = vrot.lane.b32.xlu0 %v5218_v0, %s7759_s14  ;;  %v10041_v49 = vpop.permute.xlu1 %4217  ;;  %v7236_v9 = vpack.c.bf16 %v3036_v23, %v3036_v23  ;;  %v3034_v63 = vmax.f32 %v2992_v22, 0.0  ;;  %v3003_v50 = vadd.f32 %v7684_v42, %v7316_v61  ;;  %v4044_v56 = vshrl.u32 %v10035_v15, 16 }
 0x268   : > { %v10046_v57 = vpop.permute.xlu0 %5237  ;;  %v2994_v35 = vpop.f32.mrf.mxu0  ;;  %v5049_v40 = vor.u32 %v5048_v20, %v5044_v37  ;;  %v4048_v18 = vrot.slane %v4046_v46, 1  ;;  %v4546_v3 = vshll.u32 %v7094_v8, 16  ;;  %v4544_v30 = vshrl.u32 %v7094_v8, 16  ;;  %v3560_v20 = vld [vmem:[#allocation2 + $0xc0] sm:$0xf] }
 0x269   : > { %v3390_v7 = vshrl.u32 %v7236_v9, 16  ;;  %v7234_v59 = vpack.c.bf16 %v3034_v63, %v3034_v63  ;;  %v3037_v38 = vmax.f32 %v3003_v50, 0.0  ;;  %v2995_v36 = vadd.f32 %v7684_v42, %v2994_v35 }
 0x26a   : > { %v5054_v34 = vsel %vm1139_vm13, %v5049_v40, %v5053_v45  ;;  %v4049_v31 = vor.u32 %v4048_v18, %v4044_v56  ;;  %v4548_v2 = vrot.slane %v4546_v3, 1  ;;  %v3393_v22 = vshll.u32 %v7236_v9, 16  ;;  %v3628_v56 = vld [vmem:[#allocation2 + $0x9c] sm:$0xe]  ;;  %v3553_v18 = vld [vmem:[#allocation2 + $0xb4] sm:$0xf] }
 0x26b   : > { %4231 = vrot.lane.b32.xlu0 %v4197_v6, %s7755_s16  ;;  %v10053_v53 = vpop.permute.xlu1 %4601  ;;  %v3392_v23 = vrot.slane %v3390_v7, 7  ;;  %v3373_v0 = vshrl.u32 %v7234_v59, 16  ;;  %v7237_v37 = vpack.c.bf16 %v3037_v38, %v3037_v38  ;;  %5125 = vrot.lane.b32.xlu1 %v5054_v34, %s7760_s17  ;;  %v3035_v46 = vmax.f32 %v2995_v36, 0.0 }
 0x26c   : > { %v10056_v61 = vpop.permute.xlu0 %4727  ;;  %v4053_v63 = vrot.slane %v4051_v60, 1  ;;  %v4549_v42 = vor.u32 %v4548_v2, %v4544_v30  ;;  %v4551_v50 = vshll.u32 %v10049_v55, 16  ;;  %v3376_v35 = vshll.u32 %v7234_v59, 16 }
 0x26d   : > { %v3395_v45 = vor.u32 %v3393_v22, %v3392_v23  ;;  %v3375_v6 = vrot.slane %v3373_v0, 7  ;;  %v3398_v40 = vshrl.u32 %v7237_v37, 16  ;;  %v7235_v3 = vpack.c.bf16 %v3035_v46, %v3035_v46 }
 0x26e   : > { %v4054_v7 = vsel %vm1139_vm13, %v4049_v31, %v4053_v63  ;;  %v4553_v38 = vrot.slane %v4551_v50, 1  ;;  %v7079_v36 = vcombine.low %v3628_v56, %v10017_v47  ;;  %v3401_v2 = vshll.u32 %v7237_v37, 16 }
 0x26f   : > { %4343 = vrot.lane.b32.xlu0 %v7094_v8, %s7751_s12  ;;  %v10060_v9 = vpop.permute.xlu1 %4091  ;;  %v3561_v60 = vsel %vm9248_vm6, %v3395_v45, %v3560_v20  ;;  %v3378_v30 = vor.u32 %v3376_v35, %v3375_v6  ;;  %v3400_v34 = vrot.slane %v3398_v40, 7  ;;  %4103 = vrot.lane.b32.xlu1 %v4042_v12, %s7749_s10  ;;  %v3396_v22 = vrot.slane %v3392_v23, 4  ;;  %v3564_v8 = vld [vmem:[#allocation2 + $0xc8] sm:$0x1] }
 0x270   : > { %v10067_v59 = vpop.permute.xlu0 %5111  ;;  %3562 = vst [vmem:[#allocation2 + $0xc0] sm:$0xf] %v3561_v60  ;;  %v3381_v0 = vshrl.u32 %v7235_v3, 16  ;;  %v3384_v46 = vshll.u32 %v7235_v3, 16  ;;  %v4554_v31 = vsel %vm1139_vm13, %v4549_v42, %v4553_v38  ;;  %v4198_v20 = vrot.slane %v7079_v36, 1 }
 0x271   : > { %v3554_v47 = vsel %vm9248_vm6, %v3378_v30, %v3553_v18  ;;  %v3403_v63 = vor.u32 %v3401_v2, %v3400_v34  ;;  %v3405_v50 = vrot.slane %v3400_v34, 4  ;;  %v10072_v45 = vld [vmem:[#allocation2 + $0xb0] ss:$0 sps:$4 sm:$0x11]   ;;  %v4199_v23 = vrot.slane %v10031_v14, 1  ;;  %vm10694_vm6 = vmmov %vm10692_vm0 }
 0x272   : > { %3555 = vst [vmem:[#allocation2 + $0xb4] sm:$0xf] %v3554_v47  ;;  %v3383_v37 = vrot.slane %v3381_v0, 7  ;;  %v4707_v42 = vrot.slane %v7126_v28, 1  ;;  %v4708_v54 = vrot.slane %v10049_v55, 1  ;;  %v5304_v35 = vsel %vm2616_vm7, %v10000_v24, %v9857_v44 }
 0x273   : > { %4615 = vrot.lane.b32.xlu0 %v4554_v31, %s7754_s15  ;;  %v10075_v12 = vpop.permute.xlu1 %4333  ;;  %v3404_v40 = vsel %vm7898_vm10, %v3396_v22, %v3403_v63  ;;  %v3565_v56 = vsel %vm7847_vm3, %v3405_v50, %v3564_v8  ;;  %v3557_v18 = vld [vmem:[#allocation2 + $0xbc] sm:$0x1]  ;;  %4105 = vrot.lane.b32.xlu1 %v4054_v7, %s7749_s10  ;;  %v4558_v43 = vshll.u32 %v10020_v48, 16  ;;  %v5336_v28 = vsel %vm2682_vm14, %v5304_v35, %v9968_v16  ;;  %v3755_v22 = vld [vmem:[#allocation2 + $0xa8] sm:$0xe] }
 0x274   : > { %v10090_v14 = vpop.permute.xlu0 %4843  ;;  %v3379_v55 = vrot.slane %v3375_v6, 4  ;;  %3563 = vst.msk [vmem:[#allocation2 + $0xc4] sm:$0xf] %vm10694_vm6, %v3404_v40  ;;  %3566 = vst [vmem:[#allocation2 + $0xc8] sm:$0x1] %v3565_v56  ;;  %v3386_v44 = vor.u32 %v3384_v46, %v3383_v37  ;;  %v3388_v24 = vrot.slane %v3383_v37, 4  ;;  %v5432_v3 = vsel %vm5424_vm15, %v10007_v10, %v9988_v33 }
 0x275   : > { %v4200_v7 = vsel %vm1412_vm12, %v4198_v20, %v4199_v23  ;;  %v4709_v38 = vsel %vm1412_vm12, %v4707_v42, %v4708_v54  ;;  %v5058_v36 = vshll.u32 %v10023_v25, 16  ;;  %v4560_v30 = vrot.slane %v4558_v43, 1  ;;  %v3692_v31 = vld [vmem:[#allocation2 + $0xa8] sm:$0xe] }
 0x276   : > { %v3387_v60 = vsel %vm7898_vm10, %v3379_v55, %v3386_v44  ;;  %v3558_v16 = vsel %vm7847_vm3, %v3388_v24, %v3557_v18  ;;  %v4563_v34 = vshll.u32 %v10072_v45, 16  ;;  %v5056_v41 = vshrl.u32 %v10023_v25, 16  ;;  %v3595_v35 = vld [vmem:[#allocation2 + $0xa8] sm:$0xf] }
 0x277   : > { %4743 = vrot.lane.b32.xlu0 %v4709_v38, %s7758_s13  ;;  %v5110_v6 = vpop.permute.xlu1 %5109  ;;  %3556 = vst.msk [vmem:[#allocation2 + $0xb8] sm:$0xf] %vm10695_vm9, %v3387_v60  ;;  %3559 = vst [vmem:[#allocation2 + $0xbc] sm:$0x1] %v3558_v16  ;;  %4233 = vrot.lane.b32.xlu1 %v4200_v7, %s7755_s16  ;;  %v5060_v2 = vrot.slane %v5058_v36, 1  ;;  %v5063_v1 = vshll.u32 %v10093_v13, 16  ;;  %v7174_v47 = vcombine.low %v3755_v22, %v9995_v52 }
 0x278   : > { %v5465_v33 = vsel %vm5457_vm2, %v5432_v3, %v5110_v6  ;;  %v4600_v10 = vpop.permute.xlu0 %4599  ;;  %v4556_v46 = vshrl.u32 %v10020_v48, 16  ;;  %v7127_v20 = vcombine.low %v3692_v31, %v9990_v19  ;;  %v4565_v42 = vrot.slane %v4563_v34, 1  ;;  %v3596_v19 = vld [vmem:[#allocation2 + $0xac] sm:$0xf] }
 0x279   : > { %v5368_v8 = vsel %vm2748_vm4, %v5336_v28, %v4600_v10  ;;  %v5498_v0 = vsel %vm5490_vm8, %v5465_v33, %v10046_v57  ;;  %v5061_v50 = vor.u32 %v5060_v2, %v5056_v41  ;;  %v5065_v54 = vrot.slane %v5063_v1, 1  ;;  %v3721_v43 = vld [vmem:[#allocation2 + $0xb4] sm:$0xf]  ;;  %v7665_v36 = vld [vmem:[#allocation2 + $0xb0] ss:$0 sps:$4 sm:$0x11]  }
 0x27a   : > { %v5401_v63 = vsel %vm5391_vm5, %v5368_v8, %v10056_v61  ;;  %7332 = vmatmul.mubr.msk.bf16.gmra.mxu1 %vm5566_vm11, %v5498_v0  ;;  %v4561_v23 = vor.u32 %v4560_v30, %v4556_v46  ;;  %v5219_v40 = vrot.slane %v7174_v47, 1  ;;  %v4711_v18 = vrot.slane %v10072_v45, 1  ;;  %v3756_v28 = vld [vmem:[#allocation2 + $0xb4] sm:$0xe] }
 0x27b   : > { %v5434_v37 = vsel %vm5424_vm15, %v5401_v63, %v9926_v51  ;;  %4855 = vrot.lane.b32.xlu0 %v10023_v25, %s7757_s11  ;;  %v4090_v57 = vpop.permute.xlu1 %4089  ;;  %4345 = vrot.lane.b32.xlu1 %v10020_v48, %s7751_s12  ;;  %v5220_v25 = vrot.slane %v10093_v13, 1  ;;  %v5066_v56 = vsel %vm1139_vm13, %v5061_v50, %v5065_v54  ;;  %v4710_v48 = vrot.slane %v7127_v20, 1  ;;  %v3659_v13 = vld [vmem:[#allocation2 + $0xb4] sm:$0xf] }
 0x27c   : > { %v10130_v52 = vpop.permute.xlu0 %4331  ;;  %v5467_v61 = vsel %vm5457_vm2, %v5434_v37, %v10067_v59  ;;  %v3629_v59 = vld [vmem:[#allocation2 + $0xa8] sm:$0xe]  ;;  %v4566_v55 = vsel %vm1139_vm13, %v4561_v23, %v4565_v42  ;;  %v10144_v24 = vcombine.low %v3595_v35, %v3596_v19  ;;  %v3597_v30 = vld [vmem:[#allocation2 + $0xb4] sm:$0xf]  ;;  %v4202_v37 = vrot.slane %v7665_v36, 1 }
 0x27d   : > { %v5500_v51 = vsel %vm5490_vm8, %v5467_v61, %v9992_v5  ;;  %v5221_v16 = vsel %vm1412_vm12, %v5219_v40, %v5220_v25  ;;  %v7080_v6 = vcombine.low %v3629_v59, %v3596_v19  ;;  %v4712_v1 = vsel %vm1412_vm12, %v4710_v48, %v4711_v18 }
 0x27e   : > { %7335 = vmatprep.mubr.msk.bf16.mxu1 %vm5566_vm11, %v5500_v51  ;;  %v3722_v5 = vld [vmem:[#allocation2 + $0xb8] sm:$0xf]  ;;  %v7662_v38 = vld [vmem:[#allocation2 + $0xbc] ss:$0 sps:$4 sm:$0x11]   ;;  %v4058_v8 = vshll.u32 %v10144_v24, 16  ;;  %v5274_v19 = vsel %vm2550_vm1, %v9490_v32, %v4090_v57 }
 0x27f   : > { %5127 = vrot.lane.b32.xlu0 %v5066_v56, %s7760_s17  ;;  %v10142_v44 = vpop.permute.xlu1 %4841  ;;  %4617 = vrot.lane.b32.xlu1 %v4566_v55, %s7754_s15  ;;  %v7143_v7 = vcombine.low %v3721_v43, %v3722_v5  ;;  %v7175_v45 = vcombine.low %v3756_v28, %v3722_v5  ;;  %v10149_v60 = vld [vmem:[#allocation2 + $0xb8] sm:$0xf]  ;;  %v5223_v10 = vrot.slane %v7662_v38, 1  ;;  %v5075_v63 = vshll.u32 %v7662_v38, 16 }
 0x280   : > { %v10147_v3 = vpop.permute.xlu0 %5243  ;;  %v10152_v34 = vld [vmem:[#allocation2 + $0xb8] sm:$0xf]  ;;  %v7096_v2 = vcombine.low %v3659_v13, %v10149_v60  ;;  %v4201_v20 = vrot.slane %v7080_v6, 1  ;;  %v4060_v54 = vrot.slane %v4058_v8, 1  ;;  %v4056_v56 = vshrl.u32 %v10144_v24, 16 }
 0x281   : > { %v5222_v33 = vrot.slane %v7175_v45, 1  ;;  %v5070_v41 = vshll.u32 %v7143_v7, 16  ;;  %v10161_v0 = vcombine.low %v3597_v30, %v10152_v34  ;;  %v5068_v47 = vshrl.u32 %v7143_v7, 16  ;;  %v7670_v40 = vld [vmem:[#allocation2 + $0xbc] ss:$0 sps:$4 sm:$0x11]  }
 0x282   : > { %v4570_v23 = vshll.u32 %v7096_v2, 16  ;;  %v5077_v25 = vrot.slane %v5075_v63, 1  ;;  %v4063_v48 = vshll.u32 %v7665_v36, 16  ;;  %v7669_v18 = vld [vmem:[#allocation2 + $0xbc] ss:$0 sps:$4 sm:$0x11]   ;;  %v4203_v43 = vsel %vm1412_vm12, %v4201_v20, %v4202_v37 }
 0x283   : > { %5255 = vrot.lane.b32.xlu0 %v5221_v16, %s7759_s14  ;;  %v10157_v22 = vpop.permute.xlu1 %4733  ;;  %4745 = vrot.lane.b32.xlu1 %v4712_v1, %s7758_s13  ;;  %v5072_v31 = vrot.slane %v5070_v41, 1  ;;  %v5224_v50 = vsel %vm1412_vm12, %v5222_v33, %v5223_v10  ;;  %v4070_v35 = vshll.u32 %v10161_v0, 16  ;;  %v5306_v59 = vsel %vm2616_vm7, %v5274_v19, %v10041_v49  ;;  %v10184_v13 = vld [vmem:[#allocation2 + $0xc4] sm:$0xf]  ;;  %v3723_v16 = vld [vmem:[#allocation2 + $0xc0] sm:$0xf] }
 0x284   : > { %v10164_v46 = vpop.permute.xlu0 %4223  ;;  %v4572_v28 = vrot.slane %v4570_v23, 1  ;;  %v4061_v57 = vor.u32 %v4060_v54, %v4056_v56  ;;  %v4568_v38 = vshrl.u32 %v7096_v2, 16  ;;  %v4575_v45 = vshll.u32 %v7670_v40, 16  ;;  %v10189_v36 = vld [vmem:[#allocation2 + $0xc4] sm:$0xf] }
 0x285   : > { %v5073_v42 = vor.u32 %v5072_v31, %v5068_v47  ;;  %v4072_v5 = vrot.slane %v4070_v35, 1  ;;  %v4065_v49 = vrot.slane %v4063_v48, 1  ;;  %v4068_v6 = vshrl.u32 %v10161_v0, 16  ;;  %v3693_v33 = vld [vmem:[#allocation2 + $0xb4] sm:$0xe] }
 0x286   : > { %v4075_v30 = vshll.u32 %v7669_v18, 16  ;;  %v5338_v10 = vsel %vm2682_vm14, %v5306_v59, %v9918_v17  ;;  %v4573_v41 = vor.u32 %v4572_v28, %v4568_v38  ;;  %v3630_v1 = vld [vmem:[#allocation2 + $0xb4] sm:$0xe]  ;;  %v7128_v8 = vcombine.low %v3693_v33, %v10149_v60  ;;  %v3661_v31 = vld [vmem:[#allocation2 + $0xc0] sm:$0xf] }
 0x287   : > { %5257 = vrot.lane.b32.xlu0 %v5224_v50, %s7759_s14  ;;  %v10168_v61 = vpop.permute.xlu1 %4221  ;;  %4857 = vrot.lane.b32.xlu1 %v7143_v7, %s7757_s11  ;;  %v5078_v55 = vsel %vm1139_vm13, %v5073_v42, %v5077_v25  ;;  %v7144_v47 = vcombine.low %v3723_v16, %v10184_v13  ;;  %v4066_v63 = vsel %vm1139_vm13, %v4061_v57, %v4065_v49  ;;  %v4577_v42 = vrot.slane %v4575_v45, 1  ;;  %v3725_v56 = vld [vmem:[#allocation2 + $0xcc] sm:$0xf]  ;;  %v7675_v38 = vld [vmem:[#allocation2 + $0xc8] ss:$0 sps:$4 sm:$0x11]  }
 0x288   : > { %v10174_v51 = vpop.permute.xlu0 %5241  ;;  %v4073_v20 = vor.u32 %v4072_v5, %v4068_v6  ;;  %v7081_v37 = vcombine.low %v3630_v1, %v10152_v34  ;;  %v7097_v23 = vcombine.low %v3661_v31, %v10189_v36  ;;  %v5370_v60 = vsel %vm2748_vm4, %v5338_v10, %v10053_v53  ;;  %v7676_v5 = vld [vmem:[#allocation2 + $0xc8] ss:$0 sps:$4 sm:$0x11]  }
 0x289   : > { %v4077_v54 = vrot.slane %v4075_v30, 1  ;;  %v4578_v35 = vsel %vm1139_vm13, %v4573_v41, %v4577_v42  ;;  %v4713_v19 = vrot.slane %v7128_v8, 1  ;;  %v4714_v25 = vrot.slane %v7670_v40, 1 }
 0x28a   : > { %v4205_v28 = vrot.slane %v7669_v18, 1  ;;  %v4582_v59 = vshll.u32 %v7097_v23, 16  ;;  %v5276_v53 = vsel %vm2550_vm1, %v9468_v62, %v10060_v9  ;;  %v5403_v40 = vsel %vm5391_vm5, %v5370_v60, %v10014_v58 }
 0x28b   : > { %4235 = vrot.lane.b32.xlu0 %v4203_v43, %s7755_s16  ;;  %v10182_v32 = vpop.permute.xlu1 %4605  ;;  %5129 = vrot.lane.b32.xlu1 %v5078_v55, %s7760_s17  ;;  %v4078_v48 = vsel %vm1139_vm13, %v4073_v20, %v4077_v54  ;;  %v4204_v43 = vrot.slane %v7081_v37, 1  ;;  %v10210_v55 = vld [vmem:[#allocation2 + $0xd0] sm:$0xf]  ;;  %v4715_v45 = vsel %vm1412_vm12, %v4713_v19, %v4714_v25  ;;  %v5308_v49 = vsel %vm2616_vm7, %v5276_v53, %v10028_v26  ;;  %v3694_v37 = vld [vmem:[#allocation2 + $0xc0] sm:$0xe] }
 0x28c   : > { %v10187_v7 = vpop.permute.xlu0 %4731  ;;  %v10222_v18 = vcombine.low %v3725_v56, %v10210_v55  ;;  %v5436_v62 = vsel %vm5424_vm15, %v5403_v40, %v10142_v44  ;;  %v4584_v6 = vrot.slane %v4582_v59, 1  ;;  %v5340_v30 = vsel %vm2682_vm14, %v5308_v49, %v10130_v52 }
 0x28d   : > { %v4206_v58 = vsel %vm1412_vm12, %v4204_v43, %v4205_v28  ;;  %v5080_v41 = vshrl.u32 %v7144_v47, 16  ;;  %v5087_v1 = vshll.u32 %v7676_v5, 16  ;;  %v4580_v8 = vshrl.u32 %v7097_v23, 16 }
 0x28e   : > { %v4587_v31 = vshll.u32 %v7675_v38, 16  ;;  %v5226_v43 = vrot.slane %v7676_v5, 1  ;;  %v4717_v28 = vrot.slane %v7675_v38, 1  ;;  %v5092_v59 = vshrl.u32 %v10222_v18, 16 }
 0x28f   : > { %4347 = vrot.lane.b32.xlu0 %v7096_v2, %s7751_s12  ;;  %v10198_v50 = vpop.permute.xlu1 %4095  ;;  %4107 = vrot.lane.b32.xlu1 %v4066_v63, %s7749_s10  ;;  %v5082_v2 = vshll.u32 %v7144_v47, 16  ;;  %v3757_v63 = vld [vmem:[#allocation2 + $0xc0] sm:$0xe]  ;;  %v5089_v25 = vrot.slane %v5087_v1, 1  ;;  %vm10696_vm3 = vcmask 1041408   ;;  %vm6686_vm0 = vcmask 1046534  }
 0x290   : > { %v5116_v17 = vpop.permute.xlu0 %5115  ;;  %v7176_v42 = vcombine.low %v3757_v63, %v10184_v13  ;;  %v4589_v56 = vrot.slane %v4587_v31, 1  ;;  %v7680_v13 = vld [vmem:[#allocation2 + $0xd4] ss:$0 sps:$4 sm:$0x11]   ;;  %vm10698_vm10 = vmmov %vm10696_vm3  ;;  %vm6688_vm6 = vcmask 1047559  }
 0x291   : > { %v5084_v16 = vrot.slane %v5082_v2, 1  ;;  %v5099_v40 = vshll.u32 %v7680_v13, 16 }
 0x293   : > { %4619 = vrot.lane.b32.xlu0 %v4578_v35, %s7754_s15  ;;  %v10208_v34 = vpop.permute.xlu1 %4337  ;;  %4109 = vrot.lane.b32.xlu1 %v4078_v48, %s7749_s10  ;;  %v5085_v52 = vor.u32 %v5084_v16, %v5080_v41  ;;  %v4585_v35 = vor.u32 %v4584_v6, %v4580_v8  ;;  %v5094_v48 = vshll.u32 %v10222_v18, 16  ;;  %v3758_v16 = vld [vmem:[#allocation2 + $0xcc] sm:$0xe] }
 0x294   : > { %v10218_v57 = vpop.permute.xlu0 %4847  ;;  %v7177_v6 = vcombine.low %v3758_v16, %v10210_v55  ;;  %v5280_v55 = vsel %vm2550_vm1, %v9570_v21, %v10198_v50 }
 0x295   : > { %v5096_v53 = vrot.slane %v5094_v48, 1  ;;  %v5312_v31 = vsel %vm2616_vm7, %v5280_v55, %v10164_v46 }
 0x296   : > { %v5228_v1 = vrot.slane %v7177_v6, 1 }
 0x297   : > { %4747 = vrot.lane.b32.xlu0 %v4715_v45, %s7758_s13  ;;  %v5114_v9 = vpop.permute.xlu1 %5113  ;;  %4237 = vrot.lane.b32.xlu1 %v4206_v58, %s7755_s16  ;;  %v5097_v58 = vor.u32 %v5096_v53, %v5092_v59  ;;  %s215_s16 = sand.u32 1, %s7738_s19  }
 0x298   : > { %v5469_v33 = vsel %vm5457_vm2, %v5436_v62, %v5114_v9  ;;  %v4604_v10 = vpop.permute.xlu0 %4603  ;;  %v5101_v9 = vrot.slane %v5099_v40, 1  ;;  %s10585_s22 = scalar_lea.sflag [#allocation4], %s215_s16 }
 0x299   : > { %v5372_v26 = vsel %vm2748_vm4, %v5340_v30, %v4604_v10  ;;  %v5502_v44 = vsel %vm5490_vm8, %v5469_v33, %v10174_v51  ;;  %v7129_v51 = vcombine.low %v3694_v37, %v10189_v36  ;;  %v4590_v36 = vsel %vm1139_vm13, %v4585_v35, %v4589_v56 }
 0x29a   : > { %v5405_v20 = vsel %vm5391_vm5, %v5372_v26, %v10187_v7  ;;  %7336 = vmatmul.mubr.msk.bf16.gmra.mxu1 %vm5566_vm11, %v5502_v44  ;;  %v5102_v41 = vsel %vm1139_vm13, %v5097_v58, %v5101_v9  ;;  %v5229_v26 = vrot.slane %v7680_v13, 1 }
 0x29b   : > { %v5438_v60 = vsel %vm5424_vm15, %v5405_v20, %v10090_v14  ;;  %4859 = vrot.lane.b32.xlu0 %v7144_v47, %s7757_s11  ;;  %v4094_v54 = vpop.permute.xlu1 %4093  ;;  %4349 = vrot.lane.b32.xlu1 %v7097_v23, %s7751_s12  ;;  %v5090_v14 = vsel %vm1139_vm13, %v5085_v52, %v5089_v25  ;;  %v5225_v47 = vrot.slane %v7176_v42, 1  ;;  %vm6676_vm13 = vcmask 1041409   ;;  %s7692_s12 = scalar_lea.vmem %s7691_s7, 2048 }
 0x29c   : > { %v4336_v19 = vpop.permute.xlu0 %4335  ;;  %v5471_v7 = vsel %vm5457_vm2, %v5438_v60, %v5116_v17  ;;  %v4716_v17 = vrot.slane %v7129_v51, 1  ;;  %v5278_v62 = vsel %vm2550_vm1, %v9594_v11, %v4094_v54 }
 0x29d   : > { %v5504_v2 = vsel %vm5490_vm8, %v5471_v7, %v10147_v3  ;;  %v5227_v45 = vsel %vm1412_vm12, %v5225_v47, %v5226_v43  ;;  %v5310_v30 = vsel %vm2616_vm7, %v5278_v62, %v10168_v61  ;;  %v5344_v20 = vsel %vm2682_vm14, %v5312_v31, %v4336_v19 }
 0x29e   : > { %7339 = vmatprep.mubr.msk.bf16.mxu1 %vm5566_vm11, %v5504_v2  ;;  %v4718_v49 = vsel %vm1412_vm12, %v4716_v17, %v4717_v28  ;;  %v5342_v11 = vsel %vm2682_vm14, %v5310_v30, %v10075_v12 }
 0x29f   : > { %5131 = vrot.lane.b32.xlu0 %v5090_v14, %s7760_s17  ;;  %v4846_v23 = vpop.permute.xlu1 %4845  ;;  %4621 = vrot.lane.b32.xlu1 %v4590_v36, %s7754_s15  ;;  %v5374_v8 = vsel %vm2748_vm4, %v5342_v11, %v10182_v32 }
 0x2a0   : > { %v5248_v3 = vpop.permute.xlu0 %5247  ;;  %v5407_v12 = vsel %vm5391_vm5, %v5374_v8, %v10157_v22 }
 0x2a1   : > { %v5440_v32 = vsel %vm5424_vm15, %v5407_v12, %v4846_v23 }
 0x2a3   : > { %5259 = vrot.lane.b32.xlu0 %v5227_v45, %s7759_s14  ;;  %v4738_v5 = vpop.permute.xlu1 %4737  ;;  %4749 = vrot.lane.b32.xlu1 %v4718_v49, %s7758_s13 }
 0x2a4   : > { %v5246_v38 = vpop.permute.xlu0 %5245 }
 0x2a7   : > { %v4226_v33 = vpop.permute.xlu1 %4225  ;;  %4861 = vrot.lane.b32.xlu1 %v10222_v18, %s7757_s11  ;;  %v5230_v18 = vsel %vm1412_vm12, %v5228_v1, %v5229_v26  ;;  %vm10699_vm12 = vmmov %vm10696_vm3  ;;  %s6835_s11 = sshll.u32 %s215_s16, 6 }
 0x2a8   : > { %v4736_v10 = vpop.permute.xlu0 %4735  ;;  %s10400_s13 = scalar_lea.vmem [#allocation3], %s6835_s11 }
 0x2a9   : > { %s6769_s9 = sshll.u32 %s10400_s13, 4  ;;  %s10579_s9 = int_to_ptr.vmem [resolvable:$true] %s6769_s9 }
 0x2aa   : > { %s7686_s30 = scalar_lea.vmem %s10579_s9, 1024  ;;  %p7693_p0 = scmp.lt.s32.totalorder %s10579_s9, %s7691_s7 }
 0x2ab   : > { %v4610_v44 = vpop.permute.xlu1 %4609  ;;  %5133 = vrot.lane.b32.xlu1 %v5102_v41, %s7760_s17  ;;  %p7687_p11 = scmp.ne.s32.totalorder %s10579_s9, %s7686_s30  ;;  %p7694_p1 = scmp.lt.s32.totalorder %s7692_s12, %s7686_s30 }
 0x2ac   : > { %v5120_v61 = vpop.permute.xlu0 %5119 }
 0x2ad   : > { %p7688_p12 = pnand %p7687_p11, %p7832_p5  ;;  %p7695_p2 = por %p7694_p1, %p7693_p0 }
 0x2af   : > { %v4100_v63 = vpop.permute.xlu1 %4099  ;;  %5261 = vrot.lane.b32.xlu1 %v5230_v18, %s7759_s14  ;;  %p7689_p13 = pneg %p7688_p12 }
 0x2b0   : > { %v4608_v21 = vpop.permute.xlu0 %4607  ;;  %v5284_v59 = vsel %vm2550_vm1, %v9762_v29, %v4100_v63 }
 0x2b1   : > { %v5376_v50 = vsel %vm2748_vm4, %v5344_v20, %v4608_v21  ;;  %p7696_p3 = pnand %p7695_p2, %p7689_p13 }
 0x2b2   : > { %v5409_v52 = vsel %vm5391_vm5, %v5376_v50, %v4736_v10 }
 0x2b3   : > { %v5442_v37 = vsel %vm5424_vm15, %v5409_v52, %v10218_v57  ;;  %v5118_v42 = vpop.permute.xlu1 %5117 }
 0x2b4   : > { %v5473_v46 = vsel %vm5457_vm2, %v5440_v32, %v5118_v42  ;;  %v5475_v60 = vsel %vm5457_vm2, %v5442_v37, %v5120_v61 }
 0x2b5   : > { %v5506_v54 = vsel %vm5490_vm8, %v5473_v46, %v5246_v38  ;;  %v5508_v22 = vsel %vm5490_vm8, %v5475_v60, %v5248_v3 }
 0x2b6   : > { %7340 = vmatmul.mubr.msk.bf16.gmra.mxu1 %vm5566_vm11, %v5506_v54 }
 0x2b7   : > { %v4098_v35 = vpop.permute.xlu1 %4097  ;;  %7343 = vmatprep.mubr.msk.bf16.mxu1 %vm5566_vm11, %v5508_v22 }
 0x2b8   : > { %v5282_v51 = vsel %vm2550_vm1, %v9721_v39, %v4098_v35  ;;  %v5250_v57 = vpop.permute.xlu0 %5249 }
 0x2b9   : > { %v5314_v19 = vsel %vm2616_vm7, %v5282_v51, %v4226_v33 }
 0x2ba   : > { %v5346_v7 = vsel %vm2682_vm14, %v5314_v19, %v10208_v34 }
 0x2bb   : > { %v4850_v25 = vpop.permute.xlu1 %4849  ;;  %v5378_v2 = vsel %vm2748_vm4, %v5346_v7, %v4610_v44 }
 0x2bc   : > { %v4228_v56 = vpop.permute.xlu0 %4227  ;;  %v5411_v48 = vsel %vm5391_vm5, %v5378_v2, %v4738_v5 }
 0x2bd   : > { %v5444_v47 = vsel %vm5424_vm15, %v5411_v48, %v4850_v25  ;;  %v5316_v40 = vsel %vm2616_vm7, %v5284_v59, %v4228_v56 }
 0x2bf   : > { %v4230_v13 = vpop.permute.xlu1 %4229 }
 0x2c0   : > { %v4340_v14 = vpop.permute.xlu0 %4339 }
 0x2c1   : > { %v5348_v45 = vsel %vm2682_vm14, %v5316_v40, %v4340_v14 }
 0x2c3   : > { %v5122_v43 = vpop.permute.xlu1 %5121 }
 0x2c4   : > { %v5477_v36 = vsel %vm5457_vm2, %v5444_v47, %v5122_v43  ;;  %v4612_v39 = vpop.permute.xlu0 %4611 }
 0x2c5   : > { %v5510_v23 = vsel %vm5490_vm8, %v5477_v36, %v5250_v57  ;;  %v5380_v49 = vsel %vm2748_vm4, %v5348_v45, %v4612_v39 }
 0x2c6   : > { %7344 = vmatmul.mubr.msk.bf16.gmra.mxu1 %vm5566_vm11, %v5510_v23 }
 0x2c7   : > { %v4102_v17 = vpop.permute.xlu1 %4101 }
 0x2c8   : > { %v4740_v34 = vpop.permute.xlu0 %4739  ;;  %v5286_v29 = vsel %vm2550_vm1, %v9869_v4, %v4102_v17 }
 0x2c9   : > { %v5413_v5 = vsel %vm5391_vm5, %v5380_v49, %v4740_v34  ;;  %v5318_v10 = vsel %vm2616_vm7, %v5286_v29, %v4230_v13 }
 0x2cb   : > { %v4342_v28 = vpop.permute.xlu1 %4341 }
 0x2cc   : > { %v4852_v3 = vpop.permute.xlu0 %4851  ;;  %v5350_v41 = vsel %vm2682_vm14, %v5318_v10, %v4342_v28  ;;  %v5832_v10 = vlaneseq }
 0x2cd   : > { %v5446_v38 = vsel %vm5424_vm15, %v5413_v5, %v4852_v3 }
 0x2cf   : > { %v4614_v53 = vpop.permute.xlu1 %4613 }
 0x2d0   : > { %v5124_v16 = vpop.permute.xlu0 %5123  ;;  %v5382_v1 = vsel %vm2748_vm4, %v5350_v41, %v4614_v53  ;;  %v10358_v41 = vld [vmem:[%s10630_s4] ss:$0 sm:$0xff] }
 0x2d1   : > { %v5479_v58 = vsel %vm5457_vm2, %v5446_v38, %v5124_v16 }
 0x2d3   : > { %v4742_v62 = vpop.permute.xlu1 %4741 }
 0x2d4   : > { %v5252_v9 = vpop.permute.xlu0 %5251  ;;  %v5415_v26 = vsel %vm5391_vm5, %v5382_v1, %v4742_v62 }
 0x2d5   : > { %v5512_v6 = vsel %vm5490_vm8, %v5479_v58, %v5252_v9 }
 0x2d6   : > { %7347 = vmatprep.mubr.msk.bf16.mxu1 %vm5566_vm11, %v5512_v6 }
 0x2d7   : > { %v4854_v30 = vpop.permute.xlu1 %4853 }
 0x2d8   : > { %v5448_v44 = vsel %vm5424_vm15, %v5415_v26, %v4854_v30  ;;  %v7761_v30 = vmov 1983009808  }
 0x2d9   : > { %v5254_v33 = vpop.permute.xlu0 %5253 }
 0x2dd   : > { %v4232_v11 = vpop.permute.xlu0 %4231  ;;  %v5126_v55 = vpop.permute.xlu1 %5125 }
 0x2de   : > { %v5481_v61 = vsel %vm5457_vm2, %v5448_v44, %v5126_v55  ;;  %v5833_v44 = vshrl.u32 %v5832_v10, 7 }
 0x2df   : > { %v5514_v4 = vsel %vm5490_vm8, %v5481_v61, %v5254_v33  ;;  %v5830_v33 = vunpack.c.l.s4 %v7761_v30 }
 0x2e0   : > { %7348 = vmatmul.mubr.msk.bf16.gmra.mxu1 %vm5566_vm11, %v5514_v4 }
 0x2e1   : > { %v4344_v8 = vpop.permute.xlu0 %4343  ;;  %v4104_v18 = vpop.permute.xlu1 %4103 }
 0x2e2   : > { %v5288_v20 = vsel %vm2550_vm1, %v9964_v27, %v4104_v18 }
 0x2e3   : > { %v5320_v50 = vsel %vm2616_vm7, %v5288_v20, %v4232_v11  ;;  %v5831_v11 = vunpack.c.0.s8 %v5830_v33 }
 0x2e4   : > { %v5352_v37 = vsel %vm2682_vm14, %v5320_v50, %v4344_v8 }
 0x2e5   : > { %v4616_v31 = vpop.permute.xlu0 %4615  ;;  %v4106_v63 = vpop.permute.xlu1 %4105  ;;  %v10366_v20 = vsub.s32 %v5831_v11, %v5833_v44 }
 0x2e6   : > { %v5384_v46 = vsel %vm2748_vm4, %v5352_v37, %v4616_v31  ;;  %v5290_v57 = vsel %vm2550_vm1, %v10035_v15, %v4106_v63 }
 0x2e9   : > { %v4744_v12 = vpop.permute.xlu0 %4743  ;;  %v4234_v21 = vpop.permute.xlu1 %4233 }
 0x2ea   : > { %v5417_v54 = vsel %vm5391_vm5, %v5384_v46, %v4744_v12  ;;  %v5322_v25 = vsel %vm2616_vm7, %v5290_v57, %v4234_v21 }
 0x2ed   : > { %v4856_v52 = vpop.permute.xlu0 %4855  ;;  %v4346_v32 = vpop.permute.xlu1 %4345 }
 0x2ee   : > { %v5450_v22 = vsel %vm5424_vm15, %v5417_v54, %v4856_v52  ;;  %v5354_v56 = vsel %vm2682_vm14, %v5322_v25, %v4346_v32 }
 0x2f1   : > { %v5128_v42 = vpop.permute.xlu0 %5127  ;;  %v4618_v60 = vpop.permute.xlu1 %4617 }
 0x2f2   : > { %v5483_v35 = vsel %vm5457_vm2, %v5450_v22, %v5128_v42  ;;  %v5386_v13 = vsel %vm2748_vm4, %v5354_v56, %v4618_v60 }
 0x2f5   : > { %v5256_v51 = vpop.permute.xlu0 %5255  ;;  %v4746_v27 = vpop.permute.xlu1 %4745 }
 0x2f6   : > { %v5516_v19 = vsel %vm5490_vm8, %v5483_v35, %v5256_v51  ;;  %v5419_v48 = vsel %vm5391_vm5, %v5386_v13, %v4746_v27 }
 0x2f7   : > { %7351 = vmatprep.mubr.msk.bf16.mxu1 %vm5566_vm11, %v5516_v19 }
 0x2f9   : > { %v5258_v7 = vpop.permute.xlu0 %5257  ;;  %v4858_v2 = vpop.permute.xlu1 %4857 }
 0x2fa   : > { %v5452_v47 = vsel %vm5424_vm15, %v5419_v48, %v4858_v2 }
 0x2fd   : > { %v4236_v14 = vpop.permute.xlu0 %4235  ;;  %v5130_v43 = vpop.permute.xlu1 %5129 }
 0x2fe   : > { %v5485_v36 = vsel %vm5457_vm2, %v5452_v47, %v5130_v43 }
 0x2ff   : > { %v5518_v39 = vsel %vm5490_vm8, %v5485_v36, %v5258_v7 }
 0x300   : > { %7352 = vmatmul.mubr.msk.bf16.gmra.mxu1 %vm5566_vm11, %v5518_v39 }
 0x301   : > { %v4348_v15 = vpop.permute.xlu0 %4347  ;;  %v4108_v23 = vpop.permute.xlu1 %4107 }
 0x302   : > { %v5292_v28 = vsel %vm2550_vm1, %v10144_v24, %v4108_v23 }
 0x303   : > { %v5324_v53 = vsel %vm2616_vm7, %v5292_v28, %v4236_v14 }
 0x304   : > { %v5356_v16 = vsel %vm2682_vm14, %v5324_v53, %v4348_v15 }
 0x305   : > { %v4620_v17 = vpop.permute.xlu0 %4619  ;;  %v4110_v34 = vpop.permute.xlu1 %4109 }
 0x306   : > { %v5388_v5 = vsel %vm2748_vm4, %v5356_v16, %v4620_v17  ;;  %v5294_v61 = vsel %vm2550_vm1, %v10161_v0, %v4110_v34  ;;  %vm10700_vm1 = vmmov %vm10696_vm3 }
 0x307   : > { %vm10704_vm9 = vmmov %vm10700_vm1 }
 0x309   : > { %v4748_v3 = vpop.permute.xlu0 %4747  ;;  %v4238_v59 = vpop.permute.xlu1 %4237 }
 0x30a   : > { %v5421_v38 = vsel %vm5391_vm5, %v5388_v5, %v4748_v3  ;;  %v5326_v8 = vsel %vm2616_vm7, %v5294_v61, %v4238_v59  ;;  %vm10701_vm7 = vmmov %vm10700_vm1 }
 0x30d   : > { %v4860_v40 = vpop.permute.xlu0 %4859  ;;  %v4350_v45 = vpop.permute.xlu1 %4349 }
 0x30e   : > { %v5454_v58 = vsel %vm5424_vm15, %v5421_v38, %v4860_v40  ;;  %v5358_v31 = vsel %vm2682_vm14, %v5326_v8, %v4350_v45  ;;  %vm6678_vm14 = vcmask 1042434  }
 0x311   : > { %v5132_v49 = vpop.permute.xlu0 %5131  ;;  %v4622_v62 = vpop.permute.xlu1 %4621 }
 0x312   : > { %v5487_v9 = vsel %vm5457_vm2, %v5454_v58, %v5132_v49  ;;  %v5390_v21 = vsel %vm2748_vm4, %v5358_v31, %v4622_v62  ;;  %vm10697_vm4 = vmmov %vm10696_vm3 }
 0x315   : > { %v5260_v6 = vpop.permute.xlu0 %5259  ;;  %v4750_v24 = vpop.permute.xlu1 %4749 }
 0x316   : > { %v5520_v29 = vsel %vm5490_vm8, %v5487_v9, %v5260_v6  ;;  %v5423_v37 = vsel %vm5391_vm5, %v5390_v21, %v4750_v24  ;;  %vm10702_vm5 = vmmov %vm10700_vm1 }
 0x317   : > { %7355 = vmatprep.mubr.msk.bf16.mxu1 %vm5566_vm11, %v5520_v29 }
 0x319   : > { %v4862_v1 = vpop.permute.xlu1 %4861 }
 0x31a   : > { %v7329_v26 = vpop.f32.mrf.mxu1  ;;  %v5456_v42 = vsel %vm5424_vm15, %v5423_v37, %v4862_v1  ;;  %vm10703_vm15 = vmmov %vm10700_vm1 }
 0x31b   : > { %v5646_v55 = vadd.f32 %v7329_v26, %v10358_v41 }
 0x31c   : > { %v5637_v4 = vpop.f32.mrf.mxu1 }
 0x31d   : > { %v5638_v18 = vadd.f32 %v10358_v41, %v5637_v4  ;;  %v5134_v63 = vpop.permute.xlu1 %5133  ;;  %v5766_v50 = vmax.f32 %v5646_v55, 0.0 }
 0x31e   : > { %v7330_v12 = vpop.f32.mrf.mxu1  ;;  %v5489_v54 = vsel %vm5457_vm2, %v5456_v42, %v5134_v63  ;;  %vm6680_vm2 = vcmask 1043459  }
 0x31f   : > { %v5764_v52 = vmax.f32 %v5638_v18, 0.0  ;;  %v5649_v32 = vadd.f32 %v7330_v12, %v10358_v41 }
 0x320   : > { %v5640_v0 = vpop.f32.mrf.mxu1 }
 0x321   : > { %v5796_v46 = vmax.f32 %v5764_v52, %v5766_v50  ;;  %v5641_v60 = vadd.f32 %v10358_v41, %v5640_v0  ;;  %v5767_v22 = vmax.f32 %v5649_v32, 0.0  ;;  %v5262_v35 = vpop.permute.xlu1 %5261 }
 0x322   : > { %v5522_v19 = vsel %vm5490_vm8, %v5489_v54, %v5262_v35  ;;  %vm6682_vm8 = vcmask 1044484  }
 0x323   : > { %v5828_v51 = vcombine.high %v5796_v46, %v5796_v46  ;;  %v5835_v27 = vrot.slane %v5796_v46, %v10366_v20  ;;  %v5765_v57 = vmax.f32 %v5641_v60, 0.0  ;;  %7356 = vmatmul.mubr.msk.bf16.gmra.mxu1 %vm5566_vm11, %v5522_v19  ;;  %vm6684_vm11 = vcmask 1045509  }
 0x325   : > { %v5842_v7 = vrot.slane %v5828_v51, %v10366_v20  ;;  %v5843_v25 = vcombine.high %v5835_v27, %v5835_v27  ;;  %v6164_v2 = vsel %vm10696_vm3, %v5835_v27, -inf  ;;  %v5797_v56 = vmax.f32 %v5765_v57, %v5767_v22  ;;  %vm10705_vm3 = vmmov %vm10700_vm1 }
 0x326   : > { %v6165_v13 = vrot.slane %v6164_v2, 4 }
 0x327   : > { %v5844_v48 = vcombine.high %v5842_v7, %v5842_v7  ;;  %v6171_v14 = vsel %vm10697_vm4, %v5843_v25, -inf  ;;  %v6178_v47 = vsel %vm10698_vm10, %v5842_v7, -inf  ;;  %v5845_v43 = vcombine.high %v5797_v56, %v5797_v56  ;;  %vm10706_vm4 = vmmov %vm10700_vm1 }
 0x328   : > { %v6166_v36 = vmax.f32 %v6164_v2, %v6165_v13  ;;  %v6172_v39 = vrot.slane %v6171_v14, 4  ;;  %v6179_v15 = vrot.slane %v6178_v47, 4  ;;  %v5852_v23 = vrot.slane %v5797_v56, %v10366_v20  ;;  %vm10707_vm10 = vmmov %vm10700_vm1 }
 0x329   : > { %v6185_v17 = vsel %vm10699_vm12, %v5844_v48, -inf  ;;  %v5859_v34 = vrot.slane %v5845_v43, %v10366_v20  ;;  %vm10708_vm12 = vmmov %vm10700_vm1 }
 0x32a   : > { %v6167_v28 = vrot.slane %v6166_v36, 2  ;;  %v6173_v3 = vmax.f32 %v6171_v14, %v6172_v39  ;;  %v6180_v59 = vmax.f32 %v6178_v47, %v6179_v15  ;;  %v6186_v53 = vrot.slane %v6185_v17, 4 }
 0x32b   : > { %v5860_v40 = vcombine.high %v5852_v23, %v5852_v23  ;;  %v5861_v45 = vcombine.high %v5859_v34, %v5859_v34  ;;  %v6192_v16 = vsel %vm10700_vm1, %v5852_v23, -inf  ;;  %v6206_v49 = vsel %vm10701_vm7, %v5859_v34, -inf  ;;  %vm10709_vm7 = vmmov %vm10700_vm1 }
 0x32c   : > { %v6168_v5 = vmax.f32 %v6166_v36, %v6167_v28  ;;  %v6174_v62 = vrot.slane %v6173_v3, 2  ;;  %v6181_v38 = vrot.slane %v6180_v59, 2  ;;  %v6187_v58 = vmax.f32 %v6185_v17, %v6186_v53 }
 0x32d   : > { %v6193_v9 = vrot.slane %v6192_v16, 4  ;;  %v6199_v6 = vsel %vm10702_vm5, %v5860_v40, -inf  ;;  %v6207_v24 = vrot.slane %v6206_v49, 4  ;;  %v6213_v29 = vsel %vm10703_vm15, %v5861_v45, -inf  ;;  %vm10710_vm5 = vmmov %vm10700_vm1 }
 0x32e   : > { %v6169_v30 = vrot.slane %v6168_v5, 1  ;;  %v6175_v33 = vmax.f32 %v6173_v3, %v6174_v62  ;;  %v6182_v10 = vmax.f32 %v6180_v59, %v6181_v38  ;;  %v6188_v1 = vrot.slane %v6187_v58, 2  ;;  %vm10711_vm15 = vmmov %vm10700_vm1 }
 0x32f   : > { %v6194_v26 = vmax.f32 %v6192_v16, %v6193_v9  ;;  %v6200_v11 = vrot.slane %v6199_v6, 4  ;;  %v6208_v44 = vmax.f32 %v6206_v49, %v6207_v24  ;;  %v6214_v55 = vrot.slane %v6213_v29, 4 }
 0x330   : > { %v6176_v61 = vrot.slane %v6175_v33, 1  ;;  %v6183_v4 = vrot.slane %v6182_v10, 1  ;;  %v6189_v8 = vmax.f32 %v6187_v58, %v6188_v1  ;;  %v6170_v21 = vmax.f32 %v6168_v5, %v6169_v30 }
 0x331   : > { %v6195_v18 = vrot.slane %v6194_v26, 2  ;;  %v6201_v31 = vmax.f32 %v6199_v6, %v6200_v11  ;;  %v6209_v63 = vrot.slane %v6208_v44, 2  ;;  %v6215_v12 = vmax.f32 %v6213_v29, %v6214_v55 }
 0x332   : > { %v6177_v50 = vmax.f32 %v6175_v33, %v6176_v61  ;;  %v6184_v52 = vmax.f32 %v6182_v10, %v6183_v4  ;;  %v6190_v32 = vrot.slane %v6189_v8, 1 }
 0x333   : > { %v6196_v37 = vmax.f32 %v6194_v26, %v6195_v18  ;;  %v6202_v0 = vrot.slane %v6201_v31, 2  ;;  %v6210_v42 = vmax.f32 %v6208_v44, %v6209_v63  ;;  %v6216_v46 = vrot.slane %v6215_v12, 2 }
 0x334   : > { %v6191_v60 = vmax.f32 %v6189_v8, %v6190_v32  ;;  %v6677_v54 = vsel %vm6676_vm13, %v6177_v50, %v6170_v21 }
 0x335   : > { %v6679_v22 = vsel %vm6678_vm14, %v6184_v52, %v6677_v54  ;;  %v6197_v35 = vrot.slane %v6196_v37, 1  ;;  %v6203_v51 = vmax.f32 %v6201_v31, %v6202_v0  ;;  %v6211_v27 = vrot.slane %v6210_v42, 1 }
 0x336   : > { %v6217_v19 = vmax.f32 %v6215_v12, %v6216_v46  ;;  %v6681_v57 = vsel %vm6680_vm2, %v6191_v60, %v6679_v22 }
 0x337   : > { %v6198_v7 = vmax.f32 %v6196_v37, %v6197_v35  ;;  %v6204_v25 = vrot.slane %v6203_v51, 1  ;;  %v6212_v2 = vmax.f32 %v6210_v42, %v6211_v27 }
 0x338   : > { %v6218_v56 = vrot.slane %v6217_v19, 1 }
 0x339   : > { %v6205_v13 = vmax.f32 %v6203_v51, %v6204_v25  ;;  %v6683_v48 = vsel %vm6682_vm8, %v6198_v7, %v6681_v57 }
 0x33a   : > { %v6219_v14 = vmax.f32 %v6217_v19, %v6218_v56  ;;  %v7333_v47 = vpop.f32.mrf.mxu1 }
 0x33b   : > { %v6685_v43 = vsel %vm6684_vm11, %v6205_v13, %v6683_v48  ;;  %v5662_v36 = vadd.f32 %v7333_v47, %v10358_v41 }
 0x33c   : > { %v6687_v39 = vsel %vm6686_vm0, %v6212_v2, %v6685_v43  ;;  %v5653_v15 = vpop.f32.mrf.mxu1 }
 0x33d   : > { %v6689_v23 = vsel %vm6688_vm6, %v6219_v14, %v6687_v39  ;;  %v5654_v17 = vadd.f32 %v10358_v41, %v5653_v15  ;;  %v5770_v28 = vmax.f32 %v5662_v36, 0.0 }
 0x33e   : > { %6747 = vst [vmem:[%s10400_s13] sm:$0xff] %v6689_v23  ;;  %v7334_v34 = vpop.f32.mrf.mxu1 }
 0x33f   : > { %v5768_v3 = vmax.f32 %v5654_v17, 0.0  ;;  %v5665_v59 = vadd.f32 %v7334_v34, %v10358_v41 }
 0x340   : > { %v5656_v53 = vpop.f32.mrf.mxu1 }
 0x341   : > { %v5798_v40 = vmax.f32 %v5768_v3, %v5770_v28  ;;  %v5657_v45 = vadd.f32 %v10358_v41, %v5656_v53  ;;  %v5771_v5 = vmax.f32 %v5665_v59, 0.0 }
 0x343   : > { %v5862_v16 = vcombine.high %v5798_v40, %v5798_v40  ;;  %v5869_v49 = vrot.slane %v5798_v40, %v10366_v20  ;;  %v5769_v62 = vmax.f32 %v5657_v45, 0.0 }
 0x345   : > { %v5876_v38 = vrot.slane %v5862_v16, %v10366_v20  ;;  %v5877_v58 = vcombine.high %v5869_v49, %v5869_v49  ;;  %v6220_v9 = vsel %vm10704_vm9, %v5869_v49, -inf  ;;  %v5799_v6 = vmax.f32 %v5769_v62, %v5771_v5  ;;  %vm10712_vm9 = vmmov %vm10700_vm1 }
 0x346   : > { %v6221_v24 = vrot.slane %v6220_v9, 4 }
 0x347   : > { %v5878_v29 = vcombine.high %v5876_v38, %v5876_v38  ;;  %v6227_v30 = vsel %vm10705_vm3, %v5877_v58, -inf  ;;  %v6234_v33 = vsel %vm10706_vm4, %v5876_v38, -inf  ;;  %v5879_v10 = vcombine.high %v5799_v6, %v5799_v6  ;;  %vm10713_vm3 = vmmov %vm10700_vm1 }
 0x348   : > { %v6222_v1 = vmax.f32 %v6220_v9, %v6221_v24  ;;  %v6228_v26 = vrot.slane %v6227_v30, 4  ;;  %v6235_v11 = vrot.slane %v6234_v33, 4  ;;  %v5886_v44 = vrot.slane %v5799_v6, %v10366_v20  ;;  %vm10714_vm4 = vmmov %vm10700_vm1 }
 0x349   : > { %v6241_v55 = vsel %vm10707_vm10, %v5878_v29, -inf  ;;  %v5893_v61 = vrot.slane %v5879_v10, %v10366_v20  ;;  %vm10715_vm10 = vmmov %vm10700_vm1 }
 0x34a   : > { %v6223_v4 = vrot.slane %v6222_v1, 2  ;;  %v6229_v8 = vmax.f32 %v6227_v30, %v6228_v26  ;;  %v6236_v18 = vmax.f32 %v6234_v33, %v6235_v11  ;;  %v6242_v31 = vrot.slane %v6241_v55, 4 }
 0x34b   : > { %v5894_v63 = vcombine.high %v5886_v44, %v5886_v44  ;;  %v5895_v12 = vcombine.high %v5893_v61, %v5893_v61  ;;  %v6248_v21 = vsel %vm10708_vm12, %v5886_v44, -inf  ;;  %v6262_v50 = vsel %vm10700_vm1, %v5893_v61, -inf  ;;  %vm10716_vm12 = vmmov %vm10700_vm1 }
 0x34c   : > { %v6224_v52 = vmax.f32 %v6222_v1, %v6223_v4  ;;  %v6230_v32 = vrot.slane %v6229_v8, 2  ;;  %v6237_v37 = vrot.slane %v6236_v18, 2  ;;  %v6243_v0 = vmax.f32 %v6241_v55, %v6242_v31 }
 0x34d   : > { %v6249_v42 = vrot.slane %v6248_v21, 4  ;;  %v6255_v46 = vsel %vm10709_vm7, %v5894_v63, -inf  ;;  %v6263_v60 = vrot.slane %v6262_v50, 4  ;;  %v6269_v54 = vsel %vm10710_vm5, %v5895_v12, -inf  ;;  %vm10717_vm7 = vmmov %vm10700_vm1 }
 0x34e   : > { %v6225_v22 = vrot.slane %v6224_v52, 1  ;;  %v6231_v35 = vmax.f32 %v6229_v8, %v6230_v32  ;;  %v6238_v51 = vmax.f32 %v6236_v18, %v6237_v37  ;;  %v6244_v27 = vrot.slane %v6243_v0, 2  ;;  %vm10718_vm5 = vmmov %vm10700_vm1 }
 0x34f   : > { %v6250_v19 = vmax.f32 %v6248_v21, %v6249_v42  ;;  %v6256_v57 = vrot.slane %v6255_v46, 4  ;;  %v6264_v7 = vmax.f32 %v6262_v50, %v6263_v60  ;;  %v6270_v25 = vrot.slane %v6269_v54, 4 }
 0x350   : > { %v6232_v2 = vrot.slane %v6231_v35, 1  ;;  %v6239_v56 = vrot.slane %v6238_v51, 1  ;;  %v6245_v13 = vmax.f32 %v6243_v0, %v6244_v27  ;;  %v6226_v36 = vmax.f32 %v6224_v52, %v6225_v22 }
 0x351   : > { %v6251_v48 = vrot.slane %v6250_v19, 2  ;;  %v6257_v14 = vmax.f32 %v6255_v46, %v6256_v57  ;;  %v6265_v47 = vrot.slane %v6264_v7, 2  ;;  %v6271_v43 = vmax.f32 %v6269_v54, %v6270_v25 }
 0x352   : > { %v6233_v39 = vmax.f32 %v6231_v35, %v6232_v2  ;;  %v6240_v15 = vmax.f32 %v6238_v51, %v6239_v56  ;;  %v6246_v23 = vrot.slane %v6245_v13, 1 }
 0x353   : > { %v6252_v17 = vmax.f32 %v6250_v19, %v6251_v48  ;;  %v6258_v34 = vrot.slane %v6257_v14, 2  ;;  %v6266_v28 = vmax.f32 %v6264_v7, %v6265_v47  ;;  %v6272_v3 = vrot.slane %v6271_v43, 2 }
 0x354   : > { %v6247_v59 = vmax.f32 %v6245_v13, %v6246_v23  ;;  %v6690_v53 = vsel %vm6676_vm13, %v6233_v39, %v6226_v36 }
 0x355   : > { %v6691_v40 = vsel %vm6678_vm14, %v6240_v15, %v6690_v53  ;;  %v6253_v45 = vrot.slane %v6252_v17, 1  ;;  %v6259_v16 = vmax.f32 %v6257_v14, %v6258_v34  ;;  %v6267_v49 = vrot.slane %v6266_v28, 1 }
 0x356   : > { %v6273_v5 = vmax.f32 %v6271_v43, %v6272_v3  ;;  %v6692_v62 = vsel %vm6680_vm2, %v6247_v59, %v6691_v40 }
 0x357   : > { %v6254_v38 = vmax.f32 %v6252_v17, %v6253_v45  ;;  %v6260_v58 = vrot.slane %v6259_v16, 1  ;;  %v6268_v9 = vmax.f32 %v6266_v28, %v6267_v49 }
 0x358   : > { %v6274_v6 = vrot.slane %v6273_v5, 1 }
 0x359   : > { %v6261_v24 = vmax.f32 %v6259_v16, %v6260_v58  ;;  %v6693_v29 = vsel %vm6682_vm8, %v6254_v38, %v6692_v62 }
 0x35a   : > { %v6275_v30 = vmax.f32 %v6273_v5, %v6274_v6  ;;  %v7337_v33 = vpop.f32.mrf.mxu1 }
 0x35b   : > { %v6694_v10 = vsel %vm6684_vm11, %v6261_v24, %v6693_v29  ;;  %v5678_v1 = vadd.f32 %v7337_v33, %v10358_v41 }
 0x35c   : > { %v6695_v26 = vsel %vm6686_vm0, %v6268_v9, %v6694_v10  ;;  %v5669_v11 = vpop.f32.mrf.mxu1 }
 0x35d   : > { %v6696_v44 = vsel %vm6688_vm6, %v6275_v30, %v6695_v26  ;;  %v5670_v55 = vadd.f32 %v10358_v41, %v5669_v11  ;;  %v5774_v4 = vmax.f32 %v5678_v1, 0.0 }
 0x35e   : > { %6748 = vst [vmem:[%s10400_s13 + $0x8] sm:$0xff] %v6696_v44  ;;  %v7338_v61 = vpop.f32.mrf.mxu1 }
 0x35f   : > { %v5772_v8 = vmax.f32 %v5670_v55, 0.0  ;;  %v5681_v18 = vadd.f32 %v7338_v61, %v10358_v41 }
 0x360   : > { %v5672_v31 = vpop.f32.mrf.mxu1 }
 0x361   : > { %v5800_v63 = vmax.f32 %v5772_v8, %v5774_v4  ;;  %v5673_v12 = vadd.f32 %v10358_v41, %v5672_v31  ;;  %v5775_v52 = vmax.f32 %v5681_v18, 0.0 }
 0x363   : > { %v5896_v21 = vcombine.high %v5800_v63, %v5800_v63  ;;  %v5903_v50 = vrot.slane %v5800_v63, %v10366_v20  ;;  %v5773_v32 = vmax.f32 %v5673_v12, 0.0 }
 0x365   : > { %v5910_v37 = vrot.slane %v5896_v21, %v10366_v20  ;;  %v5911_v0 = vcombine.high %v5903_v50, %v5903_v50  ;;  %v6276_v42 = vsel %vm10711_vm15, %v5903_v50, -inf  ;;  %v5801_v46 = vmax.f32 %v5773_v32, %v5775_v52  ;;  %vm10719_vm15 = vmmov %vm10700_vm1 }
 0x366   : > { %v6277_v60 = vrot.slane %v6276_v42, 4 }
 0x367   : > { %v5912_v54 = vcombine.high %v5910_v37, %v5910_v37  ;;  %v6283_v22 = vsel %vm10712_vm9, %v5911_v0, -inf  ;;  %v6290_v35 = vsel %vm10713_vm3, %v5910_v37, -inf  ;;  %v5913_v51 = vcombine.high %v5801_v46, %v5801_v46  ;;  %vm10720_vm9 = vmmov %vm10700_vm1 }
 0x368   : > { %v6278_v27 = vmax.f32 %v6276_v42, %v6277_v60  ;;  %v6284_v19 = vrot.slane %v6283_v22, 4  ;;  %v6291_v57 = vrot.slane %v6290_v35, 4  ;;  %v5920_v7 = vrot.slane %v5801_v46, %v10366_v20  ;;  %vm10721_vm3 = vmmov %vm10700_vm1 }
 0x369   : > { %v6297_v25 = vsel %vm10714_vm4, %v5912_v54, -inf  ;;  %v5927_v2 = vrot.slane %v5913_v51, %v10366_v20  ;;  %vm10722_vm4 = vmmov %vm10700_vm1 }
 0x36a   : > { %v6279_v56 = vrot.slane %v6278_v27, 2  ;;  %v6285_v13 = vmax.f32 %v6283_v22, %v6284_v19  ;;  %v6292_v48 = vmax.f32 %v6290_v35, %v6291_v57  ;;  %v6298_v14 = vrot.slane %v6297_v25, 4 }
 0x36b   : > { %v5928_v47 = vcombine.high %v5920_v7, %v5920_v7  ;;  %v5929_v43 = vcombine.high %v5927_v2, %v5927_v2  ;;  %v6304_v36 = vsel %vm10715_vm10, %v5920_v7, -inf  ;;  %v6318_v39 = vsel %vm10716_vm12, %v5927_v2, -inf  ;;  %vm10723_vm10 = vmmov %vm10700_vm1 }
 0x36c   : > { %v6280_v15 = vmax.f32 %v6278_v27, %v6279_v56  ;;  %v6286_v23 = vrot.slane %v6285_v13, 2  ;;  %v6293_v17 = vrot.slane %v6292_v48, 2  ;;  %v6299_v34 = vmax.f32 %v6297_v25, %v6298_v14  ;;  %vm10724_vm12 = vmmov %vm10700_vm1 }
 0x36d   : > { %v6305_v28 = vrot.slane %v6304_v36, 4  ;;  %v6311_v3 = vsel %vm10700_vm1, %v5928_v47, -inf  ;;  %v6319_v59 = vrot.slane %v6318_v39, 4  ;;  %v6325_v53 = vsel %vm10717_vm7, %v5929_v43, -inf  ;;  %vm10725_vm7 = vmmov %vm10700_vm1 }
 0x36e   : > { %v6281_v40 = vrot.slane %v6280_v15, 1  ;;  %v6287_v45 = vmax.f32 %v6285_v13, %v6286_v23  ;;  %v6294_v16 = vmax.f32 %v6292_v48, %v6293_v17  ;;  %v6300_v49 = vrot.slane %v6299_v34, 2 }
 0x36f   : > { %v6306_v5 = vmax.f32 %v6304_v36, %v6305_v28  ;;  %v6312_v62 = vrot.slane %v6311_v3, 4  ;;  %v6320_v38 = vmax.f32 %v6318_v39, %v6319_v59  ;;  %v6326_v58 = vrot.slane %v6325_v53, 4 }
 0x370   : > { %v6288_v9 = vrot.slane %v6287_v45, 1  ;;  %v6295_v6 = vrot.slane %v6294_v16, 1  ;;  %v6301_v24 = vmax.f32 %v6299_v34, %v6300_v49  ;;  %v6282_v1 = vmax.f32 %v6280_v15, %v6281_v40 }
 0x371   : > { %v6307_v29 = vrot.slane %v6306_v5, 2  ;;  %v6313_v30 = vmax.f32 %v6311_v3, %v6312_v62  ;;  %v6321_v33 = vrot.slane %v6320_v38, 2  ;;  %v6327_v10 = vmax.f32 %v6325_v53, %v6326_v58 }
 0x372   : > { %v6289_v26 = vmax.f32 %v6287_v45, %v6288_v9  ;;  %v6296_v11 = vmax.f32 %v6294_v16, %v6295_v6  ;;  %v6302_v44 = vrot.slane %v6301_v24, 1 }
 0x373   : > { %v6308_v55 = vmax.f32 %v6306_v5, %v6307_v29  ;;  %v6314_v61 = vrot.slane %v6313_v30, 2  ;;  %v6322_v4 = vmax.f32 %v6320_v38, %v6321_v33  ;;  %v6328_v8 = vrot.slane %v6327_v10, 2 }
 0x374   : > { %v6303_v18 = vmax.f32 %v6301_v24, %v6302_v44  ;;  %v6697_v31 = vsel %vm6676_vm13, %v6289_v26, %v6282_v1 }
 0x375   : > { %v6698_v63 = vsel %vm6678_vm14, %v6296_v11, %v6697_v31  ;;  %v6309_v12 = vrot.slane %v6308_v55, 1  ;;  %v6315_v21 = vmax.f32 %v6313_v30, %v6314_v61  ;;  %v6323_v50 = vrot.slane %v6322_v4, 1 }
 0x376   : > { %v6329_v52 = vmax.f32 %v6327_v10, %v6328_v8  ;;  %v6699_v32 = vsel %vm6680_vm2, %v6303_v18, %v6698_v63  ;;  %v7341_v37 = vpop.f32.mrf.mxu1 }
 0x377   : > { %v6310_v0 = vmax.f32 %v6308_v55, %v6309_v12  ;;  %v6316_v42 = vrot.slane %v6315_v21, 1  ;;  %v5694_v46 = vadd.f32 %v7341_v37, %v10358_v41  ;;  %v6324_v60 = vmax.f32 %v6322_v4, %v6323_v50 }
 0x378   : > { %v6330_v54 = vrot.slane %v6329_v52, 1  ;;  %v5685_v22 = vpop.f32.mrf.mxu1 }
 0x379   : > { %v6317_v35 = vmax.f32 %v6315_v21, %v6316_v42  ;;  %v6700_v51 = vsel %vm6682_vm8, %v6310_v0, %v6699_v32  ;;  %v5686_v27 = vadd.f32 %v10358_v41, %v5685_v22  ;;  %v5778_v25 = vmax.f32 %v5694_v46, 0.0 }
 0x37a   : > { %v6331_v19 = vmax.f32 %v6329_v52, %v6330_v54  ;;  %v7342_v57 = vpop.f32.mrf.mxu1 }
 0x37b   : > { %v6701_v7 = vsel %vm6684_vm11, %v6317_v35, %v6700_v51  ;;  %v5776_v2 = vmax.f32 %v5686_v27, 0.0  ;;  %v5697_v56 = vadd.f32 %v7342_v57, %v10358_v41 }
 0x37c   : > { %v6702_v13 = vsel %vm6686_vm0, %v6324_v60, %v6701_v7  ;;  %v5688_v48 = vpop.f32.mrf.mxu1 }
 0x37d   : > { %v6703_v14 = vsel %vm6688_vm6, %v6331_v19, %v6702_v13  ;;  %v5802_v47 = vmax.f32 %v5776_v2, %v5778_v25  ;;  %v5689_v43 = vadd.f32 %v10358_v41, %v5688_v48  ;;  %v5779_v15 = vmax.f32 %v5697_v56, 0.0 }
 0x37e   : > { %6749 = vst [vmem:[%s10400_s13 + $0x10] sm:$0xff] %v6703_v14 }
 0x37f   : > { %v5930_v36 = vcombine.high %v5802_v47, %v5802_v47  ;;  %v5937_v39 = vrot.slane %v5802_v47, %v10366_v20  ;;  %v5777_v23 = vmax.f32 %v5689_v43, 0.0 }
 0x381   : > { %v5944_v17 = vrot.slane %v5930_v36, %v10366_v20  ;;  %v5945_v34 = vcombine.high %v5937_v39, %v5937_v39  ;;  %v6332_v28 = vsel %vm10718_vm5, %v5937_v39, -inf  ;;  %v5803_v3 = vmax.f32 %v5777_v23, %v5779_v15  ;;  %vm10726_vm5 = vmmov %vm10700_vm1 }
 0x382   : > { %v6333_v59 = vrot.slane %v6332_v28, 4 }
 0x383   : > { %v5946_v53 = vcombine.high %v5944_v17, %v5944_v17  ;;  %v6339_v40 = vsel %vm10719_vm15, %v5945_v34, -inf  ;;  %v6346_v45 = vsel %vm10720_vm9, %v5944_v17, -inf  ;;  %v5947_v16 = vcombine.high %v5803_v3, %v5803_v3  ;;  %vm10727_vm15 = vmmov %vm10700_vm1 }
 0x384   : > { %v6334_v49 = vmax.f32 %v6332_v28, %v6333_v59  ;;  %v6340_v5 = vrot.slane %v6339_v40, 4  ;;  %v6347_v62 = vrot.slane %v6346_v45, 4  ;;  %v5954_v38 = vrot.slane %v5803_v3, %v10366_v20  ;;  %vm10728_vm9 = vmmov %vm10700_vm1 }
 0x385   : > { %v6353_v58 = vsel %vm10721_vm3, %v5946_v53, -inf  ;;  %v5961_v9 = vrot.slane %v5947_v16, %v10366_v20  ;;  %vm10729_vm3 = vmmov %vm10700_vm1 }
 0x386   : > { %v6335_v6 = vrot.slane %v6334_v49, 2  ;;  %v6341_v24 = vmax.f32 %v6339_v40, %v6340_v5  ;;  %v6348_v29 = vmax.f32 %v6346_v45, %v6347_v62  ;;  %v6354_v30 = vrot.slane %v6353_v58, 4  ;;  %v7345_v33 = vpop.f32.mrf.mxu1 }
 0x387   : > { %v5962_v10 = vcombine.high %v5954_v38, %v5954_v38  ;;  %v5963_v1 = vcombine.high %v5961_v9, %v5961_v9  ;;  %v6360_v26 = vsel %vm10722_vm4, %v5954_v38, -inf  ;;  %v6374_v11 = vsel %vm10723_vm10, %v5961_v9, -inf  ;;  %vm10730_vm4 = vmmov %vm10700_vm1 }
 0x388   : > { %v6336_v44 = vmax.f32 %v6334_v49, %v6335_v6  ;;  %v6342_v55 = vrot.slane %v6341_v24, 2  ;;  %v6349_v61 = vrot.slane %v6348_v29, 2  ;;  %v6355_v4 = vmax.f32 %v6353_v58, %v6354_v30  ;;  %v5701_v8 = vpop.f32.mrf.mxu1  ;;  %vm10731_vm10 = vmmov %vm10700_vm1 }
 0x389   : > { %v6361_v18 = vrot.slane %v6360_v26, 4  ;;  %v6367_v31 = vsel %vm10724_vm12, %v5962_v10, -inf  ;;  %v6375_v63 = vrot.slane %v6374_v11, 4  ;;  %v6381_v12 = vsel %vm10700_vm1, %v5963_v1, -inf  ;;  %vm10732_vm12 = vmmov %vm10700_vm1 }
 0x38a   : > { %v6337_v21 = vrot.slane %v6336_v44, 1  ;;  %v6343_v50 = vmax.f32 %v6341_v24, %v6342_v55  ;;  %v6350_v52 = vmax.f32 %v6348_v29, %v6349_v61  ;;  %v6356_v32 = vrot.slane %v6355_v4, 2  ;;  %v7346_v51 = vpop.f32.mrf.mxu1 }
 0x38b   : > { %v6362_v37 = vmax.f32 %v6360_v26, %v6361_v18  ;;  %v6368_v0 = vrot.slane %v6367_v31, 4  ;;  %v6376_v42 = vmax.f32 %v6374_v11, %v6375_v63  ;;  %v6382_v46 = vrot.slane %v6381_v12, 4 }
 0x38c   : > { %v6338_v60 = vmax.f32 %v6336_v44, %v6337_v21  ;;  %v6344_v54 = vrot.slane %v6343_v50, 1  ;;  %v6351_v22 = vrot.slane %v6350_v52, 1  ;;  %v6357_v35 = vmax.f32 %v6355_v4, %v6356_v32  ;;  %v5704_v17 = vpop.f32.mrf.mxu1 }
 0x38d   : > { %v6363_v27 = vrot.slane %v6362_v37, 2  ;;  %v6369_v19 = vmax.f32 %v6367_v31, %v6368_v0  ;;  %v6377_v57 = vrot.slane %v6376_v42, 2  ;;  %v6383_v7 = vmax.f32 %v6381_v12, %v6382_v46 }
 0x38e   : > { %v6345_v25 = vmax.f32 %v6343_v50, %v6344_v54  ;;  %v6352_v2 = vmax.f32 %v6350_v52, %v6351_v22  ;;  %v6358_v56 = vrot.slane %v6357_v35, 1  ;;  %v5710_v13 = vadd.f32 %v7345_v33, %v10358_v41 }
 0x38f   : > { %v6364_v48 = vmax.f32 %v6362_v37, %v6363_v27  ;;  %v6370_v14 = vrot.slane %v6369_v19, 2  ;;  %v6378_v47 = vmax.f32 %v6376_v42, %v6377_v57  ;;  %v6384_v43 = vrot.slane %v6383_v7, 2 }
 0x390   : > { %v6359_v36 = vmax.f32 %v6357_v35, %v6358_v56  ;;  %v6704_v39 = vsel %vm6676_vm13, %v6345_v25, %v6338_v60  ;;  %v5782_v15 = vmax.f32 %v5710_v13, 0.0  ;;  %v5702_v23 = vadd.f32 %v10358_v41, %v5701_v8 }
 0x391   : > { %v6705_v34 = vsel %vm6678_vm14, %v6352_v2, %v6704_v39  ;;  %v6365_v28 = vrot.slane %v6364_v48, 1  ;;  %v6371_v3 = vmax.f32 %v6369_v19, %v6370_v14  ;;  %v6379_v59 = vrot.slane %v6378_v47, 1 }
 0x392   : > { %v6385_v53 = vmax.f32 %v6383_v7, %v6384_v43  ;;  %v6706_v40 = vsel %vm6680_vm2, %v6359_v36, %v6705_v34  ;;  %v5780_v45 = vmax.f32 %v5702_v23, 0.0  ;;  %v5713_v16 = vadd.f32 %v7346_v51, %v10358_v41 }
 0x393   : > { %v6366_v49 = vmax.f32 %v6364_v48, %v6365_v28  ;;  %v6372_v5 = vrot.slane %v6371_v3, 1  ;;  %v5705_v62 = vadd.f32 %v10358_v41, %v5704_v17  ;;  %v6380_v38 = vmax.f32 %v6378_v47, %v6379_v59 }
 0x394   : > { %v6386_v58 = vrot.slane %v6385_v53, 1  ;;  %v5804_v9 = vmax.f32 %v5780_v45, %v5782_v15  ;;  %v5783_v29 = vmax.f32 %v5713_v16, 0.0 }
 0x395   : > { %v6373_v6 = vmax.f32 %v6371_v3, %v6372_v5  ;;  %v6707_v24 = vsel %vm6682_vm8, %v6366_v49, %v6706_v40  ;;  %v5781_v30 = vmax.f32 %v5705_v62, 0.0 }
 0x396   : > { %v6387_v33 = vmax.f32 %v6385_v53, %v6386_v58  ;;  %v5964_v10 = vcombine.high %v5804_v9, %v5804_v9  ;;  %v5971_v1 = vrot.slane %v5804_v9, %v10366_v20 }
 0x397   : > { %v6708_v26 = vsel %vm6684_vm11, %v6373_v6, %v6707_v24  ;;  %v5805_v11 = vmax.f32 %v5781_v30, %v5783_v29 }
 0x398   : > { %v6709_v44 = vsel %vm6686_vm0, %v6380_v38, %v6708_v26  ;;  %v5978_v55 = vrot.slane %v5964_v10, %v10366_v20  ;;  %v5979_v61 = vcombine.high %v5971_v1, %v5971_v1  ;;  %v6388_v4 = vsel %vm10725_vm7, %v5971_v1, -inf  ;;  %vm10733_vm7 = vmmov %vm10700_vm1 }
 0x399   : > { %v6710_v8 = vsel %vm6688_vm6, %v6387_v33, %v6709_v44  ;;  %v6389_v18 = vrot.slane %v6388_v4, 4  ;;  %v5981_v31 = vcombine.high %v5805_v11, %v5805_v11  ;;  %v5988_v63 = vrot.slane %v5805_v11, %v10366_v20 }
 0x39a   : > { %6750 = vst [vmem:[%s10400_s13 + $0x18] sm:$0xff] %v6710_v8  ;;  %v5980_v12 = vcombine.high %v5978_v55, %v5978_v55  ;;  %v6395_v21 = vsel %vm10726_vm5, %v5979_v61, -inf  ;;  %v6402_v50 = vsel %vm10727_vm15, %v5978_v55, -inf  ;;  %vm10734_vm5 = vmmov %vm10700_vm1 }
 0x39b   : > { %v6390_v52 = vmax.f32 %v6388_v4, %v6389_v18  ;;  %v6396_v32 = vrot.slane %v6395_v21, 4  ;;  %v6403_v37 = vrot.slane %v6402_v50, 4  ;;  %v5995_v0 = vrot.slane %v5981_v31, %v10366_v20  ;;  %vm10735_vm15 = vmmov %vm10700_vm1 }
 0x39c   : > { %v6409_v42 = vsel %vm10728_vm9, %v5980_v12, -inf  ;;  %v5996_v46 = vcombine.high %v5988_v63, %v5988_v63  ;;  %v6416_v60 = vsel %vm10729_vm3, %v5988_v63, -inf  ;;  %vm10736_vm9 = vmmov %vm10700_vm1 }
 0x39d   : > { %v6391_v54 = vrot.slane %v6390_v52, 2  ;;  %v6397_v22 = vmax.f32 %v6395_v21, %v6396_v32  ;;  %v6404_v35 = vmax.f32 %v6402_v50, %v6403_v37  ;;  %v6410_v51 = vrot.slane %v6409_v42, 4  ;;  %vm10737_vm3 = vmmov %vm10700_vm1 }
 0x39e   : > { %v5997_v27 = vcombine.high %v5995_v0, %v5995_v0  ;;  %v6417_v19 = vrot.slane %v6416_v60, 4  ;;  %v6423_v57 = vsel %vm10730_vm4, %v5996_v46, -inf  ;;  %v6430_v7 = vsel %vm10731_vm10, %v5995_v0, -inf  ;;  %vm10738_vm4 = vmmov %vm10700_vm1 }
 0x39f   : > { %v6392_v25 = vmax.f32 %v6390_v52, %v6391_v54  ;;  %v6398_v2 = vrot.slane %v6397_v22, 2  ;;  %v6405_v56 = vrot.slane %v6404_v35, 2  ;;  %v6411_v13 = vmax.f32 %v6409_v42, %v6410_v51  ;;  %vm10739_vm10 = vmmov %vm10700_vm1 }
 0x3a0   : > { %v6418_v48 = vmax.f32 %v6416_v60, %v6417_v19  ;;  %v6424_v14 = vrot.slane %v6423_v57, 4  ;;  %v6431_v47 = vrot.slane %v6430_v7, 4  ;;  %v6437_v43 = vsel %vm10732_vm12, %v5997_v27, -inf  ;;  %v7349_v17 = vpop.f32.mrf.mxu1  ;;  %vm10740_vm12 = vmmov %vm10700_vm1 }
 0x3a1   : > { %v6393_v36 = vrot.slane %v6392_v25, 1  ;;  %v6399_v39 = vmax.f32 %v6397_v22, %v6398_v2  ;;  %v6406_v15 = vmax.f32 %v6404_v35, %v6405_v56  ;;  %v6412_v23 = vrot.slane %v6411_v13, 2 }
 0x3a2   : > { %v6419_v34 = vrot.slane %v6418_v48, 2  ;;  %v6425_v28 = vmax.f32 %v6423_v57, %v6424_v14  ;;  %v6432_v3 = vmax.f32 %v6430_v7, %v6431_v47  ;;  %v6438_v59 = vrot.slane %v6437_v43, 4  ;;  %v5717_v49 = vpop.f32.mrf.mxu1 }
 0x3a3   : > { %v6394_v53 = vmax.f32 %v6392_v25, %v6393_v36  ;;  %v6400_v40 = vrot.slane %v6399_v39, 1  ;;  %v6407_v45 = vrot.slane %v6406_v15, 1  ;;  %v6413_v16 = vmax.f32 %v6411_v13, %v6412_v23 }
 0x3a4   : > { %v6420_v5 = vmax.f32 %v6418_v48, %v6419_v34  ;;  %v6426_v62 = vrot.slane %v6425_v28, 2  ;;  %v6433_v38 = vrot.slane %v6432_v3, 2  ;;  %v6439_v58 = vmax.f32 %v6437_v43, %v6438_v59  ;;  %v7350_v30 = vpop.f32.mrf.mxu1 }
 0x3a5   : > { %v6401_v9 = vmax.f32 %v6399_v39, %v6400_v40  ;;  %v6408_v6 = vmax.f32 %v6406_v15, %v6407_v45  ;;  %v6414_v24 = vrot.slane %v6413_v16, 1  ;;  %v5726_v29 = vadd.f32 %v7349_v17, %v10358_v41 }
 0x3a6   : > { %v6421_v33 = vrot.slane %v6420_v5, 1  ;;  %v6427_v10 = vmax.f32 %v6425_v28, %v6426_v62  ;;  %v6434_v1 = vmax.f32 %v6432_v3, %v6433_v38  ;;  %v6440_v26 = vrot.slane %v6439_v58, 2  ;;  %v5720_v4 = vpop.f32.mrf.mxu1 }
 0x3a7   : > { %v6415_v11 = vmax.f32 %v6413_v16, %v6414_v24  ;;  %v6711_v44 = vsel %vm6676_vm13, %v6401_v9, %v6394_v53  ;;  %v5786_v55 = vmax.f32 %v5726_v29, 0.0  ;;  %v5718_v61 = vadd.f32 %v10358_v41, %v5717_v49 }
 0x3a8   : > { %v6712_v8 = vsel %vm6678_vm14, %v6408_v6, %v6711_v44  ;;  %v6422_v18 = vmax.f32 %v6420_v5, %v6421_v33  ;;  %v6428_v31 = vrot.slane %v6427_v10, 1  ;;  %v6435_v63 = vrot.slane %v6434_v1, 1 }
 0x3a9   : > { %v6441_v12 = vmax.f32 %v6439_v58, %v6440_v26  ;;  %v6713_v21 = vsel %vm6680_vm2, %v6415_v11, %v6712_v8  ;;  %v5784_v50 = vmax.f32 %v5718_v61, 0.0  ;;  %v5729_v52 = vadd.f32 %v7350_v30, %v10358_v41 }
 0x3aa   : > { %v6429_v32 = vmax.f32 %v6427_v10, %v6428_v31  ;;  %v6436_v37 = vmax.f32 %v6434_v1, %v6435_v63  ;;  %v6714_v0 = vsel %vm6682_vm8, %v6422_v18, %v6713_v21  ;;  %v5721_v42 = vadd.f32 %v10358_v41, %v5720_v4 }
 0x3ab   : > { %v6442_v46 = vrot.slane %v6441_v12, 1  ;;  %v5806_v60 = vmax.f32 %v5784_v50, %v5786_v55  ;;  %v5787_v22 = vmax.f32 %v5729_v52, 0.0 }
 0x3ac   : > { %v6715_v54 = vsel %vm6684_vm11, %v6429_v32, %v6714_v0  ;;  %v5785_v35 = vmax.f32 %v5721_v42, 0.0 }
 0x3ad   : > { %v6443_v51 = vmax.f32 %v6441_v12, %v6442_v46  ;;  %v6716_v27 = vsel %vm6686_vm0, %v6436_v37, %v6715_v54  ;;  %v5998_v19 = vcombine.high %v5806_v60, %v5806_v60  ;;  %v6005_v57 = vrot.slane %v5806_v60, %v10366_v20 }
 0x3ae   : > { %v5807_v7 = vmax.f32 %v5785_v35, %v5787_v22 }
 0x3af   : > { %v6717_v25 = vsel %vm6688_vm6, %v6443_v51, %v6716_v27  ;;  %v6012_v2 = vrot.slane %v5998_v19, %v10366_v20  ;;  %v6013_v56 = vcombine.high %v6005_v57, %v6005_v57  ;;  %v6444_v41 = vsel %vm10700_vm1, %v6005_v57, -inf }
 0x3b0   : > { %6751 = vst [vmem:[%s10400_s13 + $0x20] sm:$0xff] %v6717_v25  ;;  %v6445_v13 = vrot.slane %v6444_v41, 4  ;;  %v6015_v48 = vcombine.high %v5807_v7, %v5807_v7  ;;  %v6022_v14 = vrot.slane %v5807_v7, %v10366_v20 }
 0x3b1   : > { %v6014_v47 = vcombine.high %v6012_v2, %v6012_v2  ;;  %v6451_v43 = vsel %vm10733_vm7, %v6013_v56, -inf  ;;  %v6458_v36 = vsel %vm10734_vm5, %v6012_v2, -inf  ;;  %vm10741_vm7 = vmmov %vm10700_vm1 }
 0x3b2   : > { %v6446_v39 = vmax.f32 %v6444_v41, %v6445_v13  ;;  %v6452_v15 = vrot.slane %v6451_v43, 4  ;;  %v6459_v23 = vrot.slane %v6458_v36, 4  ;;  %v6029_v17 = vrot.slane %v6015_v48, %v10366_v20  ;;  %vm10742_vm5 = vmmov %vm10700_vm1 }
 0x3b3   : > { %v6465_v34 = vsel %vm10735_vm15, %v6014_v47, -inf  ;;  %v6030_v28 = vcombine.high %v6022_v14, %v6022_v14  ;;  %v6472_v3 = vsel %vm10736_vm9, %v6022_v14, -inf  ;;  %v10520_v14 = vld [vmem:[%s10630_s4] ss:$0 sm:$0xff]  ;;  %vm10743_vm15 = vmmov %vm10700_vm1 }
 0x3b4   : > { %v6447_v59 = vrot.slane %v6446_v39, 2  ;;  %v6453_v53 = vmax.f32 %v6451_v43, %v6452_v15  ;;  %v6460_v40 = vmax.f32 %v6458_v36, %v6459_v23  ;;  %v6466_v45 = vrot.slane %v6465_v34, 4  ;;  %vm10744_vm9 = vmmov %vm10700_vm1 }
 0x3b5   : > { %v6031_v16 = vcombine.high %v6029_v17, %v6029_v17  ;;  %v6473_v49 = vrot.slane %v6472_v3, 4  ;;  %v6479_v5 = vsel %vm10737_vm3, %v6030_v28, -inf  ;;  %v6486_v62 = vsel %vm10738_vm4, %v6029_v17, -inf  ;;  %vm10745_vm3 = vmmov %vm10700_vm1 }
 0x3b6   : > { %v6448_v38 = vmax.f32 %v6446_v39, %v6447_v59  ;;  %v6454_v58 = vrot.slane %v6453_v53, 2  ;;  %v6461_v9 = vrot.slane %v6460_v40, 2  ;;  %v6467_v6 = vmax.f32 %v6465_v34, %v6466_v45  ;;  %vm10746_vm4 = vmmov %vm10700_vm1 }
 0x3b7   : > { %v6474_v24 = vmax.f32 %v6472_v3, %v6473_v49  ;;  %v6480_v29 = vrot.slane %v6479_v5, 4  ;;  %v6487_v30 = vrot.slane %v6486_v62, 4  ;;  %v6493_v33 = vsel %vm10739_vm10, %v6031_v16, -inf  ;;  %vm10747_vm10 = vmmov %vm10700_vm1 }
 0x3b8   : > { %v6449_v10 = vrot.slane %v6448_v38, 1  ;;  %v6455_v1 = vmax.f32 %v6453_v53, %v6454_v58  ;;  %v6462_v26 = vmax.f32 %v6460_v40, %v6461_v9  ;;  %v6468_v11 = vrot.slane %v6467_v6, 2 }
 0x3b9   : > { %v6475_v44 = vrot.slane %v6474_v24, 2  ;;  %v6481_v55 = vmax.f32 %v6479_v5, %v6480_v29  ;;  %v6488_v61 = vmax.f32 %v6486_v62, %v6487_v30  ;;  %v6494_v4 = vrot.slane %v6493_v33, 4 }
 0x3ba   : > { %v6456_v8 = vrot.slane %v6455_v1, 1  ;;  %v6463_v18 = vrot.slane %v6462_v26, 1  ;;  %v6469_v31 = vmax.f32 %v6467_v6, %v6468_v11  ;;  %v6450_v52 = vmax.f32 %v6448_v38, %v6449_v10 }
 0x3bb   : > { %v6476_v63 = vmax.f32 %v6474_v24, %v6475_v44  ;;  %v6482_v12 = vrot.slane %v6481_v55, 2  ;;  %v6489_v21 = vrot.slane %v6488_v61, 2  ;;  %v6495_v50 = vmax.f32 %v6493_v33, %v6494_v4 }
 0x3bc   : > { %v6457_v32 = vmax.f32 %v6455_v1, %v6456_v8  ;;  %v6464_v37 = vmax.f32 %v6462_v26, %v6463_v18  ;;  %v6470_v0 = vrot.slane %v6469_v31, 1 }
 0x3bd   : > { %v6477_v42 = vrot.slane %v6476_v63, 1  ;;  %v6483_v46 = vmax.f32 %v6481_v55, %v6482_v12  ;;  %v6490_v60 = vmax.f32 %v6488_v61, %v6489_v21  ;;  %v6496_v54 = vrot.slane %v6495_v50, 2 }
 0x3be   : > { %v6471_v22 = vmax.f32 %v6469_v31, %v6470_v0  ;;  %v6718_v35 = vsel %vm6676_vm13, %v6457_v32, %v6450_v52 }
 0x3bf   : > { %v6719_v51 = vsel %vm6678_vm14, %v6464_v37, %v6718_v35  ;;  %v6478_v27 = vmax.f32 %v6476_v63, %v6477_v42  ;;  %v6484_v19 = vrot.slane %v6483_v46, 1  ;;  %v6491_v57 = vrot.slane %v6490_v60, 1 }
 0x3c0   : > { %v6497_v7 = vmax.f32 %v6495_v50, %v6496_v54  ;;  %v6720_v25 = vsel %vm6680_vm2, %v6471_v22, %v6719_v51  ;;  %v7353_v13 = vpop.f32.mrf.mxu1 }
 0x3c1   : > { %v6485_v2 = vmax.f32 %v6483_v46, %v6484_v19  ;;  %v6492_v56 = vmax.f32 %v6490_v60, %v6491_v57  ;;  %v6721_v41 = vsel %vm6682_vm8, %v6478_v27, %v6720_v25  ;;  %v5742_v47 = vadd.f32 %v10520_v14, %v7353_v13 }
 0x3c2   : > { %v6498_v48 = vrot.slane %v6497_v7, 1  ;;  %v5733_v36 = vpop.f32.mrf.mxu1 }
 0x3c3   : > { %v6722_v43 = vsel %vm6684_vm11, %v6485_v2, %v6721_v41  ;;  %v5734_v23 = vadd.f32 %v10520_v14, %v5733_v36  ;;  %v5790_v28 = vmax.f32 %v5742_v47, 0.0 }
 0x3c4   : > { %v6499_v39 = vmax.f32 %v6497_v7, %v6498_v48  ;;  %v6723_v15 = vsel %vm6686_vm0, %v6492_v56, %v6722_v43  ;;  %v7354_v17 = vpop.f32.mrf.mxu1 }
 0x3c5   : > { %v5788_v3 = vmax.f32 %v5734_v23, 0.0  ;;  %v5745_v59 = vadd.f32 %v10520_v14, %v7354_v17 }
 0x3c6   : > { %v6724_v34 = vsel %vm6688_vm6, %v6499_v39, %v6723_v15  ;;  %v5736_v53 = vpop.f32.mrf.mxu1 }
 0x3c7   : > { %6752 = vst [vmem:[%s10400_s13 + $0x28] sm:$0xff] %v6724_v34  ;;  %v5808_v40 = vmax.f32 %v5788_v3, %v5790_v28  ;;  %v5737_v45 = vadd.f32 %v10520_v14, %v5736_v53  ;;  %v5791_v5 = vmax.f32 %v5745_v59, 0.0 }
 0x3c9   : > { %v6032_v16 = vcombine.high %v5808_v40, %v5808_v40  ;;  %v6039_v49 = vrot.slane %v5808_v40, %v10366_v20  ;;  %v5789_v62 = vmax.f32 %v5737_v45, 0.0 }
 0x3cb   : > { %v6046_v38 = vrot.slane %v6032_v16, %v10366_v20  ;;  %v6047_v58 = vcombine.high %v6039_v49, %v6039_v49  ;;  %v6500_v9 = vsel %vm10740_vm12, %v6039_v49, -inf  ;;  %v5809_v6 = vmax.f32 %v5789_v62, %v5791_v5  ;;  %vm10748_vm12 = vmmov %vm10700_vm1 }
 0x3cc   : > { %v6501_v24 = vrot.slane %v6500_v9, 4 }
 0x3cd   : > { %v6048_v29 = vcombine.high %v6046_v38, %v6046_v38  ;;  %v6507_v30 = vsel %vm10700_vm1, %v6047_v58, -inf  ;;  %v6514_v33 = vsel %vm10741_vm7, %v6046_v38, -inf  ;;  %v6049_v10 = vcombine.high %v5809_v6, %v5809_v6  ;;  %vm10749_vm7 = vmmov %vm10700_vm1 }
 0x3ce   : > { %v6502_v1 = vmax.f32 %v6500_v9, %v6501_v24  ;;  %v6508_v26 = vrot.slane %v6507_v30, 4  ;;  %v6515_v11 = vrot.slane %v6514_v33, 4  ;;  %v6056_v44 = vrot.slane %v5809_v6, %v10366_v20 }
 0x3cf   : > { %v6521_v55 = vsel %vm10742_vm5, %v6048_v29, -inf  ;;  %v6063_v61 = vrot.slane %v6049_v10, %v10366_v20  ;;  %vm10750_vm5 = vmmov %vm10700_vm1 }
 0x3d0   : > { %v6503_v4 = vrot.slane %v6502_v1, 2  ;;  %v6509_v8 = vmax.f32 %v6507_v30, %v6508_v26  ;;  %v6516_v18 = vmax.f32 %v6514_v33, %v6515_v11  ;;  %v6522_v31 = vrot.slane %v6521_v55, 4 }
 0x3d1   : > { %v6064_v63 = vcombine.high %v6056_v44, %v6056_v44  ;;  %v6065_v12 = vcombine.high %v6063_v61, %v6063_v61  ;;  %v6528_v21 = vsel %vm10743_vm15, %v6056_v44, -inf  ;;  %v6542_v50 = vsel %vm10744_vm9, %v6063_v61, -inf  ;;  %vm10751_vm15 = vmmov %vm10700_vm1 }
 0x3d2   : > { %v6504_v52 = vmax.f32 %v6502_v1, %v6503_v4  ;;  %v6510_v32 = vrot.slane %v6509_v8, 2  ;;  %v6517_v37 = vrot.slane %v6516_v18, 2  ;;  %v6523_v0 = vmax.f32 %v6521_v55, %v6522_v31  ;;  %vm10752_vm9 = vmmov %vm10700_vm1 }
 0x3d3   : > { %v6529_v42 = vrot.slane %v6528_v21, 4  ;;  %v6535_v46 = vsel %vm10745_vm3, %v6064_v63, -inf  ;;  %v6543_v60 = vrot.slane %v6542_v50, 4  ;;  %v6549_v54 = vsel %vm10746_vm4, %v6065_v12, -inf  ;;  %vm10753_vm3 = vmmov %vm10700_vm1 }
 0x3d4   : > { %v6505_v22 = vrot.slane %v6504_v52, 1  ;;  %v6511_v35 = vmax.f32 %v6509_v8, %v6510_v32  ;;  %v6518_v51 = vmax.f32 %v6516_v18, %v6517_v37  ;;  %v6524_v27 = vrot.slane %v6523_v0, 2 }
 0x3d5   : > { %v6530_v19 = vmax.f32 %v6528_v21, %v6529_v42  ;;  %v6536_v57 = vrot.slane %v6535_v46, 4  ;;  %v6544_v7 = vmax.f32 %v6542_v50, %v6543_v60  ;;  %v6550_v25 = vrot.slane %v6549_v54, 4 }
 0x3d6   : > { %v6512_v2 = vrot.slane %v6511_v35, 1  ;;  %v6519_v56 = vrot.slane %v6518_v51, 1  ;;  %v6525_v41 = vmax.f32 %v6523_v0, %v6524_v27  ;;  %v6506_v36 = vmax.f32 %v6504_v52, %v6505_v22 }
 0x3d7   : > { %v6531_v13 = vrot.slane %v6530_v19, 2  ;;  %v6537_v48 = vmax.f32 %v6535_v46, %v6536_v57  ;;  %v6545_v47 = vrot.slane %v6544_v7, 2  ;;  %v6551_v43 = vmax.f32 %v6549_v54, %v6550_v25 }
 0x3d8   : > { %v6513_v39 = vmax.f32 %v6511_v35, %v6512_v2  ;;  %v6520_v15 = vmax.f32 %v6518_v51, %v6519_v56  ;;  %v6526_v23 = vrot.slane %v6525_v41, 1 }
 0x3d9   : > { %v6532_v17 = vmax.f32 %v6530_v19, %v6531_v13  ;;  %v6538_v34 = vrot.slane %v6537_v48, 2  ;;  %v6546_v28 = vmax.f32 %v6544_v7, %v6545_v47  ;;  %v6552_v3 = vrot.slane %v6551_v43, 2 }
 0x3da   : > { %v6527_v59 = vmax.f32 %v6525_v41, %v6526_v23  ;;  %v6725_v53 = vsel %vm6676_vm13, %v6513_v39, %v6506_v36 }
 0x3db   : > { %v6726_v40 = vsel %vm6678_vm14, %v6520_v15, %v6725_v53  ;;  %v6533_v45 = vrot.slane %v6532_v17, 1  ;;  %v6539_v16 = vmax.f32 %v6537_v48, %v6538_v34  ;;  %v6547_v49 = vrot.slane %v6546_v28, 1 }
 0x3dc   : > { %v6553_v5 = vmax.f32 %v6551_v43, %v6552_v3  ;;  %v6727_v62 = vsel %vm6680_vm2, %v6527_v59, %v6726_v40 }
 0x3dd   : > { %v6534_v38 = vmax.f32 %v6532_v17, %v6533_v45  ;;  %v6540_v58 = vrot.slane %v6539_v16, 1  ;;  %v6548_v9 = vmax.f32 %v6546_v28, %v6547_v49 }
 0x3de   : > { %v6554_v6 = vrot.slane %v6553_v5, 1 }
 0x3df   : > { %v6541_v24 = vmax.f32 %v6539_v16, %v6540_v58  ;;  %v6728_v29 = vsel %vm6682_vm8, %v6534_v38, %v6727_v62 }
 0x3e0   : > { %v6555_v30 = vmax.f32 %v6553_v5, %v6554_v6 }
 0x3e1   : > { %v6729_v33 = vsel %vm6684_vm11, %v6541_v24, %v6728_v29 }
 0x3e2   : > { %v6730_v10 = vsel %vm6686_vm0, %v6548_v9, %v6729_v33 }
 0x3e3   : > { %v6731_v1 = vsel %vm6688_vm6, %v6555_v30, %v6730_v10  ;;  %v7357_v26 = vpop.f32.mrf.mxu1 }
 0x3e4   : > { %6753 = vst [vmem:[%s10400_s13 + $0x30] sm:$0xff] %v6731_v1  ;;  %v5758_v11 = vadd.f32 %v10520_v14, %v7357_v26 }
 0x3e5   : > { %v5749_v44 = vpop.f32.mrf.mxu1 }
 0x3e6   : > { %v5750_v55 = vadd.f32 %v10520_v14, %v5749_v44  ;;  %v5794_v4 = vmax.f32 %v5758_v11, 0.0 }
 0x3e7   : > { %v7358_v61 = vpop.f32.mrf.mxu1 }
 0x3e8   : > { %v5792_v8 = vmax.f32 %v5750_v55, 0.0  ;;  %v5761_v18 = vadd.f32 %v10520_v14, %v7358_v61 }
 0x3e9   : > { %v5752_v31 = vpop.f32.mrf.mxu1 }
 0x3ea   : > { %v5810_v63 = vmax.f32 %v5792_v8, %v5794_v4  ;;  %v5753_v12 = vadd.f32 %v10520_v14, %v5752_v31  ;;  %v5795_v52 = vmax.f32 %v5761_v18, 0.0 }
 0x3ec   : > { %v6066_v21 = vcombine.high %v5810_v63, %v5810_v63  ;;  %v6073_v50 = vrot.slane %v5810_v63, %v10366_v20  ;;  %v5793_v32 = vmax.f32 %v5753_v12, 0.0 }
 0x3ee   : > { %v6080_v37 = vrot.slane %v6066_v21, %v10366_v20  ;;  %v6081_v0 = vcombine.high %v6073_v50, %v6073_v50  ;;  %v6556_v42 = vsel %vm10747_vm10, %v6073_v50, -inf  ;;  %v5811_v46 = vmax.f32 %v5793_v32, %v5795_v52 }
 0x3ef   : > { %v6557_v60 = vrot.slane %v6556_v42, 4 }
 0x3f0   : > { %v6082_v54 = vcombine.high %v6080_v37, %v6080_v37  ;;  %v6563_v22 = vsel %vm10748_vm12, %v6081_v0, -inf  ;;  %v6570_v35 = vsel %vm10700_vm1, %v6080_v37, -inf  ;;  %v6083_v51 = vcombine.high %v5811_v46, %v5811_v46 }
 0x3f1   : > { %v6558_v27 = vmax.f32 %v6556_v42, %v6557_v60  ;;  %v6564_v14 = vrot.slane %v6563_v22, 4  ;;  %v6571_v19 = vrot.slane %v6570_v35, 4  ;;  %v6090_v57 = vrot.slane %v5811_v46, %v10366_v20 }
 0x3f2   : > { %v6577_v7 = vsel %vm10749_vm7, %v6082_v54, -inf  ;;  %v6097_v25 = vrot.slane %v6083_v51, %v10366_v20 }
 0x3f3   : > { %v6559_v2 = vrot.slane %v6558_v27, 2  ;;  %v6565_v56 = vmax.f32 %v6563_v22, %v6564_v14  ;;  %v6572_v41 = vmax.f32 %v6570_v35, %v6571_v19  ;;  %v6578_v13 = vrot.slane %v6577_v7, 4 }
 0x3f4   : > { %v6098_v48 = vcombine.high %v6090_v57, %v6090_v57  ;;  %v6099_v47 = vcombine.high %v6097_v25, %v6097_v25  ;;  %v6584_v43 = vsel %vm10750_vm5, %v6090_v57, -inf  ;;  %v6598_v36 = vsel %vm10751_vm15, %v6097_v25, -inf }
 0x3f5   : > { %v6560_v39 = vmax.f32 %v6558_v27, %v6559_v2  ;;  %v6566_v15 = vrot.slane %v6565_v56, 2  ;;  %v6573_v23 = vrot.slane %v6572_v41, 2  ;;  %v6579_v17 = vmax.f32 %v6577_v7, %v6578_v13 }
 0x3f6   : > { %v6585_v34 = vrot.slane %v6584_v43, 4  ;;  %v6591_v28 = vsel %vm10752_vm9, %v6098_v48, -inf  ;;  %v6599_v3 = vrot.slane %v6598_v36, 4  ;;  %v6605_v20 = vsel %vm10753_vm3, %v6099_v47, -inf }
 0x3f7   : > { %v6561_v59 = vrot.slane %v6560_v39, 1  ;;  %v6567_v53 = vmax.f32 %v6565_v56, %v6566_v15  ;;  %v6574_v40 = vmax.f32 %v6572_v41, %v6573_v23  ;;  %v6580_v45 = vrot.slane %v6579_v17, 2 }
 0x3f8   : > { %v6586_v16 = vmax.f32 %v6584_v43, %v6585_v34  ;;  %v6592_v49 = vrot.slane %v6591_v28, 4  ;;  %v6600_v5 = vmax.f32 %v6598_v36, %v6599_v3  ;;  %v6606_v62 = vrot.slane %v6605_v20, 4 }
 0x3f9   : > { %v6568_v38 = vrot.slane %v6567_v53, 1  ;;  %v6575_v58 = vrot.slane %v6574_v40, 1  ;;  %v6581_v9 = vmax.f32 %v6579_v17, %v6580_v45  ;;  %v6562_v33 = vmax.f32 %v6560_v39, %v6561_v59 }
 0x3fa   : > { %v6587_v6 = vrot.slane %v6586_v16, 2  ;;  %v6593_v24 = vmax.f32 %v6591_v28, %v6592_v49  ;;  %v6601_v29 = vrot.slane %v6600_v5, 2  ;;  %v6607_v30 = vmax.f32 %v6605_v20, %v6606_v62 }
 0x3fb   : > { %v6569_v10 = vmax.f32 %v6567_v53, %v6568_v38  ;;  %v6576_v1 = vmax.f32 %v6574_v40, %v6575_v58  ;;  %v6582_v26 = vrot.slane %v6581_v9, 1 }
 0x3fc   : > { %v6588_v11 = vmax.f32 %v6586_v16, %v6587_v6  ;;  %v6594_v44 = vrot.slane %v6593_v24, 2  ;;  %v6602_v55 = vmax.f32 %v6600_v5, %v6601_v29  ;;  %v6608_v61 = vrot.slane %v6607_v30, 2 }
 0x3fd   : > { %v6583_v4 = vmax.f32 %v6581_v9, %v6582_v26  ;;  %v6732_v8 = vsel %vm6676_vm13, %v6569_v10, %v6562_v33 }
 0x3fe   : > { %v6733_v18 = vsel %vm6678_vm14, %v6576_v1, %v6732_v8  ;;  %v6589_v31 = vrot.slane %v6588_v11, 1  ;;  %v6595_v63 = vmax.f32 %v6593_v24, %v6594_v44  ;;  %v6603_v12 = vrot.slane %v6602_v55, 1 }
 0x3ff   : > { %v6609_v21 = vmax.f32 %v6607_v30, %v6608_v61  ;;  %v6734_v50 = vsel %vm6680_vm2, %v6583_v4, %v6733_v18 }
 0x400   : > { %v6590_v52 = vmax.f32 %v6588_v11, %v6589_v31  ;;  %v6596_v32 = vrot.slane %v6595_v63, 1  ;;  %v6604_v37 = vmax.f32 %v6602_v55, %v6603_v12 }
 0x401   : > { %v6610_v0 = vrot.slane %v6609_v21, 1 }
 0x402   : > { %v6597_v42 = vmax.f32 %v6595_v63, %v6596_v32  ;;  %v6735_v46 = vsel %vm6682_vm8, %v6590_v52, %v6734_v50 }
 0x403   : > { %v6611_v60 = vmax.f32 %v6609_v21, %v6610_v0 }
 0x404   : > { %v6736_v54 = vsel %vm6684_vm11, %v6597_v42, %v6735_v46 }
 0x405   : > { %v6737_v22 = vsel %vm6686_vm0, %v6604_v37, %v6736_v54 }
 0x406   : > { %v6738_v35 = vsel %vm6688_vm6, %v6611_v60, %v6737_v22 }
 0x407   : > { %6754 = vst [vmem:[%s10400_s13 + $0x38] sm:$0xff] %v6738_v35 }
 0x408   : > { %7699 = shalt.err (!%p7696_p3)
}
 0x409   : > { %s7700_s15 = scalar_lea.hbm %s10576_s26, 1024  ;;  %s7704_s13 = scalar_lea.hbm %s10631_s5, 2048 }
 0x40a   : > { %p7701_p4 = scmp.ne.s32.totalorder %s10576_s26, %s7700_s15  ;;  %p7705_p9 = scmp.lt.s32.totalorder %s10576_s26, %s10631_s5 }
 0x40b   : > { %p7706_p10 = scmp.lt.s32.totalorder %s7704_s13, %s7700_s15 }
 0x40c   : > { %p7702_p7 = pnand %p7701_p4, %p7832_p5 }
 0x40d   : > { %p7707_p11 = por %p7706_p10, %p7705_p9 }
 0x40e   : > { %p7703_p8 = pneg %p7702_p7 }
 0x410   : > { %p7708_p12 = pnand %p7707_p11, %p7703_p8 }
 0x412   : > { %7711 = shalt.err (!%p7708_p12)
}
 0x413   : > { %s7763_s8 = smov 128  }
 0x414   : > { %7361 = dma.vmem_to_hbm [thread:$0]  (%p7832_p5), %s10579_s9, 1024, %s10576_s26, %s10585_s22, %s7763_s8, %s7763_s8, %s7749_s10  }
 0x415 PF: > { %p7367_p13 = scmp.ge.s32.totalorder %s7746_s21, 2  ;;  %s6784_s23 = sand.u32 1, %s7734_s18  }
 0x416   : > { %s6785_s25 = scalar_lea.sflag [#allocation4], %s6784_s23 }
 0x417   : > { %p7364_p0 = pnand %p7367_p13, %p7836_p6 }
 0x419   : > { %p7365_p1 = pneg %p7364_p0 }
 0x41b   : > { %7729 = dma.done.wait (%p7365_p1), %s6785_s25, 1024  }
 0x41c   : > { %7731 = vsyncadd (%p7365_p1), %s6785_s25, 4294966272  ;;  %p15_p2 = scmp.ge.s32.totalorder %s7819_s24, 4   ;;  %s10754_s18 = smov %s7738_s19 }
 0x41d   : > { %s10755_s19 = smov %s7742_s20  ;;  %s10756_s20 = smov %s7830_s27 }
 0x41e   : > { %s10757_s21 = smov %s7819_s24  ;;  %17 = sbr.rel (!%p15_p2) target bundleno = 3 (0x3), region = 78 }
 0x423   :  { %6790 = vsyncpa [#allocation4], 1 }
 0x424   :  { %6792 = vsyncpa [#allocation4 + $0x1], 1 }

</bundles_post_ra>
